<compile_context>
chip_gen: v6e
topology: v6e:2x2x1
jax: 0.10.0
libtpu: 0.0.40
codegen_flags: <defaults>
</compile_context>

<pallas_src>
import functools

import jax
import jax.numpy as jnp
from jax.experimental import pallas as pl
from jax.experimental.pallas import tpu as pltpu


# ----------------------------------------------------------------------------
# In-kernel multi-head attention (shared by the fused block kernels)
# ----------------------------------------------------------------------------
def _mha_compute(x, ctx, wq, bq, wkv, bkv, wo, bo, *, num_heads, scale):
    """x: (Lq,E) query rows, ctx: (Lk,E) key/value rows -> (Lq,E) attn output."""
    E = wq.shape[0]
    dh = E // num_heads

    q = jnp.dot(x, wq, preferred_element_type=jnp.float32) + bq        # (Lq, E)
    kv = jnp.dot(ctx, wkv, preferred_element_type=jnp.float32) + bkv   # (Lk, 2E)
    k = kv[:, :E]
    v = kv[:, E:]

    # Heads folded inside the kernel (static unroll); the output projection is
    # folded into the per-head loop:  concat_h(o_h) @ Wo == sum_h o_h @ Wo[h].
    acc = jnp.zeros((x.shape[0], E), jnp.float32)
    for h in range(num_heads):
        sl = slice(h * dh, (h + 1) * dh)
        qh, kh, vh = q[:, sl], k[:, sl], v[:, sl]
        # contract dh directly (no explicit k.T / XLU transpose materialization)
        s = jax.lax.dot_general(qh, kh, (((1,), (1,)), ((), ())),
                                preferred_element_type=jnp.float32) * scale
        p = jnp.exp(s - jnp.max(s, axis=-1, keepdims=True))
        p = p * pl.reciprocal(jnp.sum(p, axis=-1, keepdims=True), approx=True)
        oh = jnp.dot(p, vh, preferred_element_type=jnp.float32)         # (Lq, dh)
        acc = acc + jnp.dot(oh, wo[sl, :], preferred_element_type=jnp.float32)
    return acc + bo


# ----------------------------------------------------------------------------
# Fused kernels
# ----------------------------------------------------------------------------
def _embed_kernel(x_ref, w_ref, b_ref, o_ref, *, input_dim):
    """Linear(input_dim, E) + ReLU as input_dim broadcast-FMAs on the VPU."""
    x = x_ref[0]                      # (N, input_dim)
    w = w_ref[...]                    # (input_dim, E)
    acc = jnp.broadcast_to(b_ref[...], (x.shape[0], w.shape[1]))
    for i in range(input_dim):        # K=3 -> 3 FMAs, MXU stays free
        acc = acc + x[:, i:i + 1] * w[i:i + 1, :]
    o_ref[0] = jnp.maximum(acc, 0.0).astype(o_ref.dtype)


def _mha_ff_block_kernel(x_ref, ctx_ref, wq_ref, bq_ref, wkv_ref, bkv_ref,
                         wo_ref, bo_ref, w1_ref, b1_ref, w2_ref, b2_ref,
                         o_ref, *, num_heads, scale):
    """y = FF(MHA(x, ctx)) + MHA(x, ctx), fully fused for one batch element."""
    attn = _mha_compute(x_ref[0], ctx_ref[0],
                        wq_ref[...], bq_ref[...], wkv_ref[...], bkv_ref[...],
                        wo_ref[...], bo_ref[...],
                        num_heads=num_heads, scale=scale)                # (Lq, E)
    h1 = jnp.maximum(
        jnp.dot(attn, w1_ref[...], preferred_element_type=jnp.float32) + b1_ref[...],
        0.0)
    y = jnp.dot(h1, w2_ref[...], preferred_element_type=jnp.float32) + b2_ref[...] + attn
    o_ref[0] = y.astype(o_ref.dtype)


def _output_head_kernel(x_ref, ctx_ref, wq_ref, bq_ref, wkv_ref, bkv_ref,
                        wo_ref, bo_ref, w1_ref, b1_ref, w2_ref, b2_ref,
                        o_ref, *, num_heads, scale):
    """output_cross_attention(data, context=x) -> Linear -> ReLU -> Linear(.,1)."""
    attn = _mha_compute(x_ref[0], ctx_ref[0],
                        wq_ref[...], bq_ref[...], wkv_ref[...], bkv_ref[...],
                        wo_ref[...], bo_ref[...],
                        num_heads=num_heads, scale=scale)                # (N, E)
    h1 = jnp.maximum(
        jnp.dot(attn, w1_ref[...], preferred_element_type=jnp.float32) + b1_ref[...],
        0.0)                                                             # (N, E//2)
    # Final Linear(E//2, 1) as a lane reduction (w2 stored as a (1, E//2) row).
    out = jnp.sum(h1 * w2_ref[...], axis=-1, keepdims=True) + b2_ref[...]  # (N, 1)
    o_ref[0] = out.astype(o_ref.dtype)


# ----------------------------------------------------------------------------
# pallas_call wrappers
# ----------------------------------------------------------------------------
def _w_map(b):
    return (0, 0)


def input_embedding(inputs, w, b):
    B, N, in_dim = inputs.shape
    E = w.shape[1]
    return pl.pallas_call(
        functools.partial(_embed_kernel, input_dim=in_dim),
        out_shape=jax.ShapeDtypeStruct((B, N, E), inputs.dtype),
        grid=(B,),
        in_specs=[
            pl.BlockSpec((1, N, in_dim), lambda i: (i, 0, 0)),
            pl.BlockSpec((in_dim, E), _w_map),
            pl.BlockSpec((1, E), _w_map),
        ],
        out_specs=pl.BlockSpec((1, N, E), lambda i: (i, 0, 0)),
        compiler_params=pltpu.CompilerParams(dimension_semantics=("parallel",)),
    )(inputs, w, b)


def mha_ff_block(x, ctx, attn_p, ff_p, num_heads):
    """Fused (MultiheadAttention -> FeedForward + residual) for one layer.

    x:   (Bx, Lq, E) query; Bx may be 1 (shared latents, broadcast via index_map).
    ctx: (Bc, Lk, E) key/value source.
    """
    Bx, Lq, E = x.shape
    Bc, Lk, _ = ctx.shape
    B = max(Bx, Bc)
    scale = 1.0 / float((E // num_heads) ** 0.5)

    x_map = (lambda i: (i, 0, 0)) if Bx > 1 else (lambda i: (0, 0, 0))
    c_map = (lambda i: (i, 0, 0)) if Bc > 1 else (lambda i: (0, 0, 0))

    return pl.pallas_call(
        functools.partial(_mha_ff_block_kernel, num_heads=num_heads, scale=scale),
        out_shape=jax.ShapeDtypeStruct((B, Lq, E), x.dtype),
        grid=(B,),
        in_specs=[
            pl.BlockSpec((1, Lq, E), x_map),
            pl.BlockSpec((1, Lk, E), c_map),
            pl.BlockSpec((E, E), _w_map),       # wq
            pl.BlockSpec((1, E), _w_map),       # bq
            pl.BlockSpec((E, 2 * E), _w_map),   # wkv (packed K/V)
            pl.BlockSpec((1, 2 * E), _w_map),   # bkv
            pl.BlockSpec((E, E), _w_map),       # wo
            pl.BlockSpec((1, E), _w_map),       # bo
            pl.BlockSpec((E, E), _w_map),       # ff w1
            pl.BlockSpec((1, E), _w_map),       # ff b1
            pl.BlockSpec((E, E), _w_map),       # ff w2
            pl.BlockSpec((1, E), _w_map),       # ff b2
        ],
        out_specs=pl.BlockSpec((1, Lq, E), lambda i: (i, 0, 0)),
        compiler_params=pltpu.CompilerParams(dimension_semantics=("parallel",)),
    )(x, ctx, attn_p["wq"], attn_p["bq"], attn_p["wkv"], attn_p["bkv"],
      attn_p["wo"], attn_p["bo"], ff_p["w1"], ff_p["b1"], ff_p["w2"], ff_p["b2"])


def output_head(data, x, attn_p, head_p, num_heads):
    """Fused output_cross_attention(data, context=x) + output MLP -> (B, N, 1)."""
    B, N, E = data.shape
    _, Lk, _ = x.shape
    H2 = head_p["w1"].shape[1]
    scale = 1.0 / float((E // num_heads) ** 0.5)

    return pl.pallas_call(
        functools.partial(_output_head_kernel, num_heads=num_heads, scale=scale),
        out_shape=jax.ShapeDtypeStruct((B, N, 1), data.dtype),
        grid=(B,),
        in_specs=[
            pl.BlockSpec((1, N, E), lambda i: (i, 0, 0)),    # query = data
            pl.BlockSpec((1, Lk, E), lambda i: (i, 0, 0)),   # context = latents x
            pl.BlockSpec((E, E), _w_map),       # wq
            pl.BlockSpec((1, E), _w_map),       # bq
            pl.BlockSpec((E, 2 * E), _w_map),   # wkv
            pl.BlockSpec((1, 2 * E), _w_map),   # bkv
            pl.BlockSpec((E, E), _w_map),       # wo
            pl.BlockSpec((1, E), _w_map),       # bo
            pl.BlockSpec((E, H2), _w_map),      # out1 w
            pl.BlockSpec((1, H2), _w_map),      # out1 b
            pl.BlockSpec((1, H2), _w_map),      # out2 w (row form)
            pl.BlockSpec((1, 1), _w_map),       # out2 b
        ],
        out_specs=pl.BlockSpec((1, N, 1), lambda i: (i, 0, 0)),
        compiler_params=pltpu.CompilerParams(dimension_semantics=("parallel",)),
    )(data, x, attn_p["wq"], attn_p["bq"], attn_p["wkv"], attn_p["bkv"],
      attn_p["wo"], attn_p["bo"], head_p["w1"], head_p["b1"],
      head_p["w2"], head_p["b2"])


# ----------------------------------------------------------------------------
# Forward pass (matches HeatPredictor.forward)
# ----------------------------------------------------------------------------
def heat_predictor_forward(params, inputs, *, depth, num_cross_heads,
                           num_latent_heads, num_output_heads):
    """inputs: (B, N, input_dim) -> (B, N, 1)."""
    data = input_embedding(inputs, params["embed_w"], params["embed_b"])  # (B,N,E)

    # Latents broadcast over batch handled by the BlockSpec index_map (no HBM copy).
    x = params["latents"][None]                                           # (1,L,E)

    for _ in range(depth):
        x = mha_ff_block(x, data, params["cross_attn"], params["cross_ff"],
                         num_cross_heads)
        for attn_p, ff_p in params["latent_layers"]:
            x = mha_ff_block(x, x, attn_p, ff_p, num_latent_heads)

    return output_head(data, x, params["out_cross_attn"], params["out_head"],
                       num_output_heads)


# ----------------------------------------------------------------------------
# Deterministic parameter initialization (synthetic weights, no checkpoints)
# ----------------------------------------------------------------------------
def init_params(key, input_dim, E, num_latents, num_latent_layers):
    keys = iter(jax.random.split(key, 256))

    def lin(k_in, k_out):
        w = 0.02 * jax.random.normal(next(keys), (k_in, k_out), jnp.float32)
        b = jnp.zeros((1, k_out), jnp.float32)
        return w, b

    def attn():
        wq, bq = lin(E, E)
        wkv, bkv = lin(E, 2 * E)    # K and V projections packed -> one matmul
        wo, bo = lin(E, E)
        return {"wq": wq, "bq": bq, "wkv": wkv, "bkv": bkv, "wo": wo, "bo": bo}

    def ff():
        w1, b1 = lin(E, E)
        w2, b2 = lin(E, E)
        return {"w1": w1, "b1": b1, "w2": w2, "b2": b2}

    embed_w, embed_b = lin(input_dim, E)
    out1_w, out1_b = lin(E, E // 2)
    # Final Linear(E//2, 1) weight stored as a (1, E//2) lane row for the
    # in-kernel reduction (instead of a degenerate (E//2, 1) MXU matmul).
    out2_w = 0.02 * jax.random.normal(next(keys), (1, E // 2), jnp.float32)
    out2_b = jnp.zeros((1, 1), jnp.float32)

    return {
        "embed_w": embed_w, "embed_b": embed_b,
        "latents": 0.2 * jax.random.normal(next(keys), (num_latents, E),
                                           jnp.float32),
        "cross_attn": attn(), "cross_ff": ff(),
        "latent_layers": [(attn(), ff()) for _ in range(num_latent_layers)],
        "out_cross_attn": attn(),
        "out_head": {"w1": out1_w, "b1": out1_b, "w2": out2_w, "b2": out2_b},
    }


# ----------------------------------------------------------------------------
if __name__ == "__main__":
    # Small, module-consistent shapes.
    B, N_PTS, INPUT_DIM = 2, 16, 3          # batch of point clouds, xyz points
    E = 32                                   # input_embedding_dim
    NUM_LATENTS = 8
    DEPTH = 2
    NUM_LATENT_LAYERS = 2
    NUM_CROSS_HEADS = NUM_LATENT_HEADS = NUM_OUTPUT_HEADS = 4

    key = jax.random.PRNGKey(0)
    pkey, xkey = jax.random.split(key)
    params = init_params(pkey, INPUT_DIM, E, NUM_LATENTS, NUM_LATENT_LAYERS)
    inputs = jax.random.normal(xkey, (B, N_PTS, INPUT_DIM), jnp.float32)

    fwd = jax.jit(functools.partial(
        heat_predictor_forward,
        depth=DEPTH,
        num_cross_heads=NUM_CROSS_HEADS,
        num_latent_heads=NUM_LATENT_HEADS,
        num_output_heads=NUM_OUTPUT_HEADS,
    ))

    out = fwd(params, inputs)
    out = jax.block_until_ready(out)

    assert out.shape == (B, N_PTS, 1)
    assert bool(jnp.all(jnp.isfinite(out)))
    print("KERNEL_OK")
</pallas_src>

<mosaic_0001>
module attributes {stable_mosaic.version = 11 : i64} {
  func.func @_embed_kernel(%arg0: i32, %arg1: memref<1x16x3xf32, #tpu.memory_space<vmem>>, %arg2: memref<3x32xf32, #tpu.memory_space<vmem>>, %arg3: memref<1x32xf32, #tpu.memory_space<vmem>>, %arg4: memref<1x16x32xf32, #tpu.memory_space<vmem>>) attributes {dimension_semantics = [#tpu.dimension_semantics<parallel>], iteration_bounds = array<i64: 2>, scalar_prefetch = 0 : i64, scratch_operands = 0 : i64, tpu.core_type = #tpu.core_type<tc>, window_params = [{transform_indices = @transform_0, window_bounds = array<i64: 1, 16, 3>}, {pipeline_mode = #tpu.pipeline_mode<synchronous>, transform_indices = @transform_1, window_bounds = array<i64: 3, 32>}, {pipeline_mode = #tpu.pipeline_mode<synchronous>, transform_indices = @transform_2, window_bounds = array<i64: 1, 32>}, {transform_indices = @transform_3, window_bounds = array<i64: 1, 16, 32>}]} {
    %c0 = arith.constant 0 : index
    %c0_0 = arith.constant 0 : index
    %c0_1 = arith.constant 0 : index
    %0 = vector.load %arg1[%c0, %c0_0, %c0_1] : memref<1x16x3xf32, #tpu.memory_space<vmem>>, vector<1x16x3xf32>
    %1 = vector.shape_cast %0 : vector<1x16x3xf32> to vector<16x3xf32>
    %c0_2 = arith.constant 0 : index
    %c0_3 = arith.constant 0 : index
    %2 = vector.load %arg2[%c0_2, %c0_3] : memref<3x32xf32, #tpu.memory_space<vmem>>, vector<3x32xf32>
    %c0_4 = arith.constant 0 : index
    %c0_5 = arith.constant 0 : index
    %3 = vector.load %arg3[%c0_4, %c0_5] : memref<1x32xf32, #tpu.memory_space<vmem>>, vector<1x32xf32>
    %4 = vector.shape_cast %3 : vector<1x32xf32> to vector<1x32xf32>
    %5 = vector.broadcast %4 : vector<1x32xf32> to vector<16x32xf32>
    %6 = vector.extract_strided_slice %1 {offsets = [0, 0], sizes = [16, 1], strides = [1, 1]} : vector<16x3xf32> to vector<16x1xf32>
    %7 = vector.extract_strided_slice %2 {offsets = [0, 0], sizes = [1, 32], strides = [1, 1]} : vector<3x32xf32> to vector<1x32xf32>
    %8 = vector.broadcast %6 : vector<16x1xf32> to vector<16x32xf32>
    %9 = vector.broadcast %7 : vector<1x32xf32> to vector<16x32xf32>
    %10 = arith.mulf %8, %9 : vector<16x32xf32>
    %11 = arith.addf %5, %10 : vector<16x32xf32>
    %12 = vector.extract_strided_slice %1 {offsets = [0, 1], sizes = [16, 1], strides = [1, 1]} : vector<16x3xf32> to vector<16x1xf32>
    %13 = vector.extract_strided_slice %2 {offsets = [1, 0], sizes = [1, 32], strides = [1, 1]} : vector<3x32xf32> to vector<1x32xf32>
    %14 = vector.broadcast %12 : vector<16x1xf32> to vector<16x32xf32>
    %15 = vector.broadcast %13 : vector<1x32xf32> to vector<16x32xf32>
    %16 = arith.mulf %14, %15 : vector<16x32xf32>
    %17 = arith.addf %11, %16 : vector<16x32xf32>
    %18 = vector.extract_strided_slice %1 {offsets = [0, 2], sizes = [16, 1], strides = [1, 1]} : vector<16x3xf32> to vector<16x1xf32>
    %19 = vector.extract_strided_slice %2 {offsets = [2, 0], sizes = [1, 32], strides = [1, 1]} : vector<3x32xf32> to vector<1x32xf32>
    %20 = vector.broadcast %18 : vector<16x1xf32> to vector<16x32xf32>
    %21 = vector.broadcast %19 : vector<1x32xf32> to vector<16x32xf32>
    %22 = arith.mulf %20, %21 : vector<16x32xf32>
    %23 = arith.addf %17, %22 : vector<16x32xf32>
    %cst = arith.constant 0.000000e+00 : f32
    %24 = vector.broadcast %cst : f32 to vector<16x32xf32>
    %25 = arith.maximumf %23, %24 : vector<16x32xf32>
    %c0_6 = arith.constant 0 : index
    %c0_7 = arith.constant 0 : index
    %c0_8 = arith.constant 0 : index
    %26 = vector.load %arg4[%c0_6, %c0_7, %c0_8] : memref<1x16x32xf32, #tpu.memory_space<vmem>>, vector<1x16x32xf32>
    %27 = vector.shape_cast %26 : vector<1x16x32xf32> to vector<16x32xf32>
    %28 = vector.shape_cast %25 : vector<16x32xf32> to vector<1x16x32xf32>
    tpu.vector_store %arg4[%c0_6, %c0_7, %c0_8], %28 {strides = array<i32>} : memref<1x16x32xf32, #tpu.memory_space<vmem>>, vector<1x16x32xf32>,
    return
  }
  func.func @transform_0(%arg0: i32) -> (i32, i32, i32) {
    %c0_i32 = arith.constant 0 : i32
    %c0_i32_0 = arith.constant 0 : i32
    %c0_i32_1 = arith.constant 0 : i32
    return %arg0, %c0_i32, %c0_i32_0 : i32, i32, i32
  }
  func.func @transform_1(%arg0: i32) -> (i32, i32) {
    %c0_i32 = arith.constant 0 : i32
    %c0_i32_0 = arith.constant 0 : i32
    %c0_i32_1 = arith.constant 0 : i32
    return %c0_i32, %c0_i32_0 : i32, i32
  }
  func.func @transform_2(%arg0: i32) -> (i32, i32) {
    %c0_i32 = arith.constant 0 : i32
    %c0_i32_0 = arith.constant 0 : i32
    %c0_i32_1 = arith.constant 0 : i32
    return %c0_i32, %c0_i32_0 : i32, i32
  }
  func.func @transform_3(%arg0: i32) -> (i32, i32, i32) {
    %c0_i32 = arith.constant 0 : i32
    %c0_i32_0 = arith.constant 0 : i32
    %c0_i32_1 = arith.constant 0 : i32
    return %arg0, %c0_i32, %c0_i32_0 : i32, i32, i32
  }
}

module attributes {stable_mosaic.version = 11 : i64} {
  func.func @_mha_ff_block_kernel(%arg0: i32, %arg1: memref<1x8x32xf32, #tpu.memory_space<vmem>>, %arg2: memref<1x16x32xf32, #tpu.memory_space<vmem>>, %arg3: memref<32x32xf32, #tpu.memory_space<vmem>>, %arg4: memref<1x32xf32, #tpu.memory_space<vmem>>, %arg5: memref<32x64xf32, #tpu.memory_space<vmem>>, %arg6: memref<1x64xf32, #tpu.memory_space<vmem>>, %arg7: memref<32x32xf32, #tpu.memory_space<vmem>>, %arg8: memref<1x32xf32, #tpu.memory_space<vmem>>, %arg9: memref<32x32xf32, #tpu.memory_space<vmem>>, %arg10: memref<1x32xf32, #tpu.memory_space<vmem>>, %arg11: memref<32x32xf32, #tpu.memory_space<vmem>>, %arg12: memref<1x32xf32, #tpu.memory_space<vmem>>, %arg13: memref<1x8x32xf32, #tpu.memory_space<vmem>>) attributes {dimension_semantics = [#tpu.dimension_semantics<parallel>], iteration_bounds = array<i64: 2>, scalar_prefetch = 0 : i64, scratch_operands = 0 : i64, tpu.core_type = #tpu.core_type<tc>, window_params = [{pipeline_mode = #tpu.pipeline_mode<synchronous>, transform_indices = @transform_0, window_bounds = array<i64: 1, 8, 32>}, {transform_indices = @transform_1, window_bounds = array<i64: 1, 16, 32>}, {pipeline_mode = #tpu.pipeline_mode<synchronous>, transform_indices = @transform_2, window_bounds = array<i64: 32, 32>}, {pipeline_mode = #tpu.pipeline_mode<synchronous>, transform_indices = @transform_3, window_bounds = array<i64: 1, 32>}, {pipeline_mode = #tpu.pipeline_mode<synchronous>, transform_indices = @transform_4, window_bounds = array<i64: 32, 64>}, {pipeline_mode = #tpu.pipeline_mode<synchronous>, transform_indices = @transform_5, window_bounds = array<i64: 1, 64>}, {pipeline_mode = #tpu.pipeline_mode<synchronous>, transform_indices = @transform_6, window_bounds = array<i64: 32, 32>}, {pipeline_mode = #tpu.pipeline_mode<synchronous>, transform_indices = @transform_7, window_bounds = array<i64: 1, 32>}, {pipeline_mode = #tpu.pipeline_mode<synchronous>, transform_indices = @transform_8, window_bounds = array<i64: 32, 32>}, {pipeline_mode = #tpu.pipeline_mode<synchronous>, transform_indices = @transform_9, window_bounds = array<i64: 1, 32>}, {pipeline_mode = #tpu.pipeline_mode<synchronous>, transform_indices = @transform_10, window_bounds = array<i64: 32, 32>}, {pipeline_mode = #tpu.pipeline_mode<synchronous>, transform_indices = @transform_11, window_bounds = array<i64: 1, 32>}, {transform_indices = @transform_12, window_bounds = array<i64: 1, 8, 32>}]} {
    %c0 = arith.constant 0 : index
    %c0_0 = arith.constant 0 : index
    %c0_1 = arith.constant 0 : index
    %0 = vector.load %arg1[%c0, %c0_0, %c0_1] : memref<1x8x32xf32, #tpu.memory_space<vmem>>, vector<1x8x32xf32>
    %1 = vector.shape_cast %0 : vector<1x8x32xf32> to vector<8x32xf32>
    %c0_2 = arith.constant 0 : index
    %c0_3 = arith.constant 0 : index
    %c0_4 = arith.constant 0 : index
    %2 = vector.load %arg2[%c0_2, %c0_3, %c0_4] : memref<1x16x32xf32, #tpu.memory_space<vmem>>, vector<1x16x32xf32>
    %3 = vector.shape_cast %2 : vector<1x16x32xf32> to vector<16x32xf32>
    %c0_5 = arith.constant 0 : index
    %c0_6 = arith.constant 0 : index
    %4 = vector.load %arg3[%c0_5, %c0_6] : memref<32x32xf32, #tpu.memory_space<vmem>>, vector<32x32xf32>
    %c0_7 = arith.constant 0 : index
    %c0_8 = arith.constant 0 : index
    %5 = vector.load %arg4[%c0_7, %c0_8] : memref<1x32xf32, #tpu.memory_space<vmem>>, vector<1x32xf32>
    %c0_9 = arith.constant 0 : index
    %c0_10 = arith.constant 0 : index
    %6 = vector.load %arg5[%c0_9, %c0_10] : memref<32x64xf32, #tpu.memory_space<vmem>>, vector<32x64xf32>
    %c0_11 = arith.constant 0 : index
    %c0_12 = arith.constant 0 : index
    %7 = vector.load %arg6[%c0_11, %c0_12] : memref<1x64xf32, #tpu.memory_space<vmem>>, vector<1x64xf32>
    %c0_13 = arith.constant 0 : index
    %c0_14 = arith.constant 0 : index
    %8 = vector.load %arg7[%c0_13, %c0_14] : memref<32x32xf32, #tpu.memory_space<vmem>>, vector<32x32xf32>
    %c0_15 = arith.constant 0 : index
    %c0_16 = arith.constant 0 : index
    %9 = vector.load %arg8[%c0_15, %c0_16] : memref<1x32xf32, #tpu.memory_space<vmem>>, vector<1x32xf32>
    %cst = arith.constant dense<0.000000e+00> : vector<8x32xf32>
    %10 = tpu.matmul %1, %4, %cst {dimension_numbers = #tpu.dot_dimension_numbers<[1], [0], [0], [1], [0, 0, 1, 1], [], []>} : vector<8x32xf32>, vector<32x32xf32>, vector<8x32xf32> -> vector<8x32xf32>
    %11 = vector.broadcast %5 : vector<1x32xf32> to vector<8x32xf32>
    %12 = arith.addf %10, %11 : vector<8x32xf32>
    %cst_17 = arith.constant dense<0.000000e+00> : vector<16x64xf32>
    %13 = tpu.matmul %3, %6, %cst_17 {dimension_numbers = #tpu.dot_dimension_numbers<[1], [0], [0], [1], [0, 0, 1, 1], [], []>} : vector<16x32xf32>, vector<32x64xf32>, vector<16x64xf32> -> vector<16x64xf32>
    %14 = vector.broadcast %7 : vector<1x64xf32> to vector<16x64xf32>
    %15 = arith.addf %13, %14 : vector<16x64xf32>
    %16 = vector.extract_strided_slice %15 {offsets = [0, 0], sizes = [16, 32], strides = [1, 1]} : vector<16x64xf32> to vector<16x32xf32>
    %17 = vector.extract_strided_slice %15 {offsets = [0, 32], sizes = [16, 32], strides = [1, 1]} : vector<16x64xf32> to vector<16x32xf32>
    %cst_18 = arith.constant 0.000000e+00 : f32
    %18 = vector.broadcast %cst_18 : f32 to vector<8x32xf32>
    %19 = vector.extract_strided_slice %12 {offsets = [0, 0], sizes = [8, 8], strides = [1, 1]} : vector<8x32xf32> to vector<8x8xf32>
    %20 = vector.extract_strided_slice %16 {offsets = [0, 0], sizes = [16, 8], strides = [1, 1]} : vector<16x32xf32> to vector<16x8xf32>
    %21 = vector.extract_strided_slice %17 {offsets = [0, 0], sizes = [16, 8], strides = [1, 1]} : vector<16x32xf32> to vector<16x8xf32>
    %cst_19 = arith.constant dense<0.000000e+00> : vector<8x16xf32>
    %22 = tpu.matmul %19, %20, %cst_19 {dimension_numbers = #tpu.dot_dimension_numbers<[1], [1], [0], [0], [0, 0, 1, 0], [], []>} : vector<8x8xf32>, vector<16x8xf32>, vector<8x16xf32> -> vector<8x16xf32>
    %cst_20 = arith.constant 0.353553385 : f32
    %23 = vector.broadcast %cst_20 : f32 to vector<8x16xf32>
    %24 = arith.mulf %22, %23 : vector<8x16xf32>
    %cst_21 = arith.constant dense<0xFF800000> : vector<8xf32>
    %25 = vector.multi_reduction <maximumf>, %24, %cst_21 [1] : vector<8x16xf32> to vector<8xf32>
    %26 = vector.shape_cast %25 : vector<8xf32> to vector<8x1xf32>
    %27 = vector.broadcast %26 : vector<8x1xf32> to vector<8x16xf32>
    %28 = arith.subf %24, %27 : vector<8x16xf32>
    %29 = math.exp %28 : vector<8x16xf32>
    %cst_22 = arith.constant dense<0.000000e+00> : vector<8xf32>
    %30 = vector.multi_reduction <add>, %29, %cst_22 [1] : vector<8x16xf32> to vector<8xf32>
    %31 = vector.shape_cast %30 : vector<8xf32> to vector<8x1xf32>
    %32 = tpu.reciprocal %31 {approx = true} : vector<8x1xf32> -> vector<8x1xf32>
    %33 = vector.broadcast %32 : vector<8x1xf32> to vector<8x16xf32>
    %34 = arith.mulf %29, %33 : vector<8x16xf32>
    %cst_23 = arith.constant dense<0.000000e+00> : vector<8x8xf32>
    %35 = tpu.matmul %34, %21, %cst_23 {dimension_numbers = #tpu.dot_dimension_numbers<[1], [0], [0], [1], [0, 0, 1, 1], [], []>} : vector<8x16xf32>, vector<16x8xf32>, vector<8x8xf32> -> vector<8x8xf32>
    %36 = vector.extract_strided_slice %8 {offsets = [0, 0], sizes = [8, 32], strides = [1, 1]} : vector<32x32xf32> to vector<8x32xf32>
    %cst_24 = arith.constant dense<0.000000e+00> : vector<8x32xf32>
    %37 = tpu.matmul %35, %36, %cst_24 {dimension_numbers = #tpu.dot_dimension_numbers<[1], [0], [0], [1], [0, 0, 1, 1], [], []>} : vector<8x8xf32>, vector<8x32xf32>, vector<8x32xf32> -> vector<8x32xf32>
    %38 = arith.addf %18, %37 : vector<8x32xf32>
    %39 = vector.extract_strided_slice %12 {offsets = [0, 8], sizes = [8, 8], strides = [1, 1]} : vector<8x32xf32> to vector<8x8xf32>
    %40 = vector.extract_strided_slice %16 {offsets = [0, 8], sizes = [16, 8], strides = [1, 1]} : vector<16x32xf32> to vector<16x8xf32>
    %41 = vector.extract_strided_slice %17 {offsets = [0, 8], sizes = [16, 8], strides = [1, 1]} : vector<16x32xf32> to vector<16x8xf32>
    %cst_25 = arith.constant dense<0.000000e+00> : vector<8x16xf32>
    %42 = tpu.matmul %39, %40, %cst_25 {dimension_numbers = #tpu.dot_dimension_numbers<[1], [1], [0], [0], [0, 0, 1, 0], [], []>} : vector<8x8xf32>, vector<16x8xf32>, vector<8x16xf32> -> vector<8x16xf32>
    %cst_26 = arith.constant 0.353553385 : f32
    %43 = vector.broadcast %cst_26 : f32 to vector<8x16xf32>
    %44 = arith.mulf %42, %43 : vector<8x16xf32>
    %cst_27 = arith.constant dense<0xFF800000> : vector<8xf32>
    %45 = vector.multi_reduction <maximumf>, %44, %cst_27 [1] : vector<8x16xf32> to vector<8xf32>
    %46 = vector.shape_cast %45 : vector<8xf32> to vector<8x1xf32>
    %47 = vector.broadcast %46 : vector<8x1xf32> to vector<8x16xf32>
    %48 = arith.subf %44, %47 : vector<8x16xf32>
    %49 = math.exp %48 : vector<8x16xf32>
    %cst_28 = arith.constant dense<0.000000e+00> : vector<8xf32>
    %50 = vector.multi_reduction <add>, %49, %cst_28 [1] : vector<8x16xf32> to vector<8xf32>
    %51 = vector.shape_cast %50 : vector<8xf32> to vector<8x1xf32>
    %52 = tpu.reciprocal %51 {approx = true} : vector<8x1xf32> -> vector<8x1xf32>
    %53 = vector.broadcast %52 : vector<8x1xf32> to vector<8x16xf32>
    %54 = arith.mulf %49, %53 : vector<8x16xf32>
    %cst_29 = arith.constant dense<0.000000e+00> : vector<8x8xf32>
    %55 = tpu.matmul %54, %41, %cst_29 {dimension_numbers = #tpu.dot_dimension_numbers<[1], [0], [0], [1], [0, 0, 1, 1], [], []>} : vector<8x16xf32>, vector<16x8xf32>, vector<8x8xf32> -> vector<8x8xf32>
    %56 = vector.extract_strided_slice %8 {offsets = [8, 0], sizes = [8, 32], strides = [1, 1]} : vector<32x32xf32> to vector<8x32xf32>
    %cst_30 = arith.constant dense<0.000000e+00> : vector<8x32xf32>
    %57 = tpu.matmul %55, %56, %cst_30 {dimension_numbers = #tpu.dot_dimension_numbers<[1], [0], [0], [1], [0, 0, 1, 1], [], []>} : vector<8x8xf32>, vector<8x32xf32>, vector<8x32xf32> -> vector<8x32xf32>
    %58 = arith.addf %38, %57 : vector<8x32xf32>
    %59 = vector.extract_strided_slice %12 {offsets = [0, 16], sizes = [8, 8], strides = [1, 1]} : vector<8x32xf32> to vector<8x8xf32>
    %60 = vector.extract_strided_slice %16 {offsets = [0, 16], sizes = [16, 8], strides = [1, 1]} : vector<16x32xf32> to vector<16x8xf32>
    %61 = vector.extract_strided_slice %17 {offsets = [0, 16], sizes = [16, 8], strides = [1, 1]} : vector<16x32xf32> to vector<16x8xf32>
    %cst_31 = arith.constant dense<0.000000e+00> : vector<8x16xf32>
    %62 = tpu.matmul %59, %60, %cst_31 {dimension_numbers = #tpu.dot_dimension_numbers<[1], [1], [0], [0], [0, 0, 1, 0], [], []>} : vector<8x8xf32>, vector<16x8xf32>, vector<8x16xf32> -> vector<8x16xf32>
    %cst_32 = arith.constant 0.353553385 : f32
    %63 = vector.broadcast %cst_32 : f32 to vector<8x16xf32>
    %64 = arith.mulf %62, %63 : vector<8x16xf32>
    %cst_33 = arith.constant dense<0xFF800000> : vector<8xf32>
    %65 = vector.multi_reduction <maximumf>, %64, %cst_33 [1] : vector<8x16xf32> to vector<8xf32>
    %66 = vector.shape_cast %65 : vector<8xf32> to vector<8x1xf32>
    %67 = vector.broadcast %66 : vector<8x1xf32> to vector<8x16xf32>
    %68 = arith.subf %64, %67 : vector<8x16xf32>
    %69 = math.exp %68 : vector<8x16xf32>
    %cst_34 = arith.constant dense<0.000000e+00> : vector<8xf32>
    %70 = vector.multi_reduction <add>, %69, %cst_34 [1] : vector<8x16xf32> to vector<8xf32>
    %71 = vector.shape_cast %70 : vector<8xf32> to vector<8x1xf32>
    %72 = tpu.reciprocal %71 {approx = true} : vector<8x1xf32> -> vector<8x1xf32>
    %73 = vector.broadcast %72 : vector<8x1xf32> to vector<8x16xf32>
    %74 = arith.mulf %69, %73 : vector<8x16xf32>
    %cst_35 = arith.constant dense<0.000000e+00> : vector<8x8xf32>
    %75 = tpu.matmul %74, %61, %cst_35 {dimension_numbers = #tpu.dot_dimension_numbers<[1], [0], [0], [1], [0, 0, 1, 1], [], []>} : vector<8x16xf32>, vector<16x8xf32>, vector<8x8xf32> -> vector<8x8xf32>
    %76 = vector.extract_strided_slice %8 {offsets = [16, 0], sizes = [8, 32], strides = [1, 1]} : vector<32x32xf32> to vector<8x32xf32>
    %cst_36 = arith.constant dense<0.000000e+00> : vector<8x32xf32>
    %77 = tpu.matmul %75, %76, %cst_36 {dimension_numbers = #tpu.dot_dimension_numbers<[1], [0], [0], [1], [0, 0, 1, 1], [], []>} : vector<8x8xf32>, vector<8x32xf32>, vector<8x32xf32> -> vector<8x32xf32>
    %78 = arith.addf %58, %77 : vector<8x32xf32>
    %79 = vector.extract_strided_slice %12 {offsets = [0, 24], sizes = [8, 8], strides = [1, 1]} : vector<8x32xf32> to vector<8x8xf32>
    %80 = vector.extract_strided_slice %16 {offsets = [0, 24], sizes = [16, 8], strides = [1, 1]} : vector<16x32xf32> to vector<16x8xf32>
    %81 = vector.extract_strided_slice %17 {offsets = [0, 24], sizes = [16, 8], strides = [1, 1]} : vector<16x32xf32> to vector<16x8xf32>
    %cst_37 = arith.constant dense<0.000000e+00> : vector<8x16xf32>
    %82 = tpu.matmul %79, %80, %cst_37 {dimension_numbers = #tpu.dot_dimension_numbers<[1], [1], [0], [0], [0, 0, 1, 0], [], []>} : vector<8x8xf32>, vector<16x8xf32>, vector<8x16xf32> -> vector<8x16xf32>
    %cst_38 = arith.constant 0.353553385 : f32
    %83 = vector.broadcast %cst_38 : f32 to vector<8x16xf32>
    %84 = arith.mulf %82, %83 : vector<8x16xf32>
    %cst_39 = arith.constant dense<0xFF800000> : vector<8xf32>
    %85 = vector.multi_reduction <maximumf>, %84, %cst_39 [1] : vector<8x16xf32> to vector<8xf32>
    %86 = vector.shape_cast %85 : vector<8xf32> to vector<8x1xf32>
    %87 = vector.broadcast %86 : vector<8x1xf32> to vector<8x16xf32>
    %88 = arith.subf %84, %87 : vector<8x16xf32>
    %89 = math.exp %88 : vector<8x16xf32>
    %cst_40 = arith.constant dense<0.000000e+00> : vector<8xf32>
    %90 = vector.multi_reduction <add>, %89, %cst_40 [1] : vector<8x16xf32> to vector<8xf32>
    %91 = vector.shape_cast %90 : vector<8xf32> to vector<8x1xf32>
    %92 = tpu.reciprocal %91 {approx = true} : vector<8x1xf32> -> vector<8x1xf32>
    %93 = vector.broadcast %92 : vector<8x1xf32> to vector<8x16xf32>
    %94 = arith.mulf %89, %93 : vector<8x16xf32>
    %cst_41 = arith.constant dense<0.000000e+00> : vector<8x8xf32>
    %95 = tpu.matmul %94, %81, %cst_41 {dimension_numbers = #tpu.dot_dimension_numbers<[1], [0], [0], [1], [0, 0, 1, 1], [], []>} : vector<8x16xf32>, vector<16x8xf32>, vector<8x8xf32> -> vector<8x8xf32>
    %96 = vector.extract_strided_slice %8 {offsets = [24, 0], sizes = [8, 32], strides = [1, 1]} : vector<32x32xf32> to vector<8x32xf32>
    %cst_42 = arith.constant dense<0.000000e+00> : vector<8x32xf32>
    %97 = tpu.matmul %95, %96, %cst_42 {dimension_numbers = #tpu.dot_dimension_numbers<[1], [0], [0], [1], [0, 0, 1, 1], [], []>} : vector<8x8xf32>, vector<8x32xf32>, vector<8x32xf32> -> vector<8x32xf32>
    %98 = arith.addf %78, %97 : vector<8x32xf32>
    %99 = vector.broadcast %9 : vector<1x32xf32> to vector<8x32xf32>
    %100 = arith.addf %98, %99 : vector<8x32xf32>
    %c0_43 = arith.constant 0 : index
    %c0_44 = arith.constant 0 : index
    %101 = vector.load %arg9[%c0_43, %c0_44] : memref<32x32xf32, #tpu.memory_space<vmem>>, vector<32x32xf32>
    %cst_45 = arith.constant dense<0.000000e+00> : vector<8x32xf32>
    %102 = tpu.matmul %100, %101, %cst_45 {dimension_numbers = #tpu.dot_dimension_numbers<[1], [0], [0], [1], [0, 0, 1, 1], [], []>} : vector<8x32xf32>, vector<32x32xf32>, vector<8x32xf32> -> vector<8x32xf32>
    %c0_46 = arith.constant 0 : index
    %c0_47 = arith.constant 0 : index
    %103 = vector.load %arg10[%c0_46, %c0_47] : memref<1x32xf32, #tpu.memory_space<vmem>>, vector<1x32xf32>
    %104 = vector.broadcast %103 : vector<1x32xf32> to vector<8x32xf32>
    %105 = arith.addf %102, %104 : vector<8x32xf32>
    %cst_48 = arith.constant 0.000000e+00 : f32
    %106 = vector.broadcast %cst_48 : f32 to vector<8x32xf32>
    %107 = arith.maximumf %105, %106 : vector<8x32xf32>
    %c0_49 = arith.constant 0 : index
    %c0_50 = arith.constant 0 : index
    %108 = vector.load %arg11[%c0_49, %c0_50] : memref<32x32xf32, #tpu.memory_space<vmem>>, vector<32x32xf32>
    %cst_51 = arith.constant dense<0.000000e+00> : vector<8x32xf32>
    %109 = tpu.matmul %107, %108, %cst_51 {dimension_numbers = #tpu.dot_dimension_numbers<[1], [0], [0], [1], [0, 0, 1, 1], [], []>} : vector<8x32xf32>, vector<32x32xf32>, vector<8x32xf32> -> vector<8x32xf32>
    %c0_52 = arith.constant 0 : index
    %c0_53 = arith.constant 0 : index
    %110 = vector.load %arg12[%c0_52, %c0_53] : memref<1x32xf32, #tpu.memory_space<vmem>>, vector<1x32xf32>
    %111 = vector.broadcast %110 : vector<1x32xf32> to vector<8x32xf32>
    %112 = arith.addf %109, %111 : vector<8x32xf32>
    %113 = arith.addf %112, %100 : vector<8x32xf32>
    %c0_54 = arith.constant 0 : index
    %c0_55 = arith.constant 0 : index
    %c0_56 = arith.constant 0 : index
    %114 = vector.load %arg13[%c0_54, %c0_55, %c0_56] : memref<1x8x32xf32, #tpu.memory_space<vmem>>, vector<1x8x32xf32>
    %115 = vector.shape_cast %114 : vector<1x8x32xf32> to vector<8x32xf32>
    %116 = vector.shape_cast %113 : vector<8x32xf32> to vector<1x8x32xf32>
    tpu.vector_store %arg13[%c0_54, %c0_55, %c0_56], %116 {strides = array<i32>} : memref<1x8x32xf32, #tpu.memory_space<vmem>>, vector<1x8x32xf32>,
    return
  }
  func.func @transform_0(%arg0: i32) -> (i32, i32, i32) {
    %c0_i32 = arith.constant 0 : i32
    %c0_i32_0 = arith.constant 0 : i32
    %c0_i32_1 = arith.constant 0 : i32
    %c0_i32_2 = arith.constant 0 : i32
    return %c0_i32, %c0_i32_0, %c0_i32_1 : i32, i32, i32
  }
  func.func @transform_1(%arg0: i32) -> (i32, i32, i32) {
    %c0_i32 = arith.constant 0 : i32
    %c0_i32_0 = arith.constant 0 : i32
    %c0_i32_1 = arith.constant 0 : i32
    return %arg0, %c0_i32, %c0_i32_0 : i32, i32, i32
  }
  func.func @transform_2(%arg0: i32) -> (i32, i32) {
    %c0_i32 = arith.constant 0 : i32
    %c0_i32_0 = arith.constant 0 : i32
    %c0_i32_1 = arith.constant 0 : i32
    return %c0_i32, %c0_i32_0 : i32, i32
  }
  func.func @transform_3(%arg0: i32) -> (i32, i32) {
    %c0_i32 = arith.constant 0 : i32
    %c0_i32_0 = arith.constant 0 : i32
    %c0_i32_1 = arith.constant 0 : i32
    return %c0_i32, %c0_i32_0 : i32, i32
  }
  func.func @transform_4(%arg0: i32) -> (i32, i32) {
    %c0_i32 = arith.constant 0 : i32
    %c0_i32_0 = arith.constant 0 : i32
    %c0_i32_1 = arith.constant 0 : i32
    return %c0_i32, %c0_i32_0 : i32, i32
  }
  func.func @transform_5(%arg0: i32) -> (i32, i32) {
    %c0_i32 = arith.constant 0 : i32
    %c0_i32_0 = arith.constant 0 : i32
    %c0_i32_1 = arith.constant 0 : i32
    return %c0_i32, %c0_i32_0 : i32, i32
  }
  func.func @transform_6(%arg0: i32) -> (i32, i32) {
    %c0_i32 = arith.constant 0 : i32
    %c0_i32_0 = arith.constant 0 : i32
    %c0_i32_1 = arith.constant 0 : i32
    return %c0_i32, %c0_i32_0 : i32, i32
  }
  func.func @transform_7(%arg0: i32) -> (i32, i32) {
    %c0_i32 = arith.constant 0 : i32
    %c0_i32_0 = arith.constant 0 : i32
    %c0_i32_1 = arith.constant 0 : i32
    return %c0_i32, %c0_i32_0 : i32, i32
  }
  func.func @transform_8(%arg0: i32) -> (i32, i32) {
    %c0_i32 = arith.constant 0 : i32
    %c0_i32_0 = arith.constant 0 : i32
    %c0_i32_1 = arith.constant 0 : i32
    return %c0_i32, %c0_i32_0 : i32, i32
  }
  func.func @transform_9(%arg0: i32) -> (i32, i32) {
    %c0_i32 = arith.constant 0 : i32
    %c0_i32_0 = arith.constant 0 : i32
    %c0_i32_1 = arith.constant 0 : i32
    return %c0_i32, %c0_i32_0 : i32, i32
  }
  func.func @transform_10(%arg0: i32) -> (i32, i32) {
    %c0_i32 = arith.constant 0 : i32
    %c0_i32_0 = arith.constant 0 : i32
    %c0_i32_1 = arith.constant 0 : i32
    return %c0_i32, %c0_i32_0 : i32, i32
  }
  func.func @transform_11(%arg0: i32) -> (i32, i32) {
    %c0_i32 = arith.constant 0 : i32
    %c0_i32_0 = arith.constant 0 : i32
    %c0_i32_1 = arith.constant 0 : i32
    return %c0_i32, %c0_i32_0 : i32, i32
  }
  func.func @transform_12(%arg0: i32) -> (i32, i32, i32) {
    %c0_i32 = arith.constant 0 : i32
    %c0_i32_0 = arith.constant 0 : i32
    %c0_i32_1 = arith.constant 0 : i32
    return %arg0, %c0_i32, %c0_i32_0 : i32, i32, i32
  }
}

module attributes {stable_mosaic.version = 11 : i64} {
  func.func @_mha_ff_block_kernel(%arg0: i32, %arg1: memref<1x8x32xf32, #tpu.memory_space<vmem>>, %arg2: memref<1x8x32xf32, #tpu.memory_space<vmem>>, %arg3: memref<32x32xf32, #tpu.memory_space<vmem>>, %arg4: memref<1x32xf32, #tpu.memory_space<vmem>>, %arg5: memref<32x64xf32, #tpu.memory_space<vmem>>, %arg6: memref<1x64xf32, #tpu.memory_space<vmem>>, %arg7: memref<32x32xf32, #tpu.memory_space<vmem>>, %arg8: memref<1x32xf32, #tpu.memory_space<vmem>>, %arg9: memref<32x32xf32, #tpu.memory_space<vmem>>, %arg10: memref<1x32xf32, #tpu.memory_space<vmem>>, %arg11: memref<32x32xf32, #tpu.memory_space<vmem>>, %arg12: memref<1x32xf32, #tpu.memory_space<vmem>>, %arg13: memref<1x8x32xf32, #tpu.memory_space<vmem>>) attributes {dimension_semantics = [#tpu.dimension_semantics<parallel>], iteration_bounds = array<i64: 2>, scalar_prefetch = 0 : i64, scratch_operands = 0 : i64, tpu.core_type = #tpu.core_type<tc>, window_params = [{transform_indices = @transform_0, window_bounds = array<i64: 1, 8, 32>}, {transform_indices = @transform_1, window_bounds = array<i64: 1, 8, 32>}, {pipeline_mode = #tpu.pipeline_mode<synchronous>, transform_indices = @transform_2, window_bounds = array<i64: 32, 32>}, {pipeline_mode = #tpu.pipeline_mode<synchronous>, transform_indices = @transform_3, window_bounds = array<i64: 1, 32>}, {pipeline_mode = #tpu.pipeline_mode<synchronous>, transform_indices = @transform_4, window_bounds = array<i64: 32, 64>}, {pipeline_mode = #tpu.pipeline_mode<synchronous>, transform_indices = @transform_5, window_bounds = array<i64: 1, 64>}, {pipeline_mode = #tpu.pipeline_mode<synchronous>, transform_indices = @transform_6, window_bounds = array<i64: 32, 32>}, {pipeline_mode = #tpu.pipeline_mode<synchronous>, transform_indices = @transform_7, window_bounds = array<i64: 1, 32>}, {pipeline_mode = #tpu.pipeline_mode<synchronous>, transform_indices = @transform_8, window_bounds = array<i64: 32, 32>}, {pipeline_mode = #tpu.pipeline_mode<synchronous>, transform_indices = @transform_9, window_bounds = array<i64: 1, 32>}, {pipeline_mode = #tpu.pipeline_mode<synchronous>, transform_indices = @transform_10, window_bounds = array<i64: 32, 32>}, {pipeline_mode = #tpu.pipeline_mode<synchronous>, transform_indices = @transform_11, window_bounds = array<i64: 1, 32>}, {transform_indices = @transform_12, window_bounds = array<i64: 1, 8, 32>}]} {
    %c0 = arith.constant 0 : index
    %c0_0 = arith.constant 0 : index
    %c0_1 = arith.constant 0 : index
    %0 = vector.load %arg1[%c0, %c0_0, %c0_1] : memref<1x8x32xf32, #tpu.memory_space<vmem>>, vector<1x8x32xf32>
    %1 = vector.shape_cast %0 : vector<1x8x32xf32> to vector<8x32xf32>
    %c0_2 = arith.constant 0 : index
    %c0_3 = arith.constant 0 : index
    %c0_4 = arith.constant 0 : index
    %2 = vector.load %arg2[%c0_2, %c0_3, %c0_4] : memref<1x8x32xf32, #tpu.memory_space<vmem>>, vector<1x8x32xf32>
    %3 = vector.shape_cast %2 : vector<1x8x32xf32> to vector<8x32xf32>
    %c0_5 = arith.constant 0 : index
    %c0_6 = arith.constant 0 : index
    %4 = vector.load %arg3[%c0_5, %c0_6] : memref<32x32xf32, #tpu.memory_space<vmem>>, vector<32x32xf32>
    %c0_7 = arith.constant 0 : index
    %c0_8 = arith.constant 0 : index
    %5 = vector.load %arg4[%c0_7, %c0_8] : memref<1x32xf32, #tpu.memory_space<vmem>>, vector<1x32xf32>
    %c0_9 = arith.constant 0 : index
    %c0_10 = arith.constant 0 : index
    %6 = vector.load %arg5[%c0_9, %c0_10] : memref<32x64xf32, #tpu.memory_space<vmem>>, vector<32x64xf32>
    %c0_11 = arith.constant 0 : index
    %c0_12 = arith.constant 0 : index
    %7 = vector.load %arg6[%c0_11, %c0_12] : memref<1x64xf32, #tpu.memory_space<vmem>>, vector<1x64xf32>
    %c0_13 = arith.constant 0 : index
    %c0_14 = arith.constant 0 : index
    %8 = vector.load %arg7[%c0_13, %c0_14] : memref<32x32xf32, #tpu.memory_space<vmem>>, vector<32x32xf32>
    %c0_15 = arith.constant 0 : index
    %c0_16 = arith.constant 0 : index
    %9 = vector.load %arg8[%c0_15, %c0_16] : memref<1x32xf32, #tpu.memory_space<vmem>>, vector<1x32xf32>
    %cst = arith.constant dense<0.000000e+00> : vector<8x32xf32>
    %10 = tpu.matmul %1, %4, %cst {dimension_numbers = #tpu.dot_dimension_numbers<[1], [0], [0], [1], [0, 0, 1, 1], [], []>} : vector<8x32xf32>, vector<32x32xf32>, vector<8x32xf32> -> vector<8x32xf32>
    %11 = vector.broadcast %5 : vector<1x32xf32> to vector<8x32xf32>
    %12 = arith.addf %10, %11 : vector<8x32xf32>
    %cst_17 = arith.constant dense<0.000000e+00> : vector<8x64xf32>
    %13 = tpu.matmul %3, %6, %cst_17 {dimension_numbers = #tpu.dot_dimension_numbers<[1], [0], [0], [1], [0, 0, 1, 1], [], []>} : vector<8x32xf32>, vector<32x64xf32>, vector<8x64xf32> -> vector<8x64xf32>
    %14 = vector.broadcast %7 : vector<1x64xf32> to vector<8x64xf32>
    %15 = arith.addf %13, %14 : vector<8x64xf32>
    %16 = vector.extract_strided_slice %15 {offsets = [0, 0], sizes = [8, 32], strides = [1, 1]} : vector<8x64xf32> to vector<8x32xf32>
    %17 = vector.extract_strided_slice %15 {offsets = [0, 32], sizes = [8, 32], strides = [1, 1]} : vector<8x64xf32> to vector<8x32xf32>
    %cst_18 = arith.constant 0.000000e+00 : f32
    %18 = vector.broadcast %cst_18 : f32 to vector<8x32xf32>
    %19 = vector.extract_strided_slice %12 {offsets = [0, 0], sizes = [8, 8], strides = [1, 1]} : vector<8x32xf32> to vector<8x8xf32>
    %20 = vector.extract_strided_slice %16 {offsets = [0, 0], sizes = [8, 8], strides = [1, 1]} : vector<8x32xf32> to vector<8x8xf32>
    %21 = vector.extract_strided_slice %17 {offsets = [0, 0], sizes = [8, 8], strides = [1, 1]} : vector<8x32xf32> to vector<8x8xf32>
    %cst_19 = arith.constant dense<0.000000e+00> : vector<8x8xf32>
    %22 = tpu.matmul %19, %20, %cst_19 {dimension_numbers = #tpu.dot_dimension_numbers<[1], [1], [0], [0], [0, 0, 1, 0], [], []>} : vector<8x8xf32>, vector<8x8xf32>, vector<8x8xf32> -> vector<8x8xf32>
    %cst_20 = arith.constant 0.353553385 : f32
    %23 = vector.broadcast %cst_20 : f32 to vector<8x8xf32>
    %24 = arith.mulf %22, %23 : vector<8x8xf32>
    %cst_21 = arith.constant dense<0xFF800000> : vector<8xf32>
    %25 = vector.multi_reduction <maximumf>, %24, %cst_21 [1] : vector<8x8xf32> to vector<8xf32>
    %26 = vector.shape_cast %25 : vector<8xf32> to vector<8x1xf32>
    %27 = vector.broadcast %26 : vector<8x1xf32> to vector<8x8xf32>
    %28 = arith.subf %24, %27 : vector<8x8xf32>
    %29 = math.exp %28 : vector<8x8xf32>
    %cst_22 = arith.constant dense<0.000000e+00> : vector<8xf32>
    %30 = vector.multi_reduction <add>, %29, %cst_22 [1] : vector<8x8xf32> to vector<8xf32>
    %31 = vector.shape_cast %30 : vector<8xf32> to vector<8x1xf32>
    %32 = tpu.reciprocal %31 {approx = true} : vector<8x1xf32> -> vector<8x1xf32>
    %33 = vector.broadcast %32 : vector<8x1xf32> to vector<8x8xf32>
    %34 = arith.mulf %29, %33 : vector<8x8xf32>
    %cst_23 = arith.constant dense<0.000000e+00> : vector<8x8xf32>
    %35 = tpu.matmul %34, %21, %cst_23 {dimension_numbers = #tpu.dot_dimension_numbers<[1], [0], [0], [1], [0, 0, 1, 1], [], []>} : vector<8x8xf32>, vector<8x8xf32>, vector<8x8xf32> -> vector<8x8xf32>
    %36 = vector.extract_strided_slice %8 {offsets = [0, 0], sizes = [8, 32], strides = [1, 1]} : vector<32x32xf32> to vector<8x32xf32>
    %cst_24 = arith.constant dense<0.000000e+00> : vector<8x32xf32>
    %37 = tpu.matmul %35, %36, %cst_24 {dimension_numbers = #tpu.dot_dimension_numbers<[1], [0], [0], [1], [0, 0, 1, 1], [], []>} : vector<8x8xf32>, vector<8x32xf32>, vector<8x32xf32> -> vector<8x32xf32>
    %38 = arith.addf %18, %37 : vector<8x32xf32>
    %39 = vector.extract_strided_slice %12 {offsets = [0, 8], sizes = [8, 8], strides = [1, 1]} : vector<8x32xf32> to vector<8x8xf32>
    %40 = vector.extract_strided_slice %16 {offsets = [0, 8], sizes = [8, 8], strides = [1, 1]} : vector<8x32xf32> to vector<8x8xf32>
    %41 = vector.extract_strided_slice %17 {offsets = [0, 8], sizes = [8, 8], strides = [1, 1]} : vector<8x32xf32> to vector<8x8xf32>
    %cst_25 = arith.constant dense<0.000000e+00> : vector<8x8xf32>
    %42 = tpu.matmul %39, %40, %cst_25 {dimension_numbers = #tpu.dot_dimension_numbers<[1], [1], [0], [0], [0, 0, 1, 0], [], []>} : vector<8x8xf32>, vector<8x8xf32>, vector<8x8xf32> -> vector<8x8xf32>
    %cst_26 = arith.constant 0.353553385 : f32
    %43 = vector.broadcast %cst_26 : f32 to vector<8x8xf32>
    %44 = arith.mulf %42, %43 : vector<8x8xf32>
    %cst_27 = arith.constant dense<0xFF800000> : vector<8xf32>
    %45 = vector.multi_reduction <maximumf>, %44, %cst_27 [1] : vector<8x8xf32> to vector<8xf32>
    %46 = vector.shape_cast %45 : vector<8xf32> to vector<8x1xf32>
    %47 = vector.broadcast %46 : vector<8x1xf32> to vector<8x8xf32>
    %48 = arith.subf %44, %47 : vector<8x8xf32>
    %49 = math.exp %48 : vector<8x8xf32>
    %cst_28 = arith.constant dense<0.000000e+00> : vector<8xf32>
    %50 = vector.multi_reduction <add>, %49, %cst_28 [1] : vector<8x8xf32> to vector<8xf32>
    %51 = vector.shape_cast %50 : vector<8xf32> to vector<8x1xf32>
    %52 = tpu.reciprocal %51 {approx = true} : vector<8x1xf32> -> vector<8x1xf32>
    %53 = vector.broadcast %52 : vector<8x1xf32> to vector<8x8xf32>
    %54 = arith.mulf %49, %53 : vector<8x8xf32>
    %cst_29 = arith.constant dense<0.000000e+00> : vector<8x8xf32>
    %55 = tpu.matmul %54, %41, %cst_29 {dimension_numbers = #tpu.dot_dimension_numbers<[1], [0], [0], [1], [0, 0, 1, 1], [], []>} : vector<8x8xf32>, vector<8x8xf32>, vector<8x8xf32> -> vector<8x8xf32>
    %56 = vector.extract_strided_slice %8 {offsets = [8, 0], sizes = [8, 32], strides = [1, 1]} : vector<32x32xf32> to vector<8x32xf32>
    %cst_30 = arith.constant dense<0.000000e+00> : vector<8x32xf32>
    %57 = tpu.matmul %55, %56, %cst_30 {dimension_numbers = #tpu.dot_dimension_numbers<[1], [0], [0], [1], [0, 0, 1, 1], [], []>} : vector<8x8xf32>, vector<8x32xf32>, vector<8x32xf32> -> vector<8x32xf32>
    %58 = arith.addf %38, %57 : vector<8x32xf32>
    %59 = vector.extract_strided_slice %12 {offsets = [0, 16], sizes = [8, 8], strides = [1, 1]} : vector<8x32xf32> to vector<8x8xf32>
    %60 = vector.extract_strided_slice %16 {offsets = [0, 16], sizes = [8, 8], strides = [1, 1]} : vector<8x32xf32> to vector<8x8xf32>
    %61 = vector.extract_strided_slice %17 {offsets = [0, 16], sizes = [8, 8], strides = [1, 1]} : vector<8x32xf32> to vector<8x8xf32>
    %cst_31 = arith.constant dense<0.000000e+00> : vector<8x8xf32>
    %62 = tpu.matmul %59, %60, %cst_31 {dimension_numbers = #tpu.dot_dimension_numbers<[1], [1], [0], [0], [0, 0, 1, 0], [], []>} : vector<8x8xf32>, vector<8x8xf32>, vector<8x8xf32> -> vector<8x8xf32>
    %cst_32 = arith.constant 0.353553385 : f32
    %63 = vector.broadcast %cst_32 : f32 to vector<8x8xf32>
    %64 = arith.mulf %62, %63 : vector<8x8xf32>
    %cst_33 = arith.constant dense<0xFF800000> : vector<8xf32>
    %65 = vector.multi_reduction <maximumf>, %64, %cst_33 [1] : vector<8x8xf32> to vector<8xf32>
    %66 = vector.shape_cast %65 : vector<8xf32> to vector<8x1xf32>
    %67 = vector.broadcast %66 : vector<8x1xf32> to vector<8x8xf32>
    %68 = arith.subf %64, %67 : vector<8x8xf32>
    %69 = math.exp %68 : vector<8x8xf32>
    %cst_34 = arith.constant dense<0.000000e+00> : vector<8xf32>
    %70 = vector.multi_reduction <add>, %69, %cst_34 [1] : vector<8x8xf32> to vector<8xf32>
    %71 = vector.shape_cast %70 : vector<8xf32> to vector<8x1xf32>
    %72 = tpu.reciprocal %71 {approx = true} : vector<8x1xf32> -> vector<8x1xf32>
    %73 = vector.broadcast %72 : vector<8x1xf32> to vector<8x8xf32>
    %74 = arith.mulf %69, %73 : vector<8x8xf32>
    %cst_35 = arith.constant dense<0.000000e+00> : vector<8x8xf32>
    %75 = tpu.matmul %74, %61, %cst_35 {dimension_numbers = #tpu.dot_dimension_numbers<[1], [0], [0], [1], [0, 0, 1, 1], [], []>} : vector<8x8xf32>, vector<8x8xf32>, vector<8x8xf32> -> vector<8x8xf32>
    %76 = vector.extract_strided_slice %8 {offsets = [16, 0], sizes = [8, 32], strides = [1, 1]} : vector<32x32xf32> to vector<8x32xf32>
    %cst_36 = arith.constant dense<0.000000e+00> : vector<8x32xf32>
    %77 = tpu.matmul %75, %76, %cst_36 {dimension_numbers = #tpu.dot_dimension_numbers<[1], [0], [0], [1], [0, 0, 1, 1], [], []>} : vector<8x8xf32>, vector<8x32xf32>, vector<8x32xf32> -> vector<8x32xf32>
    %78 = arith.addf %58, %77 : vector<8x32xf32>
    %79 = vector.extract_strided_slice %12 {offsets = [0, 24], sizes = [8, 8], strides = [1, 1]} : vector<8x32xf32> to vector<8x8xf32>
    %80 = vector.extract_strided_slice %16 {offsets = [0, 24], sizes = [8, 8], strides = [1, 1]} : vector<8x32xf32> to vector<8x8xf32>
    %81 = vector.extract_strided_slice %17 {offsets = [0, 24], sizes = [8, 8], strides = [1, 1]} : vector<8x32xf32> to vector<8x8xf32>
    %cst_37 = arith.constant dense<0.000000e+00> : vector<8x8xf32>
    %82 = tpu.matmul %79, %80, %cst_37 {dimension_numbers = #tpu.dot_dimension_numbers<[1], [1], [0], [0], [0, 0, 1, 0], [], []>} : vector<8x8xf32>, vector<8x8xf32>, vector<8x8xf32> -> vector<8x8xf32>
    %cst_38 = arith.constant 0.353553385 : f32
    %83 = vector.broadcast %cst_38 : f32 to vector<8x8xf32>
    %84 = arith.mulf %82, %83 : vector<8x8xf32>
    %cst_39 = arith.constant dense<0xFF800000> : vector<8xf32>
    %85 = vector.multi_reduction <maximumf>, %84, %cst_39 [1] : vector<8x8xf32> to vector<8xf32>
    %86 = vector.shape_cast %85 : vector<8xf32> to vector<8x1xf32>
    %87 = vector.broadcast %86 : vector<8x1xf32> to vector<8x8xf32>
    %88 = arith.subf %84, %87 : vector<8x8xf32>
    %89 = math.exp %88 : vector<8x8xf32>
    %cst_40 = arith.constant dense<0.000000e+00> : vector<8xf32>
    %90 = vector.multi_reduction <add>, %89, %cst_40 [1] : vector<8x8xf32> to vector<8xf32>
    %91 = vector.shape_cast %90 : vector<8xf32> to vector<8x1xf32>
    %92 = tpu.reciprocal %91 {approx = true} : vector<8x1xf32> -> vector<8x1xf32>
    %93 = vector.broadcast %92 : vector<8x1xf32> to vector<8x8xf32>
    %94 = arith.mulf %89, %93 : vector<8x8xf32>
    %cst_41 = arith.constant dense<0.000000e+00> : vector<8x8xf32>
    %95 = tpu.matmul %94, %81, %cst_41 {dimension_numbers = #tpu.dot_dimension_numbers<[1], [0], [0], [1], [0, 0, 1, 1], [], []>} : vector<8x8xf32>, vector<8x8xf32>, vector<8x8xf32> -> vector<8x8xf32>
    %96 = vector.extract_strided_slice %8 {offsets = [24, 0], sizes = [8, 32], strides = [1, 1]} : vector<32x32xf32> to vector<8x32xf32>
    %cst_42 = arith.constant dense<0.000000e+00> : vector<8x32xf32>
    %97 = tpu.matmul %95, %96, %cst_42 {dimension_numbers = #tpu.dot_dimension_numbers<[1], [0], [0], [1], [0, 0, 1, 1], [], []>} : vector<8x8xf32>, vector<8x32xf32>, vector<8x32xf32> -> vector<8x32xf32>
    %98 = arith.addf %78, %97 : vector<8x32xf32>
    %99 = vector.broadcast %9 : vector<1x32xf32> to vector<8x32xf32>
    %100 = arith.addf %98, %99 : vector<8x32xf32>
    %c0_43 = arith.constant 0 : index
    %c0_44 = arith.constant 0 : index
    %101 = vector.load %arg9[%c0_43, %c0_44] : memref<32x32xf32, #tpu.memory_space<vmem>>, vector<32x32xf32>
    %cst_45 = arith.constant dense<0.000000e+00> : vector<8x32xf32>
    %102 = tpu.matmul %100, %101, %cst_45 {dimension_numbers = #tpu.dot_dimension_numbers<[1], [0], [0], [1], [0, 0, 1, 1], [], []>} : vector<8x32xf32>, vector<32x32xf32>, vector<8x32xf32> -> vector<8x32xf32>
    %c0_46 = arith.constant 0 : index
    %c0_47 = arith.constant 0 : index
    %103 = vector.load %arg10[%c0_46, %c0_47] : memref<1x32xf32, #tpu.memory_space<vmem>>, vector<1x32xf32>
    %104 = vector.broadcast %103 : vector<1x32xf32> to vector<8x32xf32>
    %105 = arith.addf %102, %104 : vector<8x32xf32>
    %cst_48 = arith.constant 0.000000e+00 : f32
    %106 = vector.broadcast %cst_48 : f32 to vector<8x32xf32>
    %107 = arith.maximumf %105, %106 : vector<8x32xf32>
    %c0_49 = arith.constant 0 : index
    %c0_50 = arith.constant 0 : index
    %108 = vector.load %arg11[%c0_49, %c0_50] : memref<32x32xf32, #tpu.memory_space<vmem>>, vector<32x32xf32>
    %cst_51 = arith.constant dense<0.000000e+00> : vector<8x32xf32>
    %109 = tpu.matmul %107, %108, %cst_51 {dimension_numbers = #tpu.dot_dimension_numbers<[1], [0], [0], [1], [0, 0, 1, 1], [], []>} : vector<8x32xf32>, vector<32x32xf32>, vector<8x32xf32> -> vector<8x32xf32>
    %c0_52 = arith.constant 0 : index
    %c0_53 = arith.constant 0 : index
    %110 = vector.load %arg12[%c0_52, %c0_53] : memref<1x32xf32, #tpu.memory_space<vmem>>, vector<1x32xf32>
    %111 = vector.broadcast %110 : vector<1x32xf32> to vector<8x32xf32>
    %112 = arith.addf %109, %111 : vector<8x32xf32>
    %113 = arith.addf %112, %100 : vector<8x32xf32>
    %c0_54 = arith.constant 0 : index
    %c0_55 = arith.constant 0 : index
    %c0_56 = arith.constant 0 : index
    %114 = vector.load %arg13[%c0_54, %c0_55, %c0_56] : memref<1x8x32xf32, #tpu.memory_space<vmem>>, vector<1x8x32xf32>
    %115 = vector.shape_cast %114 : vector<1x8x32xf32> to vector<8x32xf32>
    %116 = vector.shape_cast %113 : vector<8x32xf32> to vector<1x8x32xf32>
    tpu.vector_store %arg13[%c0_54, %c0_55, %c0_56], %116 {strides = array<i32>} : memref<1x8x32xf32, #tpu.memory_space<vmem>>, vector<1x8x32xf32>,
    return
  }
  func.func @transform_0(%arg0: i32) -> (i32, i32, i32) {
    %c0_i32 = arith.constant 0 : i32
    %c0_i32_0 = arith.constant 0 : i32
    %c0_i32_1 = arith.constant 0 : i32
    return %arg0, %c0_i32, %c0_i32_0 : i32, i32, i32
  }
  func.func @transform_1(%arg0: i32) -> (i32, i32, i32) {
    %c0_i32 = arith.constant 0 : i32
    %c0_i32_0 = arith.constant 0 : i32
    %c0_i32_1 = arith.constant 0 : i32
    return %arg0, %c0_i32, %c0_i32_0 : i32, i32, i32
  }
  func.func @transform_2(%arg0: i32) -> (i32, i32) {
    %c0_i32 = arith.constant 0 : i32
    %c0_i32_0 = arith.constant 0 : i32
    %c0_i32_1 = arith.constant 0 : i32
    return %c0_i32, %c0_i32_0 : i32, i32
  }
  func.func @transform_3(%arg0: i32) -> (i32, i32) {
    %c0_i32 = arith.constant 0 : i32
    %c0_i32_0 = arith.constant 0 : i32
    %c0_i32_1 = arith.constant 0 : i32
    return %c0_i32, %c0_i32_0 : i32, i32
  }
  func.func @transform_4(%arg0: i32) -> (i32, i32) {
    %c0_i32 = arith.constant 0 : i32
    %c0_i32_0 = arith.constant 0 : i32
    %c0_i32_1 = arith.constant 0 : i32
    return %c0_i32, %c0_i32_0 : i32, i32
  }
  func.func @transform_5(%arg0: i32) -> (i32, i32) {
    %c0_i32 = arith.constant 0 : i32
    %c0_i32_0 = arith.constant 0 : i32
    %c0_i32_1 = arith.constant 0 : i32
    return %c0_i32, %c0_i32_0 : i32, i32
  }
  func.func @transform_6(%arg0: i32) -> (i32, i32) {
    %c0_i32 = arith.constant 0 : i32
    %c0_i32_0 = arith.constant 0 : i32
    %c0_i32_1 = arith.constant 0 : i32
    return %c0_i32, %c0_i32_0 : i32, i32
  }
  func.func @transform_7(%arg0: i32) -> (i32, i32) {
    %c0_i32 = arith.constant 0 : i32
    %c0_i32_0 = arith.constant 0 : i32
    %c0_i32_1 = arith.constant 0 : i32
    return %c0_i32, %c0_i32_0 : i32, i32
  }
  func.func @transform_8(%arg0: i32) -> (i32, i32) {
    %c0_i32 = arith.constant 0 : i32
    %c0_i32_0 = arith.constant 0 : i32
    %c0_i32_1 = arith.constant 0 : i32
    return %c0_i32, %c0_i32_0 : i32, i32
  }
  func.func @transform_9(%arg0: i32) -> (i32, i32) {
    %c0_i32 = arith.constant 0 : i32
    %c0_i32_0 = arith.constant 0 : i32
    %c0_i32_1 = arith.constant 0 : i32
    return %c0_i32, %c0_i32_0 : i32, i32
  }
  func.func @transform_10(%arg0: i32) -> (i32, i32) {
    %c0_i32 = arith.constant 0 : i32
    %c0_i32_0 = arith.constant 0 : i32
    %c0_i32_1 = arith.constant 0 : i32
    return %c0_i32, %c0_i32_0 : i32, i32
  }
  func.func @transform_11(%arg0: i32) -> (i32, i32) {
    %c0_i32 = arith.constant 0 : i32
    %c0_i32_0 = arith.constant 0 : i32
    %c0_i32_1 = arith.constant 0 : i32
    return %c0_i32, %c0_i32_0 : i32, i32
  }
  func.func @transform_12(%arg0: i32) -> (i32, i32, i32) {
    %c0_i32 = arith.constant 0 : i32
    %c0_i32_0 = arith.constant 0 : i32
    %c0_i32_1 = arith.constant 0 : i32
    return %arg0, %c0_i32, %c0_i32_0 : i32, i32, i32
  }
}

module attributes {stable_mosaic.version = 11 : i64} {
  func.func @_mha_ff_block_kernel(%arg0: i32, %arg1: memref<1x8x32xf32, #tpu.memory_space<vmem>>, %arg2: memref<1x16x32xf32, #tpu.memory_space<vmem>>, %arg3: memref<32x32xf32, #tpu.memory_space<vmem>>, %arg4: memref<1x32xf32, #tpu.memory_space<vmem>>, %arg5: memref<32x64xf32, #tpu.memory_space<vmem>>, %arg6: memref<1x64xf32, #tpu.memory_space<vmem>>, %arg7: memref<32x32xf32, #tpu.memory_space<vmem>>, %arg8: memref<1x32xf32, #tpu.memory_space<vmem>>, %arg9: memref<32x32xf32, #tpu.memory_space<vmem>>, %arg10: memref<1x32xf32, #tpu.memory_space<vmem>>, %arg11: memref<32x32xf32, #tpu.memory_space<vmem>>, %arg12: memref<1x32xf32, #tpu.memory_space<vmem>>, %arg13: memref<1x8x32xf32, #tpu.memory_space<vmem>>) attributes {dimension_semantics = [#tpu.dimension_semantics<parallel>], iteration_bounds = array<i64: 2>, scalar_prefetch = 0 : i64, scratch_operands = 0 : i64, tpu.core_type = #tpu.core_type<tc>, window_params = [{transform_indices = @transform_0, window_bounds = array<i64: 1, 8, 32>}, {transform_indices = @transform_1, window_bounds = array<i64: 1, 16, 32>}, {pipeline_mode = #tpu.pipeline_mode<synchronous>, transform_indices = @transform_2, window_bounds = array<i64: 32, 32>}, {pipeline_mode = #tpu.pipeline_mode<synchronous>, transform_indices = @transform_3, window_bounds = array<i64: 1, 32>}, {pipeline_mode = #tpu.pipeline_mode<synchronous>, transform_indices = @transform_4, window_bounds = array<i64: 32, 64>}, {pipeline_mode = #tpu.pipeline_mode<synchronous>, transform_indices = @transform_5, window_bounds = array<i64: 1, 64>}, {pipeline_mode = #tpu.pipeline_mode<synchronous>, transform_indices = @transform_6, window_bounds = array<i64: 32, 32>}, {pipeline_mode = #tpu.pipeline_mode<synchronous>, transform_indices = @transform_7, window_bounds = array<i64: 1, 32>}, {pipeline_mode = #tpu.pipeline_mode<synchronous>, transform_indices = @transform_8, window_bounds = array<i64: 32, 32>}, {pipeline_mode = #tpu.pipeline_mode<synchronous>, transform_indices = @transform_9, window_bounds = array<i64: 1, 32>}, {pipeline_mode = #tpu.pipeline_mode<synchronous>, transform_indices = @transform_10, window_bounds = array<i64: 32, 32>}, {pipeline_mode = #tpu.pipeline_mode<synchronous>, transform_indices = @transform_11, window_bounds = array<i64: 1, 32>}, {transform_indices = @transform_12, window_bounds = array<i64: 1, 8, 32>}]} {
    %c0 = arith.constant 0 : index
    %c0_0 = arith.constant 0 : index
    %c0_1 = arith.constant 0 : index
    %0 = vector.load %arg1[%c0, %c0_0, %c0_1] : memref<1x8x32xf32, #tpu.memory_space<vmem>>, vector<1x8x32xf32>
    %1 = vector.shape_cast %0 : vector<1x8x32xf32> to vector<8x32xf32>
    %c0_2 = arith.constant 0 : index
    %c0_3 = arith.constant 0 : index
    %c0_4 = arith.constant 0 : index
    %2 = vector.load %arg2[%c0_2, %c0_3, %c0_4] : memref<1x16x32xf32, #tpu.memory_space<vmem>>, vector<1x16x32xf32>
    %3 = vector.shape_cast %2 : vector<1x16x32xf32> to vector<16x32xf32>
    %c0_5 = arith.constant 0 : index
    %c0_6 = arith.constant 0 : index
    %4 = vector.load %arg3[%c0_5, %c0_6] : memref<32x32xf32, #tpu.memory_space<vmem>>, vector<32x32xf32>
    %c0_7 = arith.constant 0 : index
    %c0_8 = arith.constant 0 : index
    %5 = vector.load %arg4[%c0_7, %c0_8] : memref<1x32xf32, #tpu.memory_space<vmem>>, vector<1x32xf32>
    %c0_9 = arith.constant 0 : index
    %c0_10 = arith.constant 0 : index
    %6 = vector.load %arg5[%c0_9, %c0_10] : memref<32x64xf32, #tpu.memory_space<vmem>>, vector<32x64xf32>
    %c0_11 = arith.constant 0 : index
    %c0_12 = arith.constant 0 : index
    %7 = vector.load %arg6[%c0_11, %c0_12] : memref<1x64xf32, #tpu.memory_space<vmem>>, vector<1x64xf32>
    %c0_13 = arith.constant 0 : index
    %c0_14 = arith.constant 0 : index
    %8 = vector.load %arg7[%c0_13, %c0_14] : memref<32x32xf32, #tpu.memory_space<vmem>>, vector<32x32xf32>
    %c0_15 = arith.constant 0 : index
    %c0_16 = arith.constant 0 : index
    %9 = vector.load %arg8[%c0_15, %c0_16] : memref<1x32xf32, #tpu.memory_space<vmem>>, vector<1x32xf32>
    %cst = arith.constant dense<0.000000e+00> : vector<8x32xf32>
    %10 = tpu.matmul %1, %4, %cst {dimension_numbers = #tpu.dot_dimension_numbers<[1], [0], [0], [1], [0, 0, 1, 1], [], []>} : vector<8x32xf32>, vector<32x32xf32>, vector<8x32xf32> -> vector<8x32xf32>
    %11 = vector.broadcast %5 : vector<1x32xf32> to vector<8x32xf32>
    %12 = arith.addf %10, %11 : vector<8x32xf32>
    %cst_17 = arith.constant dense<0.000000e+00> : vector<16x64xf32>
    %13 = tpu.matmul %3, %6, %cst_17 {dimension_numbers = #tpu.dot_dimension_numbers<[1], [0], [0], [1], [0, 0, 1, 1], [], []>} : vector<16x32xf32>, vector<32x64xf32>, vector<16x64xf32> -> vector<16x64xf32>
    %14 = vector.broadcast %7 : vector<1x64xf32> to vector<16x64xf32>
    %15 = arith.addf %13, %14 : vector<16x64xf32>
    %16 = vector.extract_strided_slice %15 {offsets = [0, 0], sizes = [16, 32], strides = [1, 1]} : vector<16x64xf32> to vector<16x32xf32>
    %17 = vector.extract_strided_slice %15 {offsets = [0, 32], sizes = [16, 32], strides = [1, 1]} : vector<16x64xf32> to vector<16x32xf32>
    %cst_18 = arith.constant 0.000000e+00 : f32
    %18 = vector.broadcast %cst_18 : f32 to vector<8x32xf32>
    %19 = vector.extract_strided_slice %12 {offsets = [0, 0], sizes = [8, 8], strides = [1, 1]} : vector<8x32xf32> to vector<8x8xf32>
    %20 = vector.extract_strided_slice %16 {offsets = [0, 0], sizes = [16, 8], strides = [1, 1]} : vector<16x32xf32> to vector<16x8xf32>
    %21 = vector.extract_strided_slice %17 {offsets = [0, 0], sizes = [16, 8], strides = [1, 1]} : vector<16x32xf32> to vector<16x8xf32>
    %cst_19 = arith.constant dense<0.000000e+00> : vector<8x16xf32>
    %22 = tpu.matmul %19, %20, %cst_19 {dimension_numbers = #tpu.dot_dimension_numbers<[1], [1], [0], [0], [0, 0, 1, 0], [], []>} : vector<8x8xf32>, vector<16x8xf32>, vector<8x16xf32> -> vector<8x16xf32>
    %cst_20 = arith.constant 0.353553385 : f32
    %23 = vector.broadcast %cst_20 : f32 to vector<8x16xf32>
    %24 = arith.mulf %22, %23 : vector<8x16xf32>
    %cst_21 = arith.constant dense<0xFF800000> : vector<8xf32>
    %25 = vector.multi_reduction <maximumf>, %24, %cst_21 [1] : vector<8x16xf32> to vector<8xf32>
    %26 = vector.shape_cast %25 : vector<8xf32> to vector<8x1xf32>
    %27 = vector.broadcast %26 : vector<8x1xf32> to vector<8x16xf32>
    %28 = arith.subf %24, %27 : vector<8x16xf32>
    %29 = math.exp %28 : vector<8x16xf32>
    %cst_22 = arith.constant dense<0.000000e+00> : vector<8xf32>
    %30 = vector.multi_reduction <add>, %29, %cst_22 [1] : vector<8x16xf32> to vector<8xf32>
    %31 = vector.shape_cast %30 : vector<8xf32> to vector<8x1xf32>
    %32 = tpu.reciprocal %31 {approx = true} : vector<8x1xf32> -> vector<8x1xf32>
    %33 = vector.broadcast %32 : vector<8x1xf32> to vector<8x16xf32>
    %34 = arith.mulf %29, %33 : vector<8x16xf32>
    %cst_23 = arith.constant dense<0.000000e+00> : vector<8x8xf32>
    %35 = tpu.matmul %34, %21, %cst_23 {dimension_numbers = #tpu.dot_dimension_numbers<[1], [0], [0], [1], [0, 0, 1, 1], [], []>} : vector<8x16xf32>, vector<16x8xf32>, vector<8x8xf32> -> vector<8x8xf32>
    %36 = vector.extract_strided_slice %8 {offsets = [0, 0], sizes = [8, 32], strides = [1, 1]} : vector<32x32xf32> to vector<8x32xf32>
    %cst_24 = arith.constant dense<0.000000e+00> : vector<8x32xf32>
    %37 = tpu.matmul %35, %36, %cst_24 {dimension_numbers = #tpu.dot_dimension_numbers<[1], [0], [0], [1], [0, 0, 1, 1], [], []>} : vector<8x8xf32>, vector<8x32xf32>, vector<8x32xf32> -> vector<8x32xf32>
    %38 = arith.addf %18, %37 : vector<8x32xf32>
    %39 = vector.extract_strided_slice %12 {offsets = [0, 8], sizes = [8, 8], strides = [1, 1]} : vector<8x32xf32> to vector<8x8xf32>
    %40 = vector.extract_strided_slice %16 {offsets = [0, 8], sizes = [16, 8], strides = [1, 1]} : vector<16x32xf32> to vector<16x8xf32>
    %41 = vector.extract_strided_slice %17 {offsets = [0, 8], sizes = [16, 8], strides = [1, 1]} : vector<16x32xf32> to vector<16x8xf32>
    %cst_25 = arith.constant dense<0.000000e+00> : vector<8x16xf32>
    %42 = tpu.matmul %39, %40, %cst_25 {dimension_numbers = #tpu.dot_dimension_numbers<[1], [1], [0], [0], [0, 0, 1, 0], [], []>} : vector<8x8xf32>, vector<16x8xf32>, vector<8x16xf32> -> vector<8x16xf32>
    %cst_26 = arith.constant 0.353553385 : f32
    %43 = vector.broadcast %cst_26 : f32 to vector<8x16xf32>
    %44 = arith.mulf %42, %43 : vector<8x16xf32>
    %cst_27 = arith.constant dense<0xFF800000> : vector<8xf32>
    %45 = vector.multi_reduction <maximumf>, %44, %cst_27 [1] : vector<8x16xf32> to vector<8xf32>
    %46 = vector.shape_cast %45 : vector<8xf32> to vector<8x1xf32>
    %47 = vector.broadcast %46 : vector<8x1xf32> to vector<8x16xf32>
    %48 = arith.subf %44, %47 : vector<8x16xf32>
    %49 = math.exp %48 : vector<8x16xf32>
    %cst_28 = arith.constant dense<0.000000e+00> : vector<8xf32>
    %50 = vector.multi_reduction <add>, %49, %cst_28 [1] : vector<8x16xf32> to vector<8xf32>
    %51 = vector.shape_cast %50 : vector<8xf32> to vector<8x1xf32>
    %52 = tpu.reciprocal %51 {approx = true} : vector<8x1xf32> -> vector<8x1xf32>
    %53 = vector.broadcast %52 : vector<8x1xf32> to vector<8x16xf32>
    %54 = arith.mulf %49, %53 : vector<8x16xf32>
    %cst_29 = arith.constant dense<0.000000e+00> : vector<8x8xf32>
    %55 = tpu.matmul %54, %41, %cst_29 {dimension_numbers = #tpu.dot_dimension_numbers<[1], [0], [0], [1], [0, 0, 1, 1], [], []>} : vector<8x16xf32>, vector<16x8xf32>, vector<8x8xf32> -> vector<8x8xf32>
    %56 = vector.extract_strided_slice %8 {offsets = [8, 0], sizes = [8, 32], strides = [1, 1]} : vector<32x32xf32> to vector<8x32xf32>
    %cst_30 = arith.constant dense<0.000000e+00> : vector<8x32xf32>
    %57 = tpu.matmul %55, %56, %cst_30 {dimension_numbers = #tpu.dot_dimension_numbers<[1], [0], [0], [1], [0, 0, 1, 1], [], []>} : vector<8x8xf32>, vector<8x32xf32>, vector<8x32xf32> -> vector<8x32xf32>
    %58 = arith.addf %38, %57 : vector<8x32xf32>
    %59 = vector.extract_strided_slice %12 {offsets = [0, 16], sizes = [8, 8], strides = [1, 1]} : vector<8x32xf32> to vector<8x8xf32>
    %60 = vector.extract_strided_slice %16 {offsets = [0, 16], sizes = [16, 8], strides = [1, 1]} : vector<16x32xf32> to vector<16x8xf32>
    %61 = vector.extract_strided_slice %17 {offsets = [0, 16], sizes = [16, 8], strides = [1, 1]} : vector<16x32xf32> to vector<16x8xf32>
    %cst_31 = arith.constant dense<0.000000e+00> : vector<8x16xf32>
    %62 = tpu.matmul %59, %60, %cst_31 {dimension_numbers = #tpu.dot_dimension_numbers<[1], [1], [0], [0], [0, 0, 1, 0], [], []>} : vector<8x8xf32>, vector<16x8xf32>, vector<8x16xf32> -> vector<8x16xf32>
    %cst_32 = arith.constant 0.353553385 : f32
    %63 = vector.broadcast %cst_32 : f32 to vector<8x16xf32>
    %64 = arith.mulf %62, %63 : vector<8x16xf32>
    %cst_33 = arith.constant dense<0xFF800000> : vector<8xf32>
    %65 = vector.multi_reduction <maximumf>, %64, %cst_33 [1] : vector<8x16xf32> to vector<8xf32>
    %66 = vector.shape_cast %65 : vector<8xf32> to vector<8x1xf32>
    %67 = vector.broadcast %66 : vector<8x1xf32> to vector<8x16xf32>
    %68 = arith.subf %64, %67 : vector<8x16xf32>
    %69 = math.exp %68 : vector<8x16xf32>
    %cst_34 = arith.constant dense<0.000000e+00> : vector<8xf32>
    %70 = vector.multi_reduction <add>, %69, %cst_34 [1] : vector<8x16xf32> to vector<8xf32>
    %71 = vector.shape_cast %70 : vector<8xf32> to vector<8x1xf32>
    %72 = tpu.reciprocal %71 {approx = true} : vector<8x1xf32> -> vector<8x1xf32>
    %73 = vector.broadcast %72 : vector<8x1xf32> to vector<8x16xf32>
    %74 = arith.mulf %69, %73 : vector<8x16xf32>
    %cst_35 = arith.constant dense<0.000000e+00> : vector<8x8xf32>
    %75 = tpu.matmul %74, %61, %cst_35 {dimension_numbers = #tpu.dot_dimension_numbers<[1], [0], [0], [1], [0, 0, 1, 1], [], []>} : vector<8x16xf32>, vector<16x8xf32>, vector<8x8xf32> -> vector<8x8xf32>
    %76 = vector.extract_strided_slice %8 {offsets = [16, 0], sizes = [8, 32], strides = [1, 1]} : vector<32x32xf32> to vector<8x32xf32>
    %cst_36 = arith.constant dense<0.000000e+00> : vector<8x32xf32>
    %77 = tpu.matmul %75, %76, %cst_36 {dimension_numbers = #tpu.dot_dimension_numbers<[1], [0], [0], [1], [0, 0, 1, 1], [], []>} : vector<8x8xf32>, vector<8x32xf32>, vector<8x32xf32> -> vector<8x32xf32>
    %78 = arith.addf %58, %77 : vector<8x32xf32>
    %79 = vector.extract_strided_slice %12 {offsets = [0, 24], sizes = [8, 8], strides = [1, 1]} : vector<8x32xf32> to vector<8x8xf32>
    %80 = vector.extract_strided_slice %16 {offsets = [0, 24], sizes = [16, 8], strides = [1, 1]} : vector<16x32xf32> to vector<16x8xf32>
    %81 = vector.extract_strided_slice %17 {offsets = [0, 24], sizes = [16, 8], strides = [1, 1]} : vector<16x32xf32> to vector<16x8xf32>
    %cst_37 = arith.constant dense<0.000000e+00> : vector<8x16xf32>
    %82 = tpu.matmul %79, %80, %cst_37 {dimension_numbers = #tpu.dot_dimension_numbers<[1], [1], [0], [0], [0, 0, 1, 0], [], []>} : vector<8x8xf32>, vector<16x8xf32>, vector<8x16xf32> -> vector<8x16xf32>
    %cst_38 = arith.constant 0.353553385 : f32
    %83 = vector.broadcast %cst_38 : f32 to vector<8x16xf32>
    %84 = arith.mulf %82, %83 : vector<8x16xf32>
    %cst_39 = arith.constant dense<0xFF800000> : vector<8xf32>
    %85 = vector.multi_reduction <maximumf>, %84, %cst_39 [1] : vector<8x16xf32> to vector<8xf32>
    %86 = vector.shape_cast %85 : vector<8xf32> to vector<8x1xf32>
    %87 = vector.broadcast %86 : vector<8x1xf32> to vector<8x16xf32>
    %88 = arith.subf %84, %87 : vector<8x16xf32>
    %89 = math.exp %88 : vector<8x16xf32>
    %cst_40 = arith.constant dense<0.000000e+00> : vector<8xf32>
    %90 = vector.multi_reduction <add>, %89, %cst_40 [1] : vector<8x16xf32> to vector<8xf32>
    %91 = vector.shape_cast %90 : vector<8xf32> to vector<8x1xf32>
    %92 = tpu.reciprocal %91 {approx = true} : vector<8x1xf32> -> vector<8x1xf32>
    %93 = vector.broadcast %92 : vector<8x1xf32> to vector<8x16xf32>
    %94 = arith.mulf %89, %93 : vector<8x16xf32>
    %cst_41 = arith.constant dense<0.000000e+00> : vector<8x8xf32>
    %95 = tpu.matmul %94, %81, %cst_41 {dimension_numbers = #tpu.dot_dimension_numbers<[1], [0], [0], [1], [0, 0, 1, 1], [], []>} : vector<8x16xf32>, vector<16x8xf32>, vector<8x8xf32> -> vector<8x8xf32>
    %96 = vector.extract_strided_slice %8 {offsets = [24, 0], sizes = [8, 32], strides = [1, 1]} : vector<32x32xf32> to vector<8x32xf32>
    %cst_42 = arith.constant dense<0.000000e+00> : vector<8x32xf32>
    %97 = tpu.matmul %95, %96, %cst_42 {dimension_numbers = #tpu.dot_dimension_numbers<[1], [0], [0], [1], [0, 0, 1, 1], [], []>} : vector<8x8xf32>, vector<8x32xf32>, vector<8x32xf32> -> vector<8x32xf32>
    %98 = arith.addf %78, %97 : vector<8x32xf32>
    %99 = vector.broadcast %9 : vector<1x32xf32> to vector<8x32xf32>
    %100 = arith.addf %98, %99 : vector<8x32xf32>
    %c0_43 = arith.constant 0 : index
    %c0_44 = arith.constant 0 : index
    %101 = vector.load %arg9[%c0_43, %c0_44] : memref<32x32xf32, #tpu.memory_space<vmem>>, vector<32x32xf32>
    %cst_45 = arith.constant dense<0.000000e+00> : vector<8x32xf32>
    %102 = tpu.matmul %100, %101, %cst_45 {dimension_numbers = #tpu.dot_dimension_numbers<[1], [0], [0], [1], [0, 0, 1, 1], [], []>} : vector<8x32xf32>, vector<32x32xf32>, vector<8x32xf32> -> vector<8x32xf32>
    %c0_46 = arith.constant 0 : index
    %c0_47 = arith.constant 0 : index
    %103 = vector.load %arg10[%c0_46, %c0_47] : memref<1x32xf32, #tpu.memory_space<vmem>>, vector<1x32xf32>
    %104 = vector.broadcast %103 : vector<1x32xf32> to vector<8x32xf32>
    %105 = arith.addf %102, %104 : vector<8x32xf32>
    %cst_48 = arith.constant 0.000000e+00 : f32
    %106 = vector.broadcast %cst_48 : f32 to vector<8x32xf32>
    %107 = arith.maximumf %105, %106 : vector<8x32xf32>
    %c0_49 = arith.constant 0 : index
    %c0_50 = arith.constant 0 : index
    %108 = vector.load %arg11[%c0_49, %c0_50] : memref<32x32xf32, #tpu.memory_space<vmem>>, vector<32x32xf32>
    %cst_51 = arith.constant dense<0.000000e+00> : vector<8x32xf32>
    %109 = tpu.matmul %107, %108, %cst_51 {dimension_numbers = #tpu.dot_dimension_numbers<[1], [0], [0], [1], [0, 0, 1, 1], [], []>} : vector<8x32xf32>, vector<32x32xf32>, vector<8x32xf32> -> vector<8x32xf32>
    %c0_52 = arith.constant 0 : index
    %c0_53 = arith.constant 0 : index
    %110 = vector.load %arg12[%c0_52, %c0_53] : memref<1x32xf32, #tpu.memory_space<vmem>>, vector<1x32xf32>
    %111 = vector.broadcast %110 : vector<1x32xf32> to vector<8x32xf32>
    %112 = arith.addf %109, %111 : vector<8x32xf32>
    %113 = arith.addf %112, %100 : vector<8x32xf32>
    %c0_54 = arith.constant 0 : index
    %c0_55 = arith.constant 0 : index
    %c0_56 = arith.constant 0 : index
    %114 = vector.load %arg13[%c0_54, %c0_55, %c0_56] : memref<1x8x32xf32, #tpu.memory_space<vmem>>, vector<1x8x32xf32>
    %115 = vector.shape_cast %114 : vector<1x8x32xf32> to vector<8x32xf32>
    %116 = vector.shape_cast %113 : vector<8x32xf32> to vector<1x8x32xf32>
    tpu.vector_store %arg13[%c0_54, %c0_55, %c0_56], %116 {strides = array<i32>} : memref<1x8x32xf32, #tpu.memory_space<vmem>>, vector<1x8x32xf32>,
    return
  }
  func.func @transform_0(%arg0: i32) -> (i32, i32, i32) {
    %c0_i32 = arith.constant 0 : i32
    %c0_i32_0 = arith.constant 0 : i32
    %c0_i32_1 = arith.constant 0 : i32
    return %arg0, %c0_i32, %c0_i32_0 : i32, i32, i32
  }
  func.func @transform_1(%arg0: i32) -> (i32, i32, i32) {
    %c0_i32 = arith.constant 0 : i32
    %c0_i32_0 = arith.constant 0 : i32
    %c0_i32_1 = arith.constant 0 : i32
    return %arg0, %c0_i32, %c0_i32_0 : i32, i32, i32
  }
  func.func @transform_2(%arg0: i32) -> (i32, i32) {
    %c0_i32 = arith.constant 0 : i32
    %c0_i32_0 = arith.constant 0 : i32
    %c0_i32_1 = arith.constant 0 : i32
    return %c0_i32, %c0_i32_0 : i32, i32
  }
  func.func @transform_3(%arg0: i32) -> (i32, i32) {
    %c0_i32 = arith.constant 0 : i32
    %c0_i32_0 = arith.constant 0 : i32
    %c0_i32_1 = arith.constant 0 : i32
    return %c0_i32, %c0_i32_0 : i32, i32
  }
  func.func @transform_4(%arg0: i32) -> (i32, i32) {
    %c0_i32 = arith.constant 0 : i32
    %c0_i32_0 = arith.constant 0 : i32
    %c0_i32_1 = arith.constant 0 : i32
    return %c0_i32, %c0_i32_0 : i32, i32
  }
  func.func @transform_5(%arg0: i32) -> (i32, i32) {
    %c0_i32 = arith.constant 0 : i32
    %c0_i32_0 = arith.constant 0 : i32
    %c0_i32_1 = arith.constant 0 : i32
    return %c0_i32, %c0_i32_0 : i32, i32
  }
  func.func @transform_6(%arg0: i32) -> (i32, i32) {
    %c0_i32 = arith.constant 0 : i32
    %c0_i32_0 = arith.constant 0 : i32
    %c0_i32_1 = arith.constant 0 : i32
    return %c0_i32, %c0_i32_0 : i32, i32
  }
  func.func @transform_7(%arg0: i32) -> (i32, i32) {
    %c0_i32 = arith.constant 0 : i32
    %c0_i32_0 = arith.constant 0 : i32
    %c0_i32_1 = arith.constant 0 : i32
    return %c0_i32, %c0_i32_0 : i32, i32
  }
  func.func @transform_8(%arg0: i32) -> (i32, i32) {
    %c0_i32 = arith.constant 0 : i32
    %c0_i32_0 = arith.constant 0 : i32
    %c0_i32_1 = arith.constant 0 : i32
    return %c0_i32, %c0_i32_0 : i32, i32
  }
  func.func @transform_9(%arg0: i32) -> (i32, i32) {
    %c0_i32 = arith.constant 0 : i32
    %c0_i32_0 = arith.constant 0 : i32
    %c0_i32_1 = arith.constant 0 : i32
    return %c0_i32, %c0_i32_0 : i32, i32
  }
  func.func @transform_10(%arg0: i32) -> (i32, i32) {
    %c0_i32 = arith.constant 0 : i32
    %c0_i32_0 = arith.constant 0 : i32
    %c0_i32_1 = arith.constant 0 : i32
    return %c0_i32, %c0_i32_0 : i32, i32
  }
  func.func @transform_11(%arg0: i32) -> (i32, i32) {
    %c0_i32 = arith.constant 0 : i32
    %c0_i32_0 = arith.constant 0 : i32
    %c0_i32_1 = arith.constant 0 : i32
    return %c0_i32, %c0_i32_0 : i32, i32
  }
  func.func @transform_12(%arg0: i32) -> (i32, i32, i32) {
    %c0_i32 = arith.constant 0 : i32
    %c0_i32_0 = arith.constant 0 : i32
    %c0_i32_1 = arith.constant 0 : i32
    return %arg0, %c0_i32, %c0_i32_0 : i32, i32, i32
  }
}

module attributes {stable_mosaic.version = 11 : i64} {
  func.func @_output_head_kernel(%arg0: i32, %arg1: memref<1x16x32xf32, #tpu.memory_space<vmem>>, %arg2: memref<1x8x32xf32, #tpu.memory_space<vmem>>, %arg3: memref<32x32xf32, #tpu.memory_space<vmem>>, %arg4: memref<1x32xf32, #tpu.memory_space<vmem>>, %arg5: memref<32x64xf32, #tpu.memory_space<vmem>>, %arg6: memref<1x64xf32, #tpu.memory_space<vmem>>, %arg7: memref<32x32xf32, #tpu.memory_space<vmem>>, %arg8: memref<1x32xf32, #tpu.memory_space<vmem>>, %arg9: memref<32x16xf32, #tpu.memory_space<vmem>>, %arg10: memref<1x16xf32, #tpu.memory_space<vmem>>, %arg11: memref<1x16xf32, #tpu.memory_space<vmem>>, %arg12: memref<1x1xf32, #tpu.memory_space<vmem>>, %arg13: memref<1x16x1xf32, #tpu.memory_space<vmem>>) attributes {dimension_semantics = [#tpu.dimension_semantics<parallel>], iteration_bounds = array<i64: 2>, scalar_prefetch = 0 : i64, scratch_operands = 0 : i64, tpu.core_type = #tpu.core_type<tc>, window_params = [{transform_indices = @transform_0, window_bounds = array<i64: 1, 16, 32>}, {transform_indices = @transform_1, window_bounds = array<i64: 1, 8, 32>}, {pipeline_mode = #tpu.pipeline_mode<synchronous>, transform_indices = @transform_2, window_bounds = array<i64: 32, 32>}, {pipeline_mode = #tpu.pipeline_mode<synchronous>, transform_indices = @transform_3, window_bounds = array<i64: 1, 32>}, {pipeline_mode = #tpu.pipeline_mode<synchronous>, transform_indices = @transform_4, window_bounds = array<i64: 32, 64>}, {pipeline_mode = #tpu.pipeline_mode<synchronous>, transform_indices = @transform_5, window_bounds = array<i64: 1, 64>}, {pipeline_mode = #tpu.pipeline_mode<synchronous>, transform_indices = @transform_6, window_bounds = array<i64: 32, 32>}, {pipeline_mode = #tpu.pipeline_mode<synchronous>, transform_indices = @transform_7, window_bounds = array<i64: 1, 32>}, {pipeline_mode = #tpu.pipeline_mode<synchronous>, transform_indices = @transform_8, window_bounds = array<i64: 32, 16>}, {pipeline_mode = #tpu.pipeline_mode<synchronous>, transform_indices = @transform_9, window_bounds = array<i64: 1, 16>}, {pipeline_mode = #tpu.pipeline_mode<synchronous>, transform_indices = @transform_10, window_bounds = array<i64: 1, 16>}, {pipeline_mode = #tpu.pipeline_mode<synchronous>, transform_indices = @transform_11, window_bounds = array<i64: 1, 1>}, {transform_indices = @transform_12, window_bounds = array<i64: 1, 16, 1>}]} {
    %c0 = arith.constant 0 : index
    %c0_0 = arith.constant 0 : index
    %c0_1 = arith.constant 0 : index
    %0 = vector.load %arg1[%c0, %c0_0, %c0_1] : memref<1x16x32xf32, #tpu.memory_space<vmem>>, vector<1x16x32xf32>
    %1 = vector.shape_cast %0 : vector<1x16x32xf32> to vector<16x32xf32>
    %c0_2 = arith.constant 0 : index
    %c0_3 = arith.constant 0 : index
    %c0_4 = arith.constant 0 : index
    %2 = vector.load %arg2[%c0_2, %c0_3, %c0_4] : memref<1x8x32xf32, #tpu.memory_space<vmem>>, vector<1x8x32xf32>
    %3 = vector.shape_cast %2 : vector<1x8x32xf32> to vector<8x32xf32>
    %c0_5 = arith.constant 0 : index
    %c0_6 = arith.constant 0 : index
    %4 = vector.load %arg3[%c0_5, %c0_6] : memref<32x32xf32, #tpu.memory_space<vmem>>, vector<32x32xf32>
    %c0_7 = arith.constant 0 : index
    %c0_8 = arith.constant 0 : index
    %5 = vector.load %arg4[%c0_7, %c0_8] : memref<1x32xf32, #tpu.memory_space<vmem>>, vector<1x32xf32>
    %c0_9 = arith.constant 0 : index
    %c0_10 = arith.constant 0 : index
    %6 = vector.load %arg5[%c0_9, %c0_10] : memref<32x64xf32, #tpu.memory_space<vmem>>, vector<32x64xf32>
    %c0_11 = arith.constant 0 : index
    %c0_12 = arith.constant 0 : index
    %7 = vector.load %arg6[%c0_11, %c0_12] : memref<1x64xf32, #tpu.memory_space<vmem>>, vector<1x64xf32>
    %c0_13 = arith.constant 0 : index
    %c0_14 = arith.constant 0 : index
    %8 = vector.load %arg7[%c0_13, %c0_14] : memref<32x32xf32, #tpu.memory_space<vmem>>, vector<32x32xf32>
    %c0_15 = arith.constant 0 : index
    %c0_16 = arith.constant 0 : index
    %9 = vector.load %arg8[%c0_15, %c0_16] : memref<1x32xf32, #tpu.memory_space<vmem>>, vector<1x32xf32>
    %cst = arith.constant dense<0.000000e+00> : vector<16x32xf32>
    %10 = tpu.matmul %1, %4, %cst {dimension_numbers = #tpu.dot_dimension_numbers<[1], [0], [0], [1], [0, 0, 1, 1], [], []>} : vector<16x32xf32>, vector<32x32xf32>, vector<16x32xf32> -> vector<16x32xf32>
    %11 = vector.broadcast %5 : vector<1x32xf32> to vector<16x32xf32>
    %12 = arith.addf %10, %11 : vector<16x32xf32>
    %cst_17 = arith.constant dense<0.000000e+00> : vector<8x64xf32>
    %13 = tpu.matmul %3, %6, %cst_17 {dimension_numbers = #tpu.dot_dimension_numbers<[1], [0], [0], [1], [0, 0, 1, 1], [], []>} : vector<8x32xf32>, vector<32x64xf32>, vector<8x64xf32> -> vector<8x64xf32>
    %14 = vector.broadcast %7 : vector<1x64xf32> to vector<8x64xf32>
    %15 = arith.addf %13, %14 : vector<8x64xf32>
    %16 = vector.extract_strided_slice %15 {offsets = [0, 0], sizes = [8, 32], strides = [1, 1]} : vector<8x64xf32> to vector<8x32xf32>
    %17 = vector.extract_strided_slice %15 {offsets = [0, 32], sizes = [8, 32], strides = [1, 1]} : vector<8x64xf32> to vector<8x32xf32>
    %cst_18 = arith.constant 0.000000e+00 : f32
    %18 = vector.broadcast %cst_18 : f32 to vector<16x32xf32>
    %19 = vector.extract_strided_slice %12 {offsets = [0, 0], sizes = [16, 8], strides = [1, 1]} : vector<16x32xf32> to vector<16x8xf32>
    %20 = vector.extract_strided_slice %16 {offsets = [0, 0], sizes = [8, 8], strides = [1, 1]} : vector<8x32xf32> to vector<8x8xf32>
    %21 = vector.extract_strided_slice %17 {offsets = [0, 0], sizes = [8, 8], strides = [1, 1]} : vector<8x32xf32> to vector<8x8xf32>
    %cst_19 = arith.constant dense<0.000000e+00> : vector<16x8xf32>
    %22 = tpu.matmul %19, %20, %cst_19 {dimension_numbers = #tpu.dot_dimension_numbers<[1], [1], [0], [0], [0, 0, 1, 0], [], []>} : vector<16x8xf32>, vector<8x8xf32>, vector<16x8xf32> -> vector<16x8xf32>
    %cst_20 = arith.constant 0.353553385 : f32
    %23 = vector.broadcast %cst_20 : f32 to vector<16x8xf32>
    %24 = arith.mulf %22, %23 : vector<16x8xf32>
    %cst_21 = arith.constant dense<0xFF800000> : vector<16xf32>
    %25 = vector.multi_reduction <maximumf>, %24, %cst_21 [1] : vector<16x8xf32> to vector<16xf32>
    %26 = vector.shape_cast %25 : vector<16xf32> to vector<16x1xf32>
    %27 = vector.broadcast %26 : vector<16x1xf32> to vector<16x8xf32>
    %28 = arith.subf %24, %27 : vector<16x8xf32>
    %29 = math.exp %28 : vector<16x8xf32>
    %cst_22 = arith.constant dense<0.000000e+00> : vector<16xf32>
    %30 = vector.multi_reduction <add>, %29, %cst_22 [1] : vector<16x8xf32> to vector<16xf32>
    %31 = vector.shape_cast %30 : vector<16xf32> to vector<16x1xf32>
    %32 = tpu.reciprocal %31 {approx = true} : vector<16x1xf32> -> vector<16x1xf32>
    %33 = vector.broadcast %32 : vector<16x1xf32> to vector<16x8xf32>
    %34 = arith.mulf %29, %33 : vector<16x8xf32>
    %cst_23 = arith.constant dense<0.000000e+00> : vector<16x8xf32>
    %35 = tpu.matmul %34, %21, %cst_23 {dimension_numbers = #tpu.dot_dimension_numbers<[1], [0], [0], [1], [0, 0, 1, 1], [], []>} : vector<16x8xf32>, vector<8x8xf32>, vector<16x8xf32> -> vector<16x8xf32>
    %36 = vector.extract_strided_slice %8 {offsets = [0, 0], sizes = [8, 32], strides = [1, 1]} : vector<32x32xf32> to vector<8x32xf32>
    %cst_24 = arith.constant dense<0.000000e+00> : vector<16x32xf32>
    %37 = tpu.matmul %35, %36, %cst_24 {dimension_numbers = #tpu.dot_dimension_numbers<[1], [0], [0], [1], [0, 0, 1, 1], [], []>} : vector<16x8xf32>, vector<8x32xf32>, vector<16x32xf32> -> vector<16x32xf32>
    %38 = arith.addf %18, %37 : vector<16x32xf32>
    %39 = vector.extract_strided_slice %12 {offsets = [0, 8], sizes = [16, 8], strides = [1, 1]} : vector<16x32xf32> to vector<16x8xf32>
    %40 = vector.extract_strided_slice %16 {offsets = [0, 8], sizes = [8, 8], strides = [1, 1]} : vector<8x32xf32> to vector<8x8xf32>
    %41 = vector.extract_strided_slice %17 {offsets = [0, 8], sizes = [8, 8], strides = [1, 1]} : vector<8x32xf32> to vector<8x8xf32>
    %cst_25 = arith.constant dense<0.000000e+00> : vector<16x8xf32>
    %42 = tpu.matmul %39, %40, %cst_25 {dimension_numbers = #tpu.dot_dimension_numbers<[1], [1], [0], [0], [0, 0, 1, 0], [], []>} : vector<16x8xf32>, vector<8x8xf32>, vector<16x8xf32> -> vector<16x8xf32>
    %cst_26 = arith.constant 0.353553385 : f32
    %43 = vector.broadcast %cst_26 : f32 to vector<16x8xf32>
    %44 = arith.mulf %42, %43 : vector<16x8xf32>
    %cst_27 = arith.constant dense<0xFF800000> : vector<16xf32>
    %45 = vector.multi_reduction <maximumf>, %44, %cst_27 [1] : vector<16x8xf32> to vector<16xf32>
    %46 = vector.shape_cast %45 : vector<16xf32> to vector<16x1xf32>
    %47 = vector.broadcast %46 : vector<16x1xf32> to vector<16x8xf32>
    %48 = arith.subf %44, %47 : vector<16x8xf32>
    %49 = math.exp %48 : vector<16x8xf32>
    %cst_28 = arith.constant dense<0.000000e+00> : vector<16xf32>
    %50 = vector.multi_reduction <add>, %49, %cst_28 [1] : vector<16x8xf32> to vector<16xf32>
    %51 = vector.shape_cast %50 : vector<16xf32> to vector<16x1xf32>
    %52 = tpu.reciprocal %51 {approx = true} : vector<16x1xf32> -> vector<16x1xf32>
    %53 = vector.broadcast %52 : vector<16x1xf32> to vector<16x8xf32>
    %54 = arith.mulf %49, %53 : vector<16x8xf32>
    %cst_29 = arith.constant dense<0.000000e+00> : vector<16x8xf32>
    %55 = tpu.matmul %54, %41, %cst_29 {dimension_numbers = #tpu.dot_dimension_numbers<[1], [0], [0], [1], [0, 0, 1, 1], [], []>} : vector<16x8xf32>, vector<8x8xf32>, vector<16x8xf32> -> vector<16x8xf32>
    %56 = vector.extract_strided_slice %8 {offsets = [8, 0], sizes = [8, 32], strides = [1, 1]} : vector<32x32xf32> to vector<8x32xf32>
    %cst_30 = arith.constant dense<0.000000e+00> : vector<16x32xf32>
    %57 = tpu.matmul %55, %56, %cst_30 {dimension_numbers = #tpu.dot_dimension_numbers<[1], [0], [0], [1], [0, 0, 1, 1], [], []>} : vector<16x8xf32>, vector<8x32xf32>, vector<16x32xf32> -> vector<16x32xf32>
    %58 = arith.addf %38, %57 : vector<16x32xf32>
    %59 = vector.extract_strided_slice %12 {offsets = [0, 16], sizes = [16, 8], strides = [1, 1]} : vector<16x32xf32> to vector<16x8xf32>
    %60 = vector.extract_strided_slice %16 {offsets = [0, 16], sizes = [8, 8], strides = [1, 1]} : vector<8x32xf32> to vector<8x8xf32>
    %61 = vector.extract_strided_slice %17 {offsets = [0, 16], sizes = [8, 8], strides = [1, 1]} : vector<8x32xf32> to vector<8x8xf32>
    %cst_31 = arith.constant dense<0.000000e+00> : vector<16x8xf32>
    %62 = tpu.matmul %59, %60, %cst_31 {dimension_numbers = #tpu.dot_dimension_numbers<[1], [1], [0], [0], [0, 0, 1, 0], [], []>} : vector<16x8xf32>, vector<8x8xf32>, vector<16x8xf32> -> vector<16x8xf32>
    %cst_32 = arith.constant 0.353553385 : f32
    %63 = vector.broadcast %cst_32 : f32 to vector<16x8xf32>
    %64 = arith.mulf %62, %63 : vector<16x8xf32>
    %cst_33 = arith.constant dense<0xFF800000> : vector<16xf32>
    %65 = vector.multi_reduction <maximumf>, %64, %cst_33 [1] : vector<16x8xf32> to vector<16xf32>
    %66 = vector.shape_cast %65 : vector<16xf32> to vector<16x1xf32>
    %67 = vector.broadcast %66 : vector<16x1xf32> to vector<16x8xf32>
    %68 = arith.subf %64, %67 : vector<16x8xf32>
    %69 = math.exp %68 : vector<16x8xf32>
    %cst_34 = arith.constant dense<0.000000e+00> : vector<16xf32>
    %70 = vector.multi_reduction <add>, %69, %cst_34 [1] : vector<16x8xf32> to vector<16xf32>
    %71 = vector.shape_cast %70 : vector<16xf32> to vector<16x1xf32>
    %72 = tpu.reciprocal %71 {approx = true} : vector<16x1xf32> -> vector<16x1xf32>
    %73 = vector.broadcast %72 : vector<16x1xf32> to vector<16x8xf32>
    %74 = arith.mulf %69, %73 : vector<16x8xf32>
    %cst_35 = arith.constant dense<0.000000e+00> : vector<16x8xf32>
    %75 = tpu.matmul %74, %61, %cst_35 {dimension_numbers = #tpu.dot_dimension_numbers<[1], [0], [0], [1], [0, 0, 1, 1], [], []>} : vector<16x8xf32>, vector<8x8xf32>, vector<16x8xf32> -> vector<16x8xf32>
    %76 = vector.extract_strided_slice %8 {offsets = [16, 0], sizes = [8, 32], strides = [1, 1]} : vector<32x32xf32> to vector<8x32xf32>
    %cst_36 = arith.constant dense<0.000000e+00> : vector<16x32xf32>
    %77 = tpu.matmul %75, %76, %cst_36 {dimension_numbers = #tpu.dot_dimension_numbers<[1], [0], [0], [1], [0, 0, 1, 1], [], []>} : vector<16x8xf32>, vector<8x32xf32>, vector<16x32xf32> -> vector<16x32xf32>
    %78 = arith.addf %58, %77 : vector<16x32xf32>
    %79 = vector.extract_strided_slice %12 {offsets = [0, 24], sizes = [16, 8], strides = [1, 1]} : vector<16x32xf32> to vector<16x8xf32>
    %80 = vector.extract_strided_slice %16 {offsets = [0, 24], sizes = [8, 8], strides = [1, 1]} : vector<8x32xf32> to vector<8x8xf32>
    %81 = vector.extract_strided_slice %17 {offsets = [0, 24], sizes = [8, 8], strides = [1, 1]} : vector<8x32xf32> to vector<8x8xf32>
    %cst_37 = arith.constant dense<0.000000e+00> : vector<16x8xf32>
    %82 = tpu.matmul %79, %80, %cst_37 {dimension_numbers = #tpu.dot_dimension_numbers<[1], [1], [0], [0], [0, 0, 1, 0], [], []>} : vector<16x8xf32>, vector<8x8xf32>, vector<16x8xf32> -> vector<16x8xf32>
    %cst_38 = arith.constant 0.353553385 : f32
    %83 = vector.broadcast %cst_38 : f32 to vector<16x8xf32>
    %84 = arith.mulf %82, %83 : vector<16x8xf32>
    %cst_39 = arith.constant dense<0xFF800000> : vector<16xf32>
    %85 = vector.multi_reduction <maximumf>, %84, %cst_39 [1] : vector<16x8xf32> to vector<16xf32>
    %86 = vector.shape_cast %85 : vector<16xf32> to vector<16x1xf32>
    %87 = vector.broadcast %86 : vector<16x1xf32> to vector<16x8xf32>
    %88 = arith.subf %84, %87 : vector<16x8xf32>
    %89 = math.exp %88 : vector<16x8xf32>
    %cst_40 = arith.constant dense<0.000000e+00> : vector<16xf32>
    %90 = vector.multi_reduction <add>, %89, %cst_40 [1] : vector<16x8xf32> to vector<16xf32>
    %91 = vector.shape_cast %90 : vector<16xf32> to vector<16x1xf32>
    %92 = tpu.reciprocal %91 {approx = true} : vector<16x1xf32> -> vector<16x1xf32>
    %93 = vector.broadcast %92 : vector<16x1xf32> to vector<16x8xf32>
    %94 = arith.mulf %89, %93 : vector<16x8xf32>
    %cst_41 = arith.constant dense<0.000000e+00> : vector<16x8xf32>
    %95 = tpu.matmul %94, %81, %cst_41 {dimension_numbers = #tpu.dot_dimension_numbers<[1], [0], [0], [1], [0, 0, 1, 1], [], []>} : vector<16x8xf32>, vector<8x8xf32>, vector<16x8xf32> -> vector<16x8xf32>
    %96 = vector.extract_strided_slice %8 {offsets = [24, 0], sizes = [8, 32], strides = [1, 1]} : vector<32x32xf32> to vector<8x32xf32>
    %cst_42 = arith.constant dense<0.000000e+00> : vector<16x32xf32>
    %97 = tpu.matmul %95, %96, %cst_42 {dimension_numbers = #tpu.dot_dimension_numbers<[1], [0], [0], [1], [0, 0, 1, 1], [], []>} : vector<16x8xf32>, vector<8x32xf32>, vector<16x32xf32> -> vector<16x32xf32>
    %98 = arith.addf %78, %97 : vector<16x32xf32>
    %99 = vector.broadcast %9 : vector<1x32xf32> to vector<16x32xf32>
    %100 = arith.addf %98, %99 : vector<16x32xf32>
    %c0_43 = arith.constant 0 : index
    %c0_44 = arith.constant 0 : index
    %101 = vector.load %arg9[%c0_43, %c0_44] : memref<32x16xf32, #tpu.memory_space<vmem>>, vector<32x16xf32>
    %cst_45 = arith.constant dense<0.000000e+00> : vector<16x16xf32>
    %102 = tpu.matmul %100, %101, %cst_45 {dimension_numbers = #tpu.dot_dimension_numbers<[1], [0], [0], [1], [0, 0, 1, 1], [], []>} : vector<16x32xf32>, vector<32x16xf32>, vector<16x16xf32> -> vector<16x16xf32>
    %c0_46 = arith.constant 0 : index
    %c0_47 = arith.constant 0 : index
    %103 = vector.load %arg10[%c0_46, %c0_47] : memref<1x16xf32, #tpu.memory_space<vmem>>, vector<1x16xf32>
    %104 = vector.broadcast %103 : vector<1x16xf32> to vector<16x16xf32>
    %105 = arith.addf %102, %104 : vector<16x16xf32>
    %cst_48 = arith.constant 0.000000e+00 : f32
    %106 = vector.broadcast %cst_48 : f32 to vector<16x16xf32>
    %107 = arith.maximumf %105, %106 : vector<16x16xf32>
    %c0_49 = arith.constant 0 : index
    %c0_50 = arith.constant 0 : index
    %108 = vector.load %arg11[%c0_49, %c0_50] : memref<1x16xf32, #tpu.memory_space<vmem>>, vector<1x16xf32>
    %109 = vector.broadcast %108 : vector<1x16xf32> to vector<16x16xf32>
    %110 = arith.mulf %107, %109 : vector<16x16xf32>
    %cst_51 = arith.constant dense<0.000000e+00> : vector<16xf32>
    %111 = vector.multi_reduction <add>, %110, %cst_51 [1] : vector<16x16xf32> to vector<16xf32>
    %112 = vector.shape_cast %111 : vector<16xf32> to vector<16x1xf32>
    %c0_52 = arith.constant 0 : index
    %c0_53 = arith.constant 0 : index
    %113 = vector.load %arg12[%c0_52, %c0_53] : memref<1x1xf32, #tpu.memory_space<vmem>>, vector<1x1xf32>
    %114 = vector.broadcast %113 : vector<1x1xf32> to vector<16x1xf32>
    %115 = arith.addf %112, %114 : vector<16x1xf32>
    %c0_54 = arith.constant 0 : index
    %c0_55 = arith.constant 0 : index
    %c0_56 = arith.constant 0 : index
    %116 = vector.load %arg13[%c0_54, %c0_55, %c0_56] : memref<1x16x1xf32, #tpu.memory_space<vmem>>, vector<1x16x1xf32>
    %117 = vector.shape_cast %116 : vector<1x16x1xf32> to vector<16x1xf32>
    %118 = vector.shape_cast %115 : vector<16x1xf32> to vector<1x16x1xf32>
    tpu.vector_store %arg13[%c0_54, %c0_55, %c0_56], %118 {strides = array<i32>} : memref<1x16x1xf32, #tpu.memory_space<vmem>>, vector<1x16x1xf32>,
    return
  }
  func.func @transform_0(%arg0: i32) -> (i32, i32, i32) {
    %c0_i32 = arith.constant 0 : i32
    %c0_i32_0 = arith.constant 0 : i32
    %c0_i32_1 = arith.constant 0 : i32
    return %arg0, %c0_i32, %c0_i32_0 : i32, i32, i32
  }
  func.func @transform_1(%arg0: i32) -> (i32, i32, i32) {
    %c0_i32 = arith.constant 0 : i32
    %c0_i32_0 = arith.constant 0 : i32
    %c0_i32_1 = arith.constant 0 : i32
    return %arg0, %c0_i32, %c0_i32_0 : i32, i32, i32
  }
  func.func @transform_2(%arg0: i32) -> (i32, i32) {
    %c0_i32 = arith.constant 0 : i32
    %c0_i32_0 = arith.constant 0 : i32
    %c0_i32_1 = arith.constant 0 : i32
    return %c0_i32, %c0_i32_0 : i32, i32
  }
  func.func @transform_3(%arg0: i32) -> (i32, i32) {
    %c0_i32 = arith.constant 0 : i32
    %c0_i32_0 = arith.constant 0 : i32
    %c0_i32_1 = arith.constant 0 : i32
    return %c0_i32, %c0_i32_0 : i32, i32
  }
  func.func @transform_4(%arg0: i32) -> (i32, i32) {
    %c0_i32 = arith.constant 0 : i32
    %c0_i32_0 = arith.constant 0 : i32
    %c0_i32_1 = arith.constant 0 : i32
    return %c0_i32, %c0_i32_0 : i32, i32
  }
  func.func @transform_5(%arg0: i32) -> (i32, i32) {
    %c0_i32 = arith.constant 0 : i32
    %c0_i32_0 = arith.constant 0 : i32
    %c0_i32_1 = arith.constant 0 : i32
    return %c0_i32, %c0_i32_0 : i32, i32
  }
  func.func @transform_6(%arg0: i32) -> (i32, i32) {
    %c0_i32 = arith.constant 0 : i32
    %c0_i32_0 = arith.constant 0 : i32
    %c0_i32_1 = arith.constant 0 : i32
    return %c0_i32, %c0_i32_0 : i32, i32
  }
  func.func @transform_7(%arg0: i32) -> (i32, i32) {
    %c0_i32 = arith.constant 0 : i32
    %c0_i32_0 = arith.constant 0 : i32
    %c0_i32_1 = arith.constant 0 : i32
    return %c0_i32, %c0_i32_0 : i32, i32
  }
  func.func @transform_8(%arg0: i32) -> (i32, i32) {
    %c0_i32 = arith.constant 0 : i32
    %c0_i32_0 = arith.constant 0 : i32
    %c0_i32_1 = arith.constant 0 : i32
    return %c0_i32, %c0_i32_0 : i32, i32
  }
  func.func @transform_9(%arg0: i32) -> (i32, i32) {
    %c0_i32 = arith.constant 0 : i32
    %c0_i32_0 = arith.constant 0 : i32
    %c0_i32_1 = arith.constant 0 : i32
    return %c0_i32, %c0_i32_0 : i32, i32
  }
  func.func @transform_10(%arg0: i32) -> (i32, i32) {
    %c0_i32 = arith.constant 0 : i32
    %c0_i32_0 = arith.constant 0 : i32
    %c0_i32_1 = arith.constant 0 : i32
    return %c0_i32, %c0_i32_0 : i32, i32
  }
  func.func @transform_11(%arg0: i32) -> (i32, i32) {
    %c0_i32 = arith.constant 0 : i32
    %c0_i32_0 = arith.constant 0 : i32
    %c0_i32_1 = arith.constant 0 : i32
    return %c0_i32, %c0_i32_0 : i32, i32
  }
  func.func @transform_12(%arg0: i32) -> (i32, i32, i32) {
    %c0_i32 = arith.constant 0 : i32
    %c0_i32_0 = arith.constant 0 : i32
    %c0_i32_1 = arith.constant 0 : i32
    return %arg0, %c0_i32, %c0_i32_0 : i32, i32, i32
  }
}

</mosaic_0001>

<bundles_post_ra>
// kernel: heat_predictor_forward.8
= control target key start
LH: loop header
LB: loop body
LE: loop exit
PB: predicated region body
PF: predicated region fallthrough
CT: control target
= control target key end

     0   :  { %8 = vsyncpa [#allocation3], 0  ;;  %s555_s0 = inlined_call_operand.vmem [shape: f32[2,16,3], index: 0, kind: input, shape index: {}]   ;;  %s556_s1 = inlined_call_operand.hbm [shape: f32[3,32], index: 1, kind: input, shape index: {}]   ;;  %s557_s2 = inlined_call_operand.hbm [shape: f32[1,32], index: 2, kind: input, shape index: {}]   ;;  %s558_s3 = inlined_call_operand.vmem [shape: f32[2,16,32], index: 3, kind: output, shape index: {}]  }
   0x1   :  { %9 = vsyncpa [#allocation5], 0  ;;  %s486_s12 = smov 0  }
   0x2 LB: > { %s492_s13 = sadd.s32 4294967295, %s459_s12   ;;  %p341_p0 = scmp.ge.s32.totalorder %s459_s12, 1  ;;  %s459_s12 = sphi %s486_s12, %s15_s12  }
   0x3   : > { %p114_p1 = scmp.lt.s32.totalorder %s459_s12, 3  ;;  %p559_p2 = scmp.eq.s32.totalorder %s492_s13, 0 }
   0x4   : > { %s461_s15 = smov [#allocation2]   ;;  %s462_s17 = smov [#allocation4]  }
   0x5   : > { %p497_p3 = pnand %p341_p0, %p114_p1  ;;  %s127_s16 = sshll.u32 %s461_s15, 4  ;;  %s128_s16 = int_to_ptr.vmem [resolvable:$true] %s127_s16 }
   0x6   : > { %s138_s18 = sshll.u32 %s462_s17, 4  ;;  %s404_s20 = scalar_lea.vmem %s128_s16, 64  ;;  %s139_s18 = int_to_ptr.vmem [resolvable:$true] %s138_s18 }
   0x7   : > { %p365_p4 = pneg %p497_p3  ;;  %p405_p7 = scmp.ne.s32.totalorder %s128_s16, %s404_s20 }
   0x8   : > { %p412_p10 = scmp.lt.s32.totalorder %s128_s16, %s128_s16  ;;  %p413_p11 = scmp.lt.s32.totalorder %s404_s20, %s404_s20 }
   0x9   : > { %p505_p5 = pnand %p559_p2, %p365_p4 }
   0xa   : > { %p414_p12 = por %p413_p11, %p412_p10 }
   0xb   : > { %p395_p6 = pneg %p505_p5 }
   0xd   : > { %p407_p8 = pnand %p405_p7, %p395_p6 }
   0xf   : > { %p408_p9 = pneg %p407_p8 }
  0x11   : > { %p415_p13 = pnand %p414_p12, %p408_p9 }
  0x13   : > { %418 = shalt.err (!%p415_p13)
}
  0x14   : > { %368 = dma.hbm_to_vmem [thread:$0]  (!%p505_p5), %s556_s1, 64, %s128_s16, [#allocation3]  }
  0x15   : > { %s430_s23 = scalar_lea.vmem %s139_s18, 16  ;;  %s437_s24 = scalar_lea.vmem %s139_s18, 32 }
  0x16   : > { %p431_p0 = scmp.ne.s32.totalorder %s139_s18, %s430_s23  ;;  %p438_p7 = scmp.lt.s32.totalorder %s139_s18, %s139_s18 }
  0x17   : > { %p439_p8 = scmp.lt.s32.totalorder %s437_s24, %s430_s23 }
  0x18   : > { %p433_p1 = pnand %p431_p0, %p395_p6 }
  0x19   : > { %p440_p2 = por %p439_p8, %p438_p7 }
  0x1a   : > { %p434_p4 = pneg %p433_p1 }
  0x1c   : > { %p441_p10 = pnand %p440_p2, %p434_p4 }
  0x1e   : > { %444 = shalt.err (!%p441_p10)
}
  0x1f   : > { %371 = dma.hbm_to_vmem [thread:$0]  (!%p505_p5), %s557_s2, 16, %s139_s18, [#allocation5]  }
  0x20   : > { %159 = sbr.rel (%p497_p3) target bundleno = 188 (0xbc), region = 32  ;;  %p562_p9 = scmp.eq.s32.totalorder (!%p497_p3), %s492_s13, 0 }
  0x25   : > { %450 = dma.done.wait (%p562_p9), [#allocation3], 64   ;;  %p563_p6 = pmov %p562_p9 }
  0x27   : > { %452 = vsyncadd (%p563_p6), [#allocation3], 4294967232  ;;  %p564_p11 = pmov %p563_p6 }
  0x28   : > { %p565_p2 = pmov %p563_p6 }
  0x29   : > { %454 = dma.done.wait (%p564_p11), [#allocation5], 16  }
  0x2a   : > { %456 = vsyncadd (%p565_p2), [#allocation5], 4294967280  ;;  %p187_p12 = scmp.lt.s32.totalorder %s492_s13, 1  ;;  %v463_v0 = vmov 1   ;;  %v464_v1 = vmov 0   ;;  %v465_v4 = vmov 2   ;;  %v217_v5 = vlaneseq }
  0x2b   : > { %390 = vset.pattern.permute.xlu1 %v463_v0  ;;  %389 = vset.pattern.permute.xlu0 %v464_v1  ;;  %v199_v8 = vld [vmem:[#allocation2] sm:$0x7]  ;;  %v352_v15 = vld [vmem:[#allocation4] ss:$0 sm:$0xff]  ;;  %vm259_vm0 = vcmask 261120  }
  0x2c   : > { %s567_s13 = smov (!%p187_p12, %s492_s13), 1  ;;  %v218_v6 = vshrl.u32 %v217_v5, 7 }
  0x2d   : > { %s355_s27 = sshll.u32 %s567_s13, 4 }
  0x2e   : > { %s191_s30 = scalar_lea.vmem %s555_s0, %s355_s27  ;;  %v219_v7 = vsub.s32 0, %v218_v6  ;;  %v235_v10 = vsub.s32 1, %v218_v6  ;;  %v251_v14 = vsub.s32 2, %v218_v6  ;;  %s196_s6 = scalar_lea.vmem %s558_s3, %s355_s27 }
  0x2f   : > { %v197_v2 = vld [vmem:[%s191_s30] sm:$0xff]  ;;  %v198_v3 = vld [vmem:[%s191_s30 + $0x8] sm:$0xff] }
  0x30   : > { %226 = vperm.xlu1 %390, %v197_v2   ;;  %209 = vperm.xlu0 %389, %v197_v2   ;;  %v220_v9 = vrot.slane %v199_v8, %v219_v7  ;;  %v236_v16 = vrot.slane %v199_v8, %v235_v10  ;;  %v252_v21 = vrot.slane %v199_v8, %v251_v14 }
  0x34   : > { %230 = vperm.xlu1 %390, %v198_v3   ;;  %214 = vperm.xlu0 %389, %v198_v3  }
  0x38   : > { %392 = vset.pattern.permute.xlu1 %v465_v4  ;;  %391 = vset.pattern.permute.xlu0 %v465_v4 }
  0x39   : > { %246 = vperm.xlu1 %392, %v198_v3   ;;  %242 = vperm.xlu0 %391, %v197_v2  }
  0xab   : > { %v227_v11 = vpop.permute.xlu1 %226  ;;  %v210_v12 = vpop.permute.xlu0 %209 }
  0xac   : > { %v221_v13 = vmul.f32 %v220_v9, %v210_v12  ;;  %v237_v24 = vmul.f32 %v236_v16, %v227_v11 }
  0xae   : > { %v223_v20 = vadd.f32 %v352_v15, %v221_v13 }
  0xaf   : > { %v231_v17 = vpop.permute.xlu1 %230  ;;  %v215_v18 = vpop.permute.xlu0 %214 }
  0xb0   : > { %v222_v19 = vmul.f32 %v220_v9, %v215_v18  ;;  %v238_v22 = vmul.f32 %v236_v16, %v231_v17  ;;  %v239_v29 = vadd.f32 %v237_v24, %v223_v20 }
  0xb2   : > { %v224_v23 = vadd.f32 %v352_v15, %v222_v19 }
  0xb4   : > { %v247_v25 = vpop.permute.xlu1 %246  ;;  %v240_v26 = vadd.f32 %v238_v22, %v224_v23  ;;  %v243_v27 = vpop.permute.xlu0 %242 }
  0xb5   : > { %v254_v28 = vmul.f32 %v252_v21, %v247_v25  ;;  %v253_v30 = vmul.f32 %v252_v21, %v243_v27 }
  0xb7   : > { %v256_v31 = vadd.f32 %v254_v28, %v240_v26  ;;  %v255_v32 = vadd.f32 %v253_v30, %v239_v29 }
  0xb9   : > { %v258_v33 = vmax.f32 %v256_v31, 0.0  ;;  %v257_v34 = vmax.f32 %v255_v32, 0.0 }
  0xbb   : > { %261 = vst.msk [vmem:[%s196_s6 + $0x8] sm:$0xff] %vm259_vm0, %v258_v33  ;;  %260 = vst.msk [vmem:[%s196_s6] sm:$0xff] %vm259_vm0, %v257_v34 }
  0xbc PF: > { %s15_s12 = sadd.s32 1, %s459_s12  }
  0xbd   : > { %p12_p3 = scmp.ge.s32.totalorder %s15_s12, 4  }
  0xbf   :  { %14 = sbr.rel (!%p12_p3) target bundleno = 2 (0x2), region = 71 }
  0xc4   :  { %283 = vsyncpa [#allocation3], 1 }
  0xc5   :  { %285 = vsyncpa [#allocation3 + $0x1], 1 }
  0xc6   :  { %286 = vsyncpa [#allocation5], 1 }

// kernel: heat_predictor_forward.10
= control target key start
LH: loop header
LB: loop body
LE: loop exit
PB: predicated region body
PF: predicated region fallthrough
CT: control target
= control target key end

     0   :  { %s2100_s21 = smov 0   ;;  %s2305_s0 = inlined_call_operand.vmem [shape: f32[2,8,32], index: 0, kind: input, shape index: {}, may-alias: {0,1}]   ;;  %s2306_s1 = inlined_call_operand.vmem [shape: f32[2,8,32], index: 1, kind: input, shape index: {}, may-alias: {0,1}]   ;;  %s2307_s2 = inlined_call_operand.vmem [shape: f32[32,32], index: 2, kind: input, shape index: {}]   ;;  %s2308_s3 = inlined_call_operand.vmem [shape: f32[1,32], index: 3, kind: input, shape index: {}]   ;;  %s2309_s4 = inlined_call_operand.vmem [shape: f32[32,64], index: 4, kind: input, shape index: {}]   ;;  %s2310_s5 = inlined_call_operand.vmem [shape: f32[1,64], index: 5, kind: input, shape index: {}]   ;;  %s2311_s6 = inlined_call_operand.vmem [shape: f32[32,32], index: 6, kind: input, shape index: {}]   ;;  %s2312_s7 = inlined_call_operand.vmem [shape: f32[1,32], index: 7, kind: input, shape index: {}]   ;;  %s2313_s8 = inlined_call_operand.vmem [shape: f32[32,32], index: 8, kind: input, shape index: {}]   ;;  %s2314_s9 = inlined_call_operand.vmem [shape: f32[1,32], index: 9, kind: input, shape index: {}]   ;;  %s2315_s10 = inlined_call_operand.vmem [shape: f32[32,32], index: 10, kind: input, shape index: {}]   ;;  %s2316_s11 = inlined_call_operand.vmem [shape: f32[1,32], index: 11, kind: input, shape index: {}]   ;;  %s2317_s12 = inlined_call_operand.vmem [shape: f32[2,8,32], index: 12, kind: output, shape index: {}]  }
   0x1 LB: > { %s1802_s22 = sadd.s32 4294967295, %s2024_s21   ;;  %p1806_p0 = scmp.ge.s32.totalorder %s2024_s21, 1  ;;  %s2024_s21 = sphi %s2100_s21, %s22_s21  }
   0x2   : > { %p370_p1 = scmp.lt.s32.totalorder %s2024_s21, 3 }
   0x4   : > { %p371_p2 = pnand %p1806_p0, %p370_p1 }
   0x5   : > { %p414_p3 = scmp.lt.s32.totalorder (!%p371_p2), %s1802_s22, 1  ;;  %s2028_s15 = smov (!%p371_p2), 120  }
   0x6   : > { %374 = sbr.rel (%p371_p2) target bundleno = 2841 (0xb19), region = 68  ;;  %s2029_s16 = smov (!%p371_p2), 96  }
   0x7   : > { %s2030_s18 = smov (!%p371_p2), 88   ;;  %s2031_s19 = smov (!%p371_p2), 112  }
   0x8   : > { %s2032_s25 = smov (!%p371_p2), 80   ;;  %s2033_s26 = smov (!%p371_p2), 104  }
   0x9   : > { %s2034_s29 = smov (!%p371_p2), 72  }
   0xb   : > { %v436_v0 = vld [vmem:[%s2309_s4 + $0x18] sm:$0xff]  ;;  %v2026_v2 = vmov 0.0   ;;  %v435_v3 = vld [vmem:[%s2309_s4 + $0x10] sm:$0xff]  ;;  %s2319_s22 = smov (!%p414_p3, %s1802_s22), 1  ;;  %v434_v5 = vld [vmem:[%s2309_s4 + $0x8] sm:$0xff]  ;;  %vm449_vm0 = vcmask 261120  }
   0xc   : > { %v431_v1 = vld [vmem:[%s2307_s2 + $0x18] sm:$0xff]  ;;  %1892 = vmatprep.subr.mxu1 %v2026_v2  ;;  %1881 = vmatprep.subr.mxu0 %v2026_v2  ;;  %v430_v4 = vld [vmem:[%s2307_s2 + $0x10] sm:$0xff]  ;;  %v429_v6 = vld [vmem:[%s2307_s2 + $0x8] sm:$0xff]  ;;  %s2130_s17 = sshll.u32 %s2319_s22, 3  ;;  %vm2027_vm1 = vmmov 0   ;;  %vm602_vm2 = vcmask 64512  }
   0xd   : > { %1893 = vmatpush3.msra.mxu1 %v436_v0  ;;  %1882 = vmatpush3.msra.mxu0 %v431_v1  ;;  %v433_v7 = vld [vmem:[%s2309_s4] sm:$0xff]  ;;  %s421_s24 = scalar_lea.vmem %s2306_s1, %s2130_s17  ;;  %s417_s28 = scalar_lea.vmem %s2305_s0, %s2130_s17  ;;  %v439_v43 = vld [vmem:[%s2311_s6 + $0x8] sm:$0xff] }
   0xe   : > { %1894 = vmatprep.subr.mxu1 %v2026_v2  ;;  %1883 = vmatprep.subr.mxu0 %v2026_v2  ;;  %v427_v8 = vld [vmem:[%s421_s24] sm:$0xff]  ;;  %s425_s22 = scalar_lea.vmem %s2317_s12, %s2130_s17 }
   0xf   : > { %1895 = vmatpush3.msra.mxu1 %v435_v3  ;;  %1884 = vmatpush3.msra.mxu0 %v430_v4  ;;  %v428_v9 = vld [vmem:[%s2307_s2] sm:$0xff] }
  0x10   : > { %1896 = vmatprep.subr.mxu1 %v2026_v2  ;;  %1885 = vmatprep.subr.mxu0 %v2026_v2  ;;  %v426_v10 = vld [vmem:[%s417_s28] sm:$0xff] }
  0x11   : > { %1897 = vmatpush3.msra.mxu1 %v434_v5  ;;  %1886 = vmatpush3.msra.mxu0 %v429_v6  ;;  %v1812_v11 = vld [vmem:[%s2310_s5] ss:$0 sm:$0xff] }
  0x12   : > { %1898 = vmatprep.subr.mxu1 %v2026_v2  ;;  %1900 = vmatprep.mubr.msk.f32.mxu1 %vm2027_vm1, %v2026_v2  ;;  %v1810_v13 = vld [vmem:[%s2308_s3] ss:$0 sm:$0xff] }
  0x13   : > { %1899 = vmatpush3.msra.mxu1 %v433_v7  ;;  %1887 = vmatprep.subr.mxu0 %v2026_v2  ;;  %v438_v48 = vld [vmem:[%s2311_s6] sm:$0xff] }
  0x14   : > { %1901 = vmatmul.mubr.msk.f32.vlgmr.msra.gmra.mxu1 %vm449_vm0, %v427_v8  ;;  %1888 = vmatpush3.msra.mxu0 %v428_v9 }
  0x15   : > { %1889 = vmatprep.mubr.msk.f32.mxu0 %vm2027_vm1, %v2026_v2  ;;  %1903 = vmatprep.subr.mxu0 %v2026_v2 }
  0x16   : > { %1890 = vmatmul.mubr.msk.f32.vlgmr.msra.gmra.mxu0 %vm449_vm0, %v426_v10  ;;  %1908 = vmatprep.subr.mxu1 %v2026_v2 }
  0x17   : > { %1905 = vmatprep.mubr.msk.f32.mxu0 %vm2027_vm1, %v2026_v2  ;;  %1910 = vmatprep.mubr.msk.f32.mxu1 %vm2027_vm1, %v2026_v2 }
  0xd4   : > { %v598_v12 = vpop.f32.mrf.mxu1 }
  0xd5   : > { %v2168_v14 = vadd.f32 %v1812_v11, %v598_v12  ;;  %v440_v11 = vld [vmem:[%s2311_s6 + $0x10] sm:$0xff] }
  0xd6   : > { %v519_v15 = vpop.f32.mrf.mxu0  ;;  %v1902_v16 = vpop.f32.mrf.mxu1 }
  0xd7   : > { %v2170_v17 = vadd.f32 %v1810_v13, %v519_v15  ;;  %769 = vrot.lane.b32.xlu0 %v2168_v14, %s2028_s15  ;;  %1904 = vmatpush3.xpose.msk.msra.mxu0 %vm602_vm2, %v2168_v14 }
  0xd8   : > { %v1891_v18 = vpop.f32.mrf.mxu0  ;;  %1913 = vmatprep.subr.mxu0 %v2026_v2 }
  0xda   : > { %1906 = vmatmul.mubr.msk.f32.vlgmr.msra.gmra.mxu0 %vm602_vm2, %v2170_v17 }
  0xdb   : > { %767 = vrot.lane.b32.xlu0 %v2170_v17, %s2028_s15  ;;  %1915 = vmatprep.mubr.msk.f32.mxu0 %vm2027_vm1, %v2026_v2 }
 0x149   : > { %v770_v19 = vpop.permute.xlu0 %769 }
 0x14a   : > { %1914 = vmatpush3.xpose.msk.msra.mxu0 %vm602_vm2, %v770_v19 }
 0x14b   : > { %1923 = vmatprep.subr.mxu0 %v2026_v2 }
 0x14d   : > { %v768_v20 = vpop.permute.xlu0 %767 }
 0x14e   : > { %1916 = vmatmul.mubr.msk.f32.vlgmr.msra.gmra.mxu0 %vm602_vm2, %v768_v20 }
 0x14f   : > { %1925 = vmatprep.mubr.msk.f32.mxu0 %vm2027_vm1, %v2026_v2  ;;  %1924 = vmatpush3.msra.mxu0 %v439_v43 }
 0x150   : > { %1933 = vmatprep.subr.mxu0 %v2026_v2 }
 0x19a   : > { %v675_v21 = vpop.f32.mrf.mxu0 }
 0x19b   : > { %v679_v22 = vmul.f32 0.35355338, %v675_v21 }
 0x19c   : > { %v1907_v23 = vpop.f32.mrf.mxu0 }
 0x19d   : > { %v680_v24 = vsel %vm602_vm2, %v679_v22, -inf }
 0x19e   : > { %681 = vmax.xlane.f32.xlu1 %v680_v24  ;;  %v441_v24 = vld [vmem:[%s2311_s6 + $0x18] sm:$0xff] }
 0x20e   : > { %v841_v25 = vpop.f32.mrf.mxu0 }
 0x20f   : > { %v845_v26 = vmul.f32 0.35355338, %v841_v25 }
 0x210   : > { %v1917_v27 = vpop.f32.mrf.mxu0 }
 0x211   : > { %v846_v28 = vsel %vm602_vm2, %v845_v26, -inf }
 0x212   : > { %847 = vmax.xlane.f32.xlu1 %v846_v28 }
 0x223   : > { %691 = vrot.lane.b32.xlu1 %v2168_v14, %s2029_s16 }
 0x227   : > { %v682_v29 = vpop.xlane.xlu1 %681 }
 0x228   : > { %v683_v30 = vsub.f32 %v679_v22, %v682_v29 }
 0x22a   : > { %v684_v31 = vmul.f32 1.442695, %v683_v30 }
 0x22c   : > { %2002 = vpow2.f32 %v684_v31 }
 0x239   : > { %v2003_v32 = vpop.eup %2002 }
 0x23a   : > { %v686_v33 = vsel %vm602_vm2, %v2003_v32, 0.0 }
 0x23b   : > { %687 = vadd.xlane.f32.xlu0 %v686_v33 }
 0x29b   : > { %v848_v34 = vpop.xlane.xlu1 %847 }
 0x29c   : > { %v849_v35 = vsub.f32 %v845_v26, %v848_v34 }
 0x29e   : > { %v850_v36 = vmul.f32 1.442695, %v849_v35  ;;  %v1568_v35 = vld [vmem:[%s2313_s8 + $0x10] sm:$0xff] }
 0x29f   : > { %v692_v37 = vpop.permute.xlu1 %691 }
 0x2a0   : > { %2004 = vpow2.f32 %v850_v36  ;;  %1909 = vmatpush3.msra.mxu1 %v692_v37  ;;  %v1567_v36 = vld [vmem:[%s2313_s8 + $0x8] sm:$0xff]  ;;  %v1566_v37 = vld [vmem:[%s2313_s8] sm:$0xff] }
 0x2a1   : > { %1918 = vmatprep.subr.mxu1 %v2026_v2 }
 0x2ad   : > { %v2005_v38 = vpop.eup %2004 }
 0x2ae   : > { %v852_v39 = vsel %vm602_vm2, %v2005_v38, 0.0 }
 0x2af   : > { %853 = vadd.xlane.f32.xlu1 %v852_v39  ;;  %v1830_v39 = vld [vmem:[%s2312_s7] ss:$0 sm:$0xff] }
 0x2c0   : > { %857 = vrot.lane.b32.xlu1 %v2168_v14, %s2030_s18 }
 0x2c4   : > { %v688_v40 = vpop.xlane.xlu0 %687  ;;  %1081 = vrot.lane.b32.xlu1 %v2168_v14, %s2031_s19 }
 0x2c5   : > { %2006 = vrcp.f32 %v688_v40 }
 0x2c8   : > { %1079 = vrot.lane.b32.xlu1 %v2170_v17, %s2031_s19 }
 0x2d2   : > { %v2007_v41 = vpop.eup %2006 }
 0x2d3   : > { %v690_v42 = vmul.f32 %v2007_v41, %v2003_v32 }
 0x2d5   : > { %1911 = vmatmul.mubr.msk.f32.vlgmr.msra.gmra.mxu1 %vm602_vm2, %v690_v42 }
 0x2d6   : > { %1920 = vmatprep.mubr.msk.f32.mxu1 %vm2027_vm1, %v2026_v2 }
 0x338   : > { %v854_v44 = vpop.xlane.xlu1 %853 }
 0x339   : > { %2008 = vrcp.f32 %v854_v44  ;;  %v1653_v44 = vld [vmem:[%s2315_s10 + $0x10] sm:$0xff] }
 0x33c   : > { %v858_v45 = vpop.permute.xlu1 %857 }
 0x33d   : > { %1919 = vmatpush3.msra.mxu1 %v858_v45  ;;  %v1652_v45 = vld [vmem:[%s2315_s10 + $0x8] sm:$0xff] }
 0x33e   : > { %1928 = vmatprep.subr.mxu1 %v2026_v2 }
 0x340   : > { %v1082_v51 = vpop.permute.xlu1 %1081 }
 0x344   : > { %v1080_v54 = vpop.permute.xlu1 %1079 }
 0x346   : > { %v2009_v46 = vpop.eup %2008 }
 0x347   : > { %v856_v47 = vmul.f32 %v2009_v46, %v2005_v38  ;;  %v1654_v38 = vld [vmem:[%s2315_s10 + $0x18] sm:$0xff]  ;;  %v1651_v46 = vld [vmem:[%s2315_s10] sm:$0xff] }
 0x349   : > { %1921 = vmatmul.mubr.msk.f32.vlgmr.msra.gmra.mxu1 %vm602_vm2, %v856_v47  ;;  %v1831_v47 = vld [vmem:[%s2314_s9] ss:$0 sm:$0xff] }
 0x34a   : > { %1929 = vmatpush3.msra.mxu1 %v438_v48  ;;  %1930 = vmatprep.mubr.msk.f32.mxu1 %vm2027_vm1, %v2026_v2 }
 0x34b   : > { %1938 = vmatprep.subr.mxu1 %v2026_v2 }
 0x395   : > { %v763_v49 = vpop.f32.mrf.mxu1 }
 0x396   : > { %1931 = vmatmul.mubr.msk.f32.vlgmr.msra.gmra.mxu1 %vm602_vm2, %v763_v49 }
 0x397   : > { %v1912_v50 = vpop.f32.mrf.mxu1  ;;  %1940 = vmatprep.mubr.msk.f32.mxu1 %vm2027_vm1, %v2026_v2 }
 0x409   : > { %v929_v52 = vpop.f32.mrf.mxu1 }
 0x40a   : > { %1926 = vmatmul.mubr.msk.f32.vlgmr.msra.gmra.mxu0 %vm602_vm2, %v929_v52  ;;  %v1833_v52 = vld [vmem:[%s2316_s11] ss:$0 sm:$0xff] }
 0x40b   : > { %1934 = vmatpush3.xpose.msk.msra.mxu0 %vm602_vm2, %v1082_v51  ;;  %v1922_v53 = vpop.f32.mrf.mxu1  ;;  %1935 = vmatprep.mubr.msk.f32.mxu0 %vm2027_vm1, %v2026_v2 }
 0x40c   : > { %1943 = vmatprep.subr.mxu0 %v2026_v2 }
 0x40e   : > { %1936 = vmatmul.mubr.msk.f32.vlgmr.msra.gmra.mxu0 %vm602_vm2, %v1080_v54 }
 0x40f   : > { %1945 = vmatprep.mubr.msk.f32.mxu0 %vm2027_vm1, %v2026_v2  ;;  %1944 = vmatpush3.msra.mxu0 %v440_v11 }
 0x410   : > { %1953 = vmatprep.subr.mxu0 %v2026_v2 }
 0x456   : > { %v1075_v55 = vpop.f32.mrf.mxu1 }
 0x458   : > { %v1932_v56 = vpop.f32.mrf.mxu1 }
 0x4ca   : > { %v1002_v57 = vpop.f32.mrf.mxu0 }
 0x4cb   : > { %v1076_v25 = vadd.f32 %v1075_v55, %v1002_v57 }
 0x4cc   : > { %v1927_v58 = vpop.f32.mrf.mxu0 }
 0x4ce   : > { %v1153_v59 = vpop.f32.mrf.mxu0 }
 0x4cf   : > { %v1157_v60 = vmul.f32 0.35355338, %v1153_v59 }
 0x4d0   : > { %v1937_v61 = vpop.f32.mrf.mxu0 }
 0x4d1   : > { %v1158_v62 = vsel %vm602_vm2, %v1157_v60, -inf }
 0x4d2   : > { %1159 = vmax.xlane.f32.xlu0 %v1158_v62 }
 0x4e8   : > { %1169 = vrot.lane.b32.xlu0 %v2168_v14, %s2032_s25 }
 0x4ec   : > { %1321 = vrot.lane.b32.xlu0 %v2168_v14, %s2033_s26 }
 0x4f0   : > { %1319 = vrot.lane.b32.xlu0 %v2170_v17, %s2033_s26 }
 0x55b   : > { %v1160_v63 = vpop.xlane.xlu0 %1159 }
 0x55c   : > { %v1161_v0 = vsub.f32 %v1157_v60, %v1160_v63 }
 0x55e   : > { %v1162_v1 = vmul.f32 1.442695, %v1161_v0 }
 0x55f   : > { %v1170_v3 = vpop.permute.xlu0 %1169 }
 0x560   : > { %2010 = vpow2.f32 %v1162_v1  ;;  %1939 = vmatpush3.msra.mxu1 %v1170_v3 }
 0x561   : > { %1948 = vmatprep.subr.mxu1 %v2026_v2 }
 0x563   : > { %v1322_v8 = vpop.permute.xlu0 %1321 }
 0x567   : > { %v1320_v10 = vpop.permute.xlu0 %1319 }
 0x56d   : > { %v2011_v4 = vpop.eup %2010 }
 0x56e   : > { %v1164_v5 = vsel %vm602_vm2, %v2011_v4, 0.0 }
 0x56f   : > { %1165 = vadd.xlane.f32.xlu1 %v1164_v5 }
 0x5f8   : > { %v1166_v6 = vpop.xlane.xlu1 %1165 }
 0x5f9   : > { %2012 = vrcp.f32 %v1166_v6 }
 0x606   : > { %v2013_v7 = vpop.eup %2012 }
 0x607   : > { %v1168_v9 = vmul.f32 %v2013_v7, %v2011_v4 }
 0x609   : > { %1941 = vmatmul.mubr.msk.f32.vlgmr.msra.gmra.mxu1 %vm602_vm2, %v1168_v9 }
 0x60a   : > { %1949 = vmatpush3.xpose.msk.msra.mxu1 %vm602_vm2, %v1322_v8  ;;  %1950 = vmatprep.mubr.msk.f32.mxu1 %vm2027_vm1, %v2026_v2 }
 0x60b   : > { %1958 = vmatprep.subr.mxu1 %v2026_v2 }
 0x60d   : > { %1951 = vmatmul.mubr.msk.f32.vlgmr.msra.gmra.mxu1 %vm602_vm2, %v1320_v10 }
 0x60e   : > { %1960 = vmatprep.mubr.msk.f32.mxu1 %vm2027_vm1, %v2026_v2  ;;  %1959 = vmatpush3.msra.mxu1 %v441_v24 }
 0x60f   : > { %1974 = vmatprep.subr.mxu1 %v2026_v2 }
 0x6c9   : > { %v1241_v12 = vpop.f32.mrf.mxu1 }
 0x6ca   : > { %1946 = vmatmul.mubr.msk.f32.vlgmr.msra.gmra.mxu0 %vm602_vm2, %v1241_v12 }
 0x6cb   : > { %v1942_v13 = vpop.f32.mrf.mxu1  ;;  %1955 = vmatprep.mubr.msk.f32.mxu0 %vm2027_vm1, %v2026_v2 }
 0x6cd   : > { %v1393_v15 = vpop.f32.mrf.mxu1 }
 0x6ce   : > { %v1397_v16 = vmul.f32 0.35355338, %v1393_v15 }
 0x6cf   : > { %v1952_v17 = vpop.f32.mrf.mxu1 }
 0x6d0   : > { %v1398_v18 = vsel %vm602_vm2, %v1397_v16, -inf }
 0x6d1   : > { %1399 = vmax.xlane.f32.xlu0 %v1398_v18 }
 0x75a   : > { %v1400_v19 = vpop.xlane.xlu0 %1399 }
 0x75b   : > { %v1401_v20 = vsub.f32 %v1397_v16, %v1400_v19 }
 0x75d   : > { %v1402_v21 = vmul.f32 1.442695, %v1401_v20 }
 0x75f   : > { %2014 = vpow2.f32 %v1402_v21 }
 0x76c   : > { %v2015_v22 = vpop.eup %2014 }
 0x76d   : > { %v1404_v23 = vsel %vm602_vm2, %v2015_v22, 0.0 }
 0x76e   : > { %1405 = vadd.xlane.f32.xlu1 %v1404_v23 }
 0x77f   : > { %1409 = vrot.lane.b32.xlu1 %v2168_v14, %s2034_s29  ;;  %v1569_v14 = vld [vmem:[%s2313_s8 + $0x18] sm:$0xff] }
 0x78a   : > { %v1314_v26 = vpop.f32.mrf.mxu0 }
 0x78b   : > { %v1318_v27 = vadd.f32 %v1314_v26, %v1076_v25 }
 0x78c   : > { %v1947_v28 = vpop.f32.mrf.mxu0 }
 0x7f7   : > { %v1406_v29 = vpop.xlane.xlu1 %1405 }
 0x7f8   : > { %2016 = vrcp.f32 %v1406_v29 }
 0x7fb   : > { %v1410_v30 = vpop.permute.xlu1 %1409 }
 0x7fc   : > { %1954 = vmatpush3.msra.mxu0 %v1410_v30 }
 0x7fd   : > { %1963 = vmatprep.subr.mxu0 %v2026_v2 }
 0x805   : > { %v2017_v31 = vpop.eup %2016 }
 0x806   : > { %v1408_v32 = vmul.f32 %v2017_v31, %v2015_v22 }
 0x808   : > { %1956 = vmatmul.mubr.msk.f32.vlgmr.msra.gmra.mxu0 %vm602_vm2, %v1408_v32 }
 0x809   : > { %1971 = vmatprep.mubr.msk.f32.mxu0 %vm2027_vm1, %v2026_v2  ;;  %1964 = vmatpush3.msra.mxu0 %v1569_v14 }
 0x80a   : > { %1965 = vmatprep.subr.mxu0 %v2026_v2 }
 0x80b   : > { %1966 = vmatpush3.msra.mxu0 %v1568_v35 }
 0x80c   : > { %1967 = vmatprep.subr.mxu0 %v2026_v2 }
 0x80d   : > { %1968 = vmatpush3.msra.mxu0 %v1567_v36 }
 0x80e   : > { %1969 = vmatprep.subr.mxu0 %v2026_v2 }
 0x80f   : > { %1970 = vmatpush3.msra.mxu0 %v1566_v37 }
 0x8c8   : > { %v1481_v33 = vpop.f32.mrf.mxu0 }
 0x8c9   : > { %1961 = vmatmul.mubr.msk.f32.vlgmr.msra.gmra.mxu1 %vm602_vm2, %v1481_v33 }
 0x8ca   : > { %v1957_v34 = vpop.f32.mrf.mxu0  ;;  %1982 = vmatprep.mubr.msk.f32.mxu1 %vm2027_vm1, %v2026_v2  ;;  %1975 = vmatpush3.msra.mxu1 %v1654_v38 }
 0x8cb   : > { %1976 = vmatprep.subr.mxu1 %v2026_v2 }
 0x8cc   : > { %1977 = vmatpush3.msra.mxu1 %v1653_v44 }
 0x8cd   : > { %1978 = vmatprep.subr.mxu1 %v2026_v2 }
 0x8ce   : > { %1979 = vmatpush3.msra.mxu1 %v1652_v45 }
 0x8cf   : > { %1980 = vmatprep.subr.mxu1 %v2026_v2 }
 0x8d0   : > { %1981 = vmatpush3.msra.mxu1 %v1651_v46 }
 0x989   : > { %v1554_v40 = vpop.f32.mrf.mxu1 }
 0x98a   : > { %v1558_v41 = vadd.f32 %v1554_v40, %v1318_v27 }
 0x98b   : > { %v1962_v42 = vpop.f32.mrf.mxu1 }
 0x98c   : > { %v1565_v43 = vadd.f32 %v1830_v39, %v1558_v41 }
 0x98e   : > { %1972 = vmatmul.mubr.msk.f32.vlgmr.msra.gmra.mxu0 %vm449_vm0, %v1565_v43 }
 0xa4e   : > { %v1646_v48 = vpop.f32.mrf.mxu0 }
 0xa4f   : > { %v1647_v49 = vadd.f32 %v1831_v47, %v1646_v48 }
 0xa50   : > { %v1973_v50 = vpop.f32.mrf.mxu0 }
 0xa51   : > { %v1650_v51 = vmax.f32 %v1647_v49, 0.0 }
 0xa53   : > { %1983 = vmatmul.mubr.msk.f32.vlgmr.msra.gmra.mxu1 %vm449_vm0, %v1650_v51 }
 0xb13   : > { %v1731_v53 = vpop.f32.mrf.mxu1 }
 0xb14   : > { %v1732_v54 = vadd.f32 %v1833_v52, %v1731_v53 }
 0xb15   : > { %v1984_v2 = vpop.f32.mrf.mxu1 }
 0xb16   : > { %v1735_v55 = vadd.f32 %v1732_v54, %v1565_v43 }
 0xb18   : > { %1736 = vst.msk [vmem:[%s425_s22] sm:$0xff] %vm449_vm0, %v1735_v55 }
 0xb19 PF: > { %s22_s21 = sadd.s32 1, %s2024_s21  }
 0xb1a   : > { %p19_p4 = scmp.ge.s32.totalorder %s22_s21, 4  }
 0xb1c   :  { %21 = sbr.rel (!%p19_p4) target bundleno = 1 (0x1), region = 101 }

// kernel: heat_predictor_forward.9
= control target key start
LH: loop header
LB: loop body
LE: loop exit
PB: predicated region body
PF: predicated region fallthrough
CT: control target
= control target key end

     0   :  { %17 = vsyncpa [#allocation3], 0  ;;  %s2211_s21 = smov 0   ;;  %s2449_s0 = inlined_call_operand.hbm [shape: f32[1,8,32], index: 0, kind: input, shape index: {}]   ;;  %s2450_s1 = inlined_call_operand.vmem [shape: f32[2,16,32], index: 1, kind: input, shape index: {}]   ;;  %s2451_s2 = inlined_call_operand.vmem [shape: f32[32,32], index: 2, kind: input, shape index: {}]   ;;  %s2452_s3 = inlined_call_operand.vmem [shape: f32[1,32], index: 3, kind: input, shape index: {}]   ;;  %s2453_s4 = inlined_call_operand.vmem [shape: f32[32,64], index: 4, kind: input, shape index: {}]   ;;  %s2454_s5 = inlined_call_operand.vmem [shape: f32[1,64], index: 5, kind: input, shape index: {}]   ;;  %s2455_s6 = inlined_call_operand.vmem [shape: f32[32,32], index: 6, kind: input, shape index: {}]   ;;  %s2456_s7 = inlined_call_operand.vmem [shape: f32[1,32], index: 7, kind: input, shape index: {}]   ;;  %s2457_s8 = inlined_call_operand.vmem [shape: f32[32,32], index: 8, kind: input, shape index: {}]   ;;  %s2458_s9 = inlined_call_operand.vmem [shape: f32[1,32], index: 9, kind: input, shape index: {}]   ;;  %s2459_s10 = inlined_call_operand.vmem [shape: f32[32,32], index: 10, kind: input, shape index: {}]   ;;  %s2460_s11 = inlined_call_operand.vmem [shape: f32[1,32], index: 11, kind: input, shape index: {}]   ;;  %s2461_s12 = inlined_call_operand.vmem [shape: f32[2,8,32], index: 12, kind: output, shape index: {}]  }
   0x1 LB: > { %s1838_s22 = sadd.s32 4294967295, %s2134_s21   ;;  %p1840_p0 = scmp.ge.s32.totalorder %s2134_s21, 1  ;;  %s2134_s21 = sphi %s2211_s21, %s23_s21  }
   0x2   : > { %p311_p1 = scmp.lt.s32.totalorder %s2134_s21, 3  ;;  %p2062_p3 = scmp.eq.s32.totalorder %s1838_s22, 0 }
   0x3   : > { %s2136_s24 = smov [#allocation2]  }
   0x4   : > { %p2219_p2 = pnand %p1840_p0, %p311_p1  ;;  %s324_s25 = sshll.u32 %s2136_s24, 4  ;;  %s325_s25 = int_to_ptr.vmem [resolvable:$true] %s324_s25 }
   0x5   : > { %s2109_s26 = scalar_lea.vmem %s325_s25, 128  ;;  %p2117_p10 = scmp.lt.s32.totalorder %s325_s25, %s325_s25 }
   0x6   : > { %p2058_p4 = pneg %p2219_p2  ;;  %p2110_p7 = scmp.ne.s32.totalorder %s325_s25, %s2109_s26 }
   0x7   : > { %p2118_p11 = scmp.lt.s32.totalorder %s2109_s26, %s2109_s26 }
   0x8   : > { %p2059_p5 = pnand %p2062_p3, %p2058_p4 }
   0x9   : > { %p2119_p12 = por %p2118_p11, %p2117_p10 }
   0xa   : > { %p2100_p6 = pneg %p2059_p5 }
   0xc   : > { %p2112_p8 = pnand %p2110_p7, %p2100_p6 }
   0xe   : > { %p2113_p9 = pneg %p2112_p8 }
  0x10   : > { %p2120_p13 = pnand %p2119_p12, %p2113_p9 }
  0x12   : > { %2123 = shalt.err (!%p2120_p13)
}
  0x13   : > { %2061 = dma.hbm_to_vmem [thread:$0]  (!%p2059_p5), %s2449_s0, 128, %s325_s25, [#allocation3]  }
  0x14   : > { %375 = sbr.rel (%p2219_p2) target bundleno = 2950 (0xb86), region = 68 }
  0x19   : > { %2129 = dma.done.wait (%p2062_p3), [#allocation3], 128  }
  0x1a   : > { %2131 = vsyncadd (%p2062_p3), [#allocation3], 4294967168  ;;  %p416_p0 = scmp.lt.s32.totalorder %s1838_s22, 1  ;;  %v2137_v0 = vmov 0.0   ;;  %vm2138_vm0 = vmmov 0   ;;  %v436_v1 = vld [vmem:[%s2453_s4 + $0x18] sm:$0xff] }
  0x1b   : > { %1934 = vmatprep.subr.mxu0 %v2137_v0  ;;  %1942 = vmatprep.mubr.msk.f32.mxu0 %vm2138_vm0, %v2137_v0  ;;  %v435_v2 = vld [vmem:[%s2453_s4 + $0x10] sm:$0xff]  ;;  %v431_v3 = vld [vmem:[%s2451_s2 + $0x18] sm:$0xff]  ;;  %vm449_vm1 = vcmask 261120   ;;  %v434_v5 = vld [vmem:[%s2453_s4 + $0x8] sm:$0xff]  ;;  %vm610_vm2 = vcmask 64512   ;;  %s2139_s17 = smov 96  }
  0x1c   : > { %s2464_s22 = smov (!%p416_p0, %s1838_s22), 1  ;;  %1945 = vmatprep.subr.mxu1 %v436_v1  ;;  %1935 = vmatpush3.msra.mxu0 %v431_v3  ;;  %v430_v6 = vld [vmem:[%s2451_s2 + $0x10] sm:$0xff]  ;;  %v433_v7 = vld [vmem:[%s2453_s4] sm:$0xff]  ;;  %v429_v8 = vld [vmem:[%s2451_s2 + $0x8] sm:$0xff]  ;;  %s2140_s20 = smov 120   ;;  %vm691_vm3 = vcmask 130048  }
  0x1d   : > { %s1880_s29 = sshll.u32 %s2464_s22, 4  ;;  %1946 = vmatpush3.msra.mxu1 %v436_v1  ;;  %1936 = vmatprep.subr.mxu0 %v2137_v0  ;;  %v428_v10 = vld [vmem:[%s2451_s2] sm:$0xff]  ;;  %s2141_s25 = smov 88   ;;  %v439_v57 = vld [vmem:[%s2455_s6 + $0x8] sm:$0xff] }
  0x1e   : > { %s420_s14 = scalar_lea.vmem %s2450_s1, %s1880_s29  ;;  %1947 = vmatprep.subr.mxu1 %v435_v2  ;;  %1937 = vmatpush3.msra.mxu0 %v430_v6  ;;  %v425_v11 = vld [vmem:[#allocation2] sm:$0xff]  ;;  %s2142_s26 = smov 112  }
  0x1f   : > { %v426_v4 = vld [vmem:[%s420_s14] sm:$0xff]  ;;  %1948 = vmatpush3.msra.mxu1 %v435_v2  ;;  %v427_v9 = vld [vmem:[%s420_s14 + $0x8] sm:$0xff]  ;;  %1938 = vmatprep.subr.mxu0 %v2137_v0  ;;  %s2143_s27 = smov 104   ;;  %s2144_s30 = smov 80  }
  0x20   : > { %1953 = vmatprep.mubr.msk.f32.mxu1 %vm449_vm1, %v426_v4  ;;  %1949 = vmatprep.subr.mxu1 %v434_v5  ;;  %v1850_v12 = vld [vmem:[%s2454_s5] ss:$0 sm:$0xff]  ;;  %s2145_s13 = smov 72  }
  0x21   : > { %1950 = vmatpush3.msra.mxu1 %v434_v5  ;;  %1939 = vmatpush3.msra.mxu0 %v429_v8  ;;  %v1848_v17 = vld [vmem:[%s2452_s3] ss:$0 sm:$0xff] }
  0x22   : > { %1951 = vmatprep.subr.mxu1 %v433_v7  ;;  %1940 = vmatprep.subr.mxu0 %v2137_v0  ;;  %v438_v38 = vld [vmem:[%s2455_s6] sm:$0xff] }
  0x23   : > { %1952 = vmatpush3.msra.mxu1 %v433_v7  ;;  %1941 = vmatpush3.msra.mxu0 %v428_v10 }
  0x24   : > { %1954 = vmatmul.mubr.msk.f32.vlgmr.msra.gmra.mxu1 %vm449_vm1, %v427_v9  ;;  %1943 = vmatmul.mubr.msk.f32.vlgmr.msra.gmra.mxu0 %vm449_vm1, %v425_v11 }
  0x25   : > { %1956 = vmatprep.subr.mxu0 %v2137_v0  ;;  %1960 = vmatprep.mubr.msk.f32.mxu0 %vm2138_vm0, %v2137_v0 }
  0x26   : > { %1963 = vmatprep.subr.mxu1 %v2137_v0  ;;  %1967 = vmatprep.mubr.msk.f32.mxu1 %vm2138_vm0, %v2137_v0 }
  0xe4   : > { %v1955_v13 = vpop.f32.mrf.mxu1  ;;  %v519_v15 = vpop.f32.mrf.mxu0 }
  0xe5   : > { %v2281_v14 = vadd.f32 %v1955_v13, %v1850_v12  ;;  %v2292_v20 = vadd.f32 %v1848_v17, %v519_v15 }
  0xe6   : > { %v601_v16 = vpop.f32.mrf.mxu1  ;;  %v1944_v18 = vpop.f32.mrf.mxu0 }
  0xe7   : > { %705 = vrot.lane.b32.xlu1 %v2281_v14, %s2139_s17  ;;  %1957 = vmatpush3.xpose.msk.msra.mxu0 %vm610_vm2, %v2281_v14  ;;  %v2290_v19 = vadd.f32 %v1850_v12, %v601_v16 }
  0xe8   : > { %1958 = vmatprep.subr.mxu0 %v2137_v0 }
  0xeb   : > { %703 = vrot.lane.b32.xlu1 %v2290_v19, %s2139_s17  ;;  %1959 = vmatpush3.xpose.msk.msra.mxu0 %vm610_vm2, %v2290_v19 }
  0xec   : > { %1977 = vmatprep.subr.mxu0 %v2137_v0 }
  0xee   : > { %1961 = vmatmul.mubr.msk.f32.vlgmr.msra.gmra.mxu0 %vm610_vm2, %v2292_v20 }
  0xef   : > { %784 = vrot.lane.b32.xlu1 %v2290_v19, %s2140_s20  ;;  %1981 = vmatprep.mubr.msk.f32.mxu0 %vm2138_vm0, %v2137_v0 }
  0xf3   : > { %782 = vrot.lane.b32.xlu1 %v2292_v20, %s2140_s20 }
 0x159   : > { %v706_v21 = vpop.permute.xlu1 %705 }
 0x15a   : > { %1964 = vmatpush3.msra.mxu1 %v706_v21 }
 0x15b   : > { %1965 = vmatprep.subr.mxu1 %v2137_v0 }
 0x15d   : > { %v704_v22 = vpop.permute.xlu1 %703 }
 0x15e   : > { %1966 = vmatpush3.msra.mxu1 %v704_v22 }
 0x15f   : > { %1970 = vmatprep.subr.mxu1 %v2137_v0 }
 0x161   : > { %v785_v36 = vpop.permute.xlu1 %784 }
 0x165   : > { %v783_v37 = vpop.permute.xlu1 %782 }
 0x1ae   : > { %v686_v23 = vpop.f32.mrf.mxu0 }
 0x1af   : > { %v690_v24 = vmul.f32 0.35355338, %v686_v23 }
 0x1b0   : > { %v1962_v25 = vpop.f32.mrf.mxu0 }
 0x1b1   : > { %v692_v26 = vsel %vm691_vm3, %v690_v24, -inf }
 0x1b2   : > { %693 = vmax.xlane.f32.xlu0 %v692_v26 }
 0x23b   : > { %v694_v27 = vpop.xlane.xlu0 %693 }
 0x23c   : > { %v695_v28 = vsub.f32 %v690_v24, %v694_v27 }
 0x23e   : > { %v696_v29 = vmul.f32 1.442695, %v695_v28 }
 0x240   : > { %2082 = vpow2.f32 %v696_v29  ;;  %v440_v29 = vld [vmem:[%s2455_s6 + $0x10] sm:$0xff] }
 0x24d   : > { %v2083_v30 = vpop.eup %2082 }
 0x24e   : > { %v698_v31 = vsel %vm691_vm3, %v2083_v30, 0.0 }
 0x24f   : > { %699 = vadd.xlane.f32.xlu0 %v698_v31 }
 0x265   : > { %786 = vrot.lane.b32.xlu0 %v2281_v14, %s2140_s20 }
 0x2d8   : > { %v700_v32 = vpop.xlane.xlu0 %699 }
 0x2d9   : > { %2084 = vrcp.f32 %v700_v32 }
 0x2dc   : > { %v787_v35 = vpop.permute.xlu0 %786 }
 0x2e6   : > { %v2085_v33 = vpop.eup %2084 }
 0x2e7   : > { %v702_v34 = vmul.f32 %v2085_v33, %v2083_v30 }
 0x2e9   : > { %1968 = vmatmul.mubr.msk.f32.vlgmr.msra.gmra.mxu1 %vm691_vm3, %v702_v34 }
 0x2ea   : > { %1971 = vmatpush3.xpose.msk.msra.mxu1 %vm610_vm2, %v787_v35  ;;  %1974 = vmatprep.mubr.msk.f32.mxu1 %vm2138_vm0, %v2137_v0 }
 0x2eb   : > { %1972 = vmatprep.subr.mxu1 %v2137_v0 }
 0x2ee   : > { %1973 = vmatpush3.xpose.msk.msra.mxu1 %vm610_vm2, %v785_v36  ;;  %v441_v36 = vld [vmem:[%s2455_s6 + $0x18] sm:$0xff] }
 0x2ef   : > { %1989 = vmatprep.subr.mxu1 %v2137_v0 }
 0x2f1   : > { %1975 = vmatmul.mubr.msk.f32.vlgmr.msra.gmra.mxu1 %vm610_vm2, %v783_v37  ;;  %v1605_v37 = vld [vmem:[%s2457_s8 + $0x18] sm:$0xff] }
 0x2f2   : > { %1991 = vmatprep.mubr.msk.f32.mxu1 %vm2138_vm0, %v2137_v0  ;;  %1990 = vmatpush3.msra.mxu1 %v438_v38 }
 0x2f3   : > { %2001 = vmatprep.subr.mxu1 %v2137_v0 }
 0x3a9   : > { %v778_v39 = vpop.f32.mrf.mxu1 }
 0x3aa   : > { %1992 = vmatmul.mubr.msk.f32.vlgmr.msra.gmra.mxu1 %vm610_vm2, %v778_v39 }
 0x3ab   : > { %v1969_v40 = vpop.f32.mrf.mxu1  ;;  %2005 = vmatprep.mubr.msk.f32.mxu1 %vm2138_vm0, %v2137_v0 }
 0x3b1   : > { %v860_v41 = vpop.f32.mrf.mxu1 }
 0x3b2   : > { %v864_v42 = vmul.f32 0.35355338, %v860_v41 }
 0x3b3   : > { %v1976_v43 = vpop.f32.mrf.mxu1 }
 0x3b4   : > { %v865_v44 = vsel %vm691_vm3, %v864_v42, -inf }
 0x3b5   : > { %866 = vmax.xlane.f32.xlu1 %v865_v44  ;;  %v1604_v44 = vld [vmem:[%s2457_s8 + $0x10] sm:$0xff] }
 0x3c6   : > { %878 = vrot.lane.b32.xlu1 %v2281_v14, %s2141_s25 }
 0x3ca   : > { %1105 = vrot.lane.b32.xlu1 %v2281_v14, %s2142_s26 }
 0x3ce   : > { %1103 = vrot.lane.b32.xlu1 %v2290_v19, %s2142_s26 }
 0x3d2   : > { %1101 = vrot.lane.b32.xlu1 %v2292_v20, %s2142_s26  ;;  %s1847_s26 = sshll.u32 %s2464_s22, 3 }
 0x3d3   : > { %s424_s29 = scalar_lea.vmem %s2461_s12, %s1847_s26 }
 0x3d6   : > { %1352 = vrot.lane.b32.xlu1 %v2281_v14, %s2143_s27 }
 0x3da   : > { %1348 = vrot.lane.b32.xlu1 %v2292_v20, %s2143_s27 }
 0x43e   : > { %v867_v45 = vpop.xlane.xlu1 %866 }
 0x43f   : > { %v868_v46 = vsub.f32 %v864_v42, %v867_v45  ;;  %v1603_v45 = vld [vmem:[%s2457_s8 + $0x8] sm:$0xff] }
 0x441   : > { %v869_v47 = vmul.f32 1.442695, %v868_v46  ;;  %v1602_v46 = vld [vmem:[%s2457_s8] sm:$0xff] }
 0x442   : > { %v879_v48 = vpop.permute.xlu1 %878 }
 0x443   : > { %2086 = vpow2.f32 %v869_v47  ;;  %1978 = vmatpush3.msra.mxu0 %v879_v48  ;;  %v1690_v47 = vld [vmem:[%s2459_s10 + $0x18] sm:$0xff]  ;;  %v1873_v48 = vld [vmem:[%s2456_s7] ss:$0 sm:$0xff] }
 0x444   : > { %1979 = vmatprep.subr.mxu0 %v2137_v0 }
 0x446   : > { %v1106_v58 = vpop.permute.xlu1 %1105 }
 0x44a   : > { %v1104_v59 = vpop.permute.xlu1 %1103 }
 0x44e   : > { %v1102_v62 = vpop.permute.xlu1 %1101 }
 0x450   : > { %v2087_v49 = vpop.eup %2086 }
 0x451   : > { %v871_v50 = vsel %vm691_vm3, %v2087_v49, 0.0 }
 0x452   : > { %872 = vadd.xlane.f32.xlu0 %v871_v50  ;;  %v1353_v63 = vpop.permute.xlu1 %1352 }
 0x456   : > { %v1349_v2 = vpop.permute.xlu1 %1348 }
 0x468   : > { %876 = vrot.lane.b32.xlu0 %v2290_v19, %s2141_s25 }
 0x46a   : > { %v2336_v51 = vpop.f32.mrf.mxu1 }
 0x46c   : > { %1350 = vrot.lane.b32.xlu0 %v2290_v19, %s2143_s27  ;;  %v1993_v52 = vpop.f32.mrf.mxu1 }
 0x4db   : > { %v873_v53 = vpop.xlane.xlu0 %872 }
 0x4dc   : > { %2088 = vrcp.f32 %v873_v53  ;;  %v1689_v53 = vld [vmem:[%s2459_s10 + $0x10] sm:$0xff] }
 0x4df   : > { %v877_v54 = vpop.permute.xlu0 %876 }
 0x4e0   : > { %1980 = vmatpush3.msra.mxu0 %v877_v54  ;;  %v1688_v54 = vld [vmem:[%s2459_s10 + $0x8] sm:$0xff] }
 0x4e1   : > { %1984 = vmatprep.subr.mxu0 %v2137_v0 }
 0x4e3   : > { %v1351_v1 = vpop.permute.xlu0 %1350 }
 0x4e9   : > { %v2089_v55 = vpop.eup %2088 }
 0x4ea   : > { %v875_v56 = vmul.f32 %v2089_v55, %v2087_v49  ;;  %v1687_v55 = vld [vmem:[%s2459_s10] sm:$0xff] }
 0x4ec   : > { %1982 = vmatmul.mubr.msk.f32.vlgmr.msra.gmra.mxu0 %vm691_vm3, %v875_v56  ;;  %v1874_v56 = vld [vmem:[%s2458_s9] ss:$0 sm:$0xff] }
 0x4ed   : > { %1985 = vmatpush3.msra.mxu0 %v439_v57  ;;  %1986 = vmatprep.mubr.msk.f32.mxu0 %vm2138_vm0, %v2137_v0 }
 0x4ee   : > { %1994 = vmatprep.subr.mxu0 %v2137_v0 }
 0x5ac   : > { %v951_v60 = vpop.f32.mrf.mxu0 }
 0x5ad   : > { %1987 = vmatmul.mubr.msk.f32.vlgmr.msra.gmra.mxu0 %vm610_vm2, %v951_v60 }
 0x5ae   : > { %1995 = vmatpush3.xpose.msk.msra.mxu0 %vm610_vm2, %v1106_v58  ;;  %v1983_v61 = vpop.f32.mrf.mxu0  ;;  %1998 = vmatprep.mubr.msk.f32.mxu0 %vm2138_vm0, %v2137_v0 }
 0x5af   : > { %1996 = vmatprep.subr.mxu0 %v2137_v0  ;;  %v1876_v61 = vld [vmem:[%s2460_s11] ss:$0 sm:$0xff] }
 0x5b2   : > { %1997 = vmatpush3.xpose.msk.msra.mxu0 %vm610_vm2, %v1104_v59 }
 0x5b3   : > { %2013 = vmatprep.subr.mxu0 %v2137_v0 }
 0x5b5   : > { %1999 = vmatmul.mubr.msk.f32.vlgmr.msra.gmra.mxu0 %vm610_vm2, %v1102_v62 }
 0x5b6   : > { %2014 = vmatpush3.xpose.msk.msra.mxu0 %vm610_vm2, %v1353_v63  ;;  %2017 = vmatprep.mubr.msk.f32.mxu0 %vm2138_vm0, %v2137_v0 }
 0x5b7   : > { %2015 = vmatprep.subr.mxu0 %v2137_v0 }
 0x5ba   : > { %2016 = vmatpush3.xpose.msk.msra.mxu0 %vm610_vm2, %v1351_v1 }
 0x5bb   : > { %2032 = vmatprep.subr.mxu0 %v2137_v0 }
 0x5bd   : > { %2018 = vmatmul.mubr.msk.f32.vlgmr.msra.gmra.mxu0 %vm610_vm2, %v1349_v2 }
 0x5be   : > { %2040 = vmatprep.mubr.msk.f32.mxu0 %vm2138_vm0, %v2137_v0  ;;  %2033 = vmatpush3.msra.mxu0 %v1605_v37 }
 0x5bf   : > { %2034 = vmatprep.subr.mxu0 %v2137_v0 }
 0x5c0   : > { %2035 = vmatpush3.msra.mxu0 %v1604_v44 }
 0x5c1   : > { %2036 = vmatprep.subr.mxu0 %v2137_v0 }
 0x5c2   : > { %2037 = vmatpush3.msra.mxu0 %v1603_v45 }
 0x5c3   : > { %2038 = vmatprep.subr.mxu0 %v2137_v0 }
 0x5c4   : > { %2039 = vmatpush3.msra.mxu0 %v1602_v46 }
 0x66d   : > { %v2364_v3 = vpop.f32.mrf.mxu0 }
 0x66e   : > { %v1098_v38 = vadd.f32 %v2336_v51, %v2364_v3 }
 0x66f   : > { %v1988_v4 = vpop.f32.mrf.mxu0 }
 0x675   : > { %v1179_v5 = vpop.f32.mrf.mxu0 }
 0x676   : > { %v1183_v6 = vmul.f32 0.35355338, %v1179_v5 }
 0x677   : > { %v2000_v7 = vpop.f32.mrf.mxu0 }
 0x678   : > { %v1184_v8 = vsel %vm691_vm3, %v1183_v6, -inf }
 0x679   : > { %1185 = vmax.xlane.f32.xlu0 %v1184_v8 }
 0x67d   : > { %v1426_v9 = vpop.f32.mrf.mxu0 }
 0x67e   : > { %v1430_v11 = vmul.f32 0.35355338, %v1426_v9 }
 0x67f   : > { %v2019_v10 = vpop.f32.mrf.mxu0 }
 0x680   : > { %v1431_v12 = vsel %vm691_vm3, %v1430_v11, -inf }
 0x68f   : > { %1197 = vrot.lane.b32.xlu0 %v2281_v14, %s2144_s30 }
 0x6ae   : > { %1432 = vmax.xlane.f32.xlu0 %v1431_v12 }
 0x6c4   : > { %1444 = vrot.lane.b32.xlu0 %v2281_v14, %s2145_s13 }
 0x702   : > { %v1186_v13 = vpop.xlane.xlu0 %1185 }
 0x703   : > { %v1187_v15 = vsub.f32 %v1183_v6, %v1186_v13 }
 0x705   : > { %v1188_v16 = vmul.f32 1.442695, %v1187_v15 }
 0x706   : > { %v1198_v17 = vpop.permute.xlu0 %1197 }
 0x707   : > { %2090 = vpow2.f32 %v1188_v16  ;;  %2002 = vmatpush3.msra.mxu1 %v1198_v17 }
 0x708   : > { %2003 = vmatprep.subr.mxu1 %v2137_v0 }
 0x714   : > { %v2091_v18 = vpop.eup %2090 }
 0x715   : > { %v1190_v20 = vsel %vm691_vm3, %v2091_v18, 0.0 }
 0x716   : > { %1191 = vadd.xlane.f32.xlu1 %v1190_v20 }
 0x727   : > { %1195 = vrot.lane.b32.xlu1 %v2290_v19, %s2144_s30 }
 0x737   : > { %v1433_v21 = vpop.xlane.xlu0 %1432 }
 0x738   : > { %v1434_v22 = vsub.f32 %v1430_v11, %v1433_v21 }
 0x73a   : > { %v1435_v23 = vmul.f32 1.442695, %v1434_v22 }
 0x73b   : > { %v1445_v32 = vpop.permute.xlu0 %1444 }
 0x73c   : > { %2092 = vpow2.f32 %v1435_v23 }
 0x749   : > { %v2093_v24 = vpop.eup %2092 }
 0x74a   : > { %v1437_v14 = vsel %vm691_vm3, %v2093_v24, 0.0 }
 0x74b   : > { %1438 = vadd.xlane.f32.xlu1 %v1437_v14 }
 0x75c   : > { %1442 = vrot.lane.b32.xlu1 %v2290_v19, %s2145_s13 }
 0x79f   : > { %v1192_v25 = vpop.xlane.xlu1 %1191 }
 0x7a0   : > { %2094 = vrcp.f32 %v1192_v25 }
 0x7a3   : > { %v1196_v26 = vpop.permute.xlu1 %1195 }
 0x7a4   : > { %2004 = vmatpush3.msra.mxu1 %v1196_v26 }
 0x7a5   : > { %2008 = vmatprep.subr.mxu1 %v2137_v0 }
 0x7ad   : > { %v2095_v27 = vpop.eup %2094 }
 0x7ae   : > { %v1194_v28 = vmul.f32 %v2095_v27, %v2091_v18 }
 0x7b0   : > { %2006 = vmatmul.mubr.msk.f32.vlgmr.msra.gmra.mxu1 %vm691_vm3, %v1194_v28 }
 0x7b1   : > { %2009 = vmatpush3.msra.mxu1 %v440_v29  ;;  %2010 = vmatprep.mubr.msk.f32.mxu1 %vm2138_vm0, %v2137_v0 }
 0x7b2   : > { %2020 = vmatprep.subr.mxu1 %v2137_v0 }
 0x7d4   : > { %v1439_v19 = vpop.xlane.xlu1 %1438 }
 0x7d5   : > { %2096 = vrcp.f32 %v1439_v19 }
 0x7d8   : > { %v1443_v34 = vpop.permute.xlu1 %1442 }
 0x7e2   : > { %v2097_v30 = vpop.eup %2096 }
 0x7e3   : > { %v1441_v35 = vmul.f32 %v2097_v30, %v2093_v24 }
 0x870   : > { %v1270_v31 = vpop.f32.mrf.mxu1 }
 0x871   : > { %2011 = vmatmul.mubr.msk.f32.vlgmr.msra.gmra.mxu1 %vm610_vm2, %v1270_v31 }
 0x872   : > { %2021 = vmatpush3.msra.mxu1 %v1445_v32  ;;  %v2007_v33 = vpop.f32.mrf.mxu1  ;;  %2024 = vmatprep.mubr.msk.f32.mxu1 %vm2138_vm0, %v2137_v0 }
 0x873   : > { %2022 = vmatprep.subr.mxu1 %v2137_v0 }
 0x874   : > { %2023 = vmatpush3.msra.mxu1 %v1443_v34 }
 0x875   : > { %2025 = vmatmul.mubr.msk.f32.vlgmr.msra.gmra.mxu1 %vm691_vm3, %v1441_v35  ;;  %2027 = vmatprep.subr.mxu1 %v2137_v0 }
 0x876   : > { %2029 = vmatprep.mubr.msk.f32.mxu1 %vm2138_vm0, %v2137_v0  ;;  %2028 = vmatpush3.msra.mxu1 %v441_v36 }
 0x877   : > { %2043 = vmatprep.subr.mxu1 %v2137_v0 }
 0x931   : > { %v1343_v39 = vpop.f32.mrf.mxu1 }
 0x932   : > { %v1347_v40 = vadd.f32 %v1343_v39, %v1098_v38 }
 0x933   : > { %v2012_v41 = vpop.f32.mrf.mxu1 }
 0x935   : > { %v1517_v42 = vpop.f32.mrf.mxu1 }
 0x936   : > { %2030 = vmatmul.mubr.msk.f32.vlgmr.msra.gmra.mxu1 %vm610_vm2, %v1517_v42 }
 0x937   : > { %v2026_v43 = vpop.f32.mrf.mxu1  ;;  %2051 = vmatprep.mubr.msk.f32.mxu1 %vm2138_vm0, %v2137_v0  ;;  %2044 = vmatpush3.msra.mxu1 %v1690_v47 }
 0x938   : > { %2045 = vmatprep.subr.mxu1 %v2137_v0 }
 0x939   : > { %2046 = vmatpush3.msra.mxu1 %v1689_v53 }
 0x93a   : > { %2047 = vmatprep.subr.mxu1 %v2137_v0 }
 0x93b   : > { %2048 = vmatpush3.msra.mxu1 %v1688_v54 }
 0x93c   : > { %2049 = vmatprep.subr.mxu1 %v2137_v0 }
 0x93d   : > { %2050 = vmatpush3.msra.mxu1 %v1687_v55 }
 0x9f6   : > { %v1590_v49 = vpop.f32.mrf.mxu1 }
 0x9f7   : > { %v1594_v50 = vadd.f32 %v1590_v49, %v1347_v40 }
 0x9f8   : > { %v2031_v51 = vpop.f32.mrf.mxu1 }
 0x9f9   : > { %v1601_v52 = vadd.f32 %v1873_v48, %v1594_v50 }
 0x9fb   : > { %2041 = vmatmul.mubr.msk.f32.vlgmr.msra.gmra.mxu0 %vm449_vm1, %v1601_v52 }
 0xabb   : > { %v1682_v57 = vpop.f32.mrf.mxu0 }
 0xabc   : > { %v1683_v58 = vadd.f32 %v1874_v56, %v1682_v57 }
 0xabd   : > { %v2042_v59 = vpop.f32.mrf.mxu0 }
 0xabe   : > { %v1686_v60 = vmax.f32 %v1683_v58, 0.0 }
 0xac0   : > { %2052 = vmatmul.mubr.msk.f32.vlgmr.msra.gmra.mxu1 %vm449_vm1, %v1686_v60 }
 0xb80   : > { %v1767_v62 = vpop.f32.mrf.mxu1 }
 0xb81   : > { %v1768_v63 = vadd.f32 %v1876_v61, %v1767_v62 }
 0xb82   : > { %v2053_v0 = vpop.f32.mrf.mxu1 }
 0xb83   : > { %v1771_v1 = vadd.f32 %v1768_v63, %v1601_v52 }
 0xb85   : > { %1772 = vst.msk [vmem:[%s424_s29] sm:$0xff] %vm449_vm1, %v1771_v1 }
 0xb86 PF: > { %s23_s21 = sadd.s32 1, %s2134_s21  }
 0xb87   : > { %p20_p1 = scmp.ge.s32.totalorder %s23_s21, 4  }
 0xb89   :  { %22 = sbr.rel (!%p20_p1) target bundleno = 1 (0x1), region = 103 }
 0xb8e   :  { %1792 = vsyncpa [#allocation3], 1 }
 0xb8f   :  { %1794 = vsyncpa [#allocation3 + $0x1], 1 }

// kernel: heat_predictor_forward.12
= control target key start
LH: loop header
LB: loop body
LE: loop exit
PB: predicated region body
PF: predicated region fallthrough
CT: control target
= control target key end

     0   :  { %s2172_s21 = smov 0   ;;  %s2403_s0 = inlined_call_operand.vmem [shape: f32[2,8,32], index: 0, kind: input, shape index: {}]   ;;  %s2404_s1 = inlined_call_operand.vmem [shape: f32[2,16,32], index: 1, kind: input, shape index: {}]   ;;  %s2405_s2 = inlined_call_operand.vmem [shape: f32[32,32], index: 2, kind: input, shape index: {}]   ;;  %s2406_s3 = inlined_call_operand.vmem [shape: f32[1,32], index: 3, kind: input, shape index: {}]   ;;  %s2407_s4 = inlined_call_operand.vmem [shape: f32[32,64], index: 4, kind: input, shape index: {}]   ;;  %s2408_s5 = inlined_call_operand.vmem [shape: f32[1,64], index: 5, kind: input, shape index: {}]   ;;  %s2409_s6 = inlined_call_operand.vmem [shape: f32[32,32], index: 6, kind: input, shape index: {}]   ;;  %s2410_s7 = inlined_call_operand.vmem [shape: f32[1,32], index: 7, kind: input, shape index: {}]   ;;  %s2411_s8 = inlined_call_operand.vmem [shape: f32[32,32], index: 8, kind: input, shape index: {}]   ;;  %s2412_s9 = inlined_call_operand.vmem [shape: f32[1,32], index: 9, kind: input, shape index: {}]   ;;  %s2413_s10 = inlined_call_operand.vmem [shape: f32[32,32], index: 10, kind: input, shape index: {}]   ;;  %s2414_s11 = inlined_call_operand.vmem [shape: f32[1,32], index: 11, kind: input, shape index: {}]   ;;  %s2415_s12 = inlined_call_operand.vmem [shape: f32[2,8,32], index: 12, kind: output, shape index: {}]  }
   0x1 LB: > { %s1842_s22 = sadd.s32 4294967295, %s2096_s21   ;;  %p1846_p0 = scmp.ge.s32.totalorder %s2096_s21, 1  ;;  %s2096_s21 = sphi %s2172_s21, %s22_s21  }
   0x2   : > { %p371_p1 = scmp.lt.s32.totalorder %s2096_s21, 3 }
   0x4   : > { %p372_p2 = pnand %p1846_p0, %p371_p1 }
   0x5   : > { %p416_p3 = scmp.lt.s32.totalorder (!%p372_p2), %s1842_s22, 1  ;;  %s2100_s15 = smov (!%p372_p2), 96  }
   0x6   : > { %375 = sbr.rel (%p372_p2) target bundleno = 2934 (0xb76), region = 68  ;;  %s2101_s18 = smov (!%p372_p2), 120  }
   0x7   : > { %s2102_s24 = smov (!%p372_p2), 88   ;;  %s2104_s26 = smov (!%p372_p2), 104  }
   0x8   : > { %s2105_s29 = smov (!%p372_p2), 80   ;;  %s2106_s30 = smov (!%p372_p2), 72  }
   0xb   : > { %v440_v0 = vld [vmem:[%s2407_s4 + $0x18] sm:$0xff]  ;;  %v439_v1 = vld [vmem:[%s2407_s4 + $0x10] sm:$0xff]  ;;  %v2098_v2 = vmov 0.0   ;;  %v438_v5 = vld [vmem:[%s2407_s4 + $0x8] sm:$0xff]  ;;  %s2417_s22 = smov (!%p416_p3, %s1842_s22), 1  ;;  %vm453_vm0 = vcmask 261120  }
   0xc   : > { %1948 = vmatprep.subr.mxu1 %v440_v0  ;;  %1937 = vmatprep.subr.mxu0 %v2098_v2  ;;  %v435_v3 = vld [vmem:[%s2405_s2 + $0x18] sm:$0xff]  ;;  %v434_v4 = vld [vmem:[%s2405_s2 + $0x10] sm:$0xff]  ;;  %v433_v6 = vld [vmem:[%s2405_s2 + $0x8] sm:$0xff]  ;;  %s1883_s19 = sshll.u32 %s2417_s22, 4  ;;  %s1847_s20 = sshll.u32 %s2417_s22, 3  ;;  %vm2099_vm1 = vmmov 0  }
   0xd   : > { %1949 = vmatpush3.msra.mxu1 %v440_v0  ;;  %1938 = vmatpush3.msra.mxu0 %v435_v3  ;;  %v437_v7 = vld [vmem:[%s2407_s4] sm:$0xff]  ;;  %s424_s25 = scalar_lea.vmem %s2404_s1, %s1883_s19  ;;  %s419_s28 = scalar_lea.vmem %s2403_s0, %s1847_s20  ;;  %vm614_vm2 = vcmask 64512   ;;  %vm695_vm3 = vcmask 130048   ;;  %v443_v57 = vld [vmem:[%s2409_s6 + $0x8] sm:$0xff] }
   0xe   : > { %1950 = vmatprep.subr.mxu1 %v439_v1  ;;  %1939 = vmatprep.subr.mxu0 %v2098_v2  ;;  %v430_v8 = vld [vmem:[%s424_s25] sm:$0xff]  ;;  %v431_v9 = vld [vmem:[%s424_s25 + $0x8] sm:$0xff]  ;;  %s2103_s25 = smov 112  }
   0xf   : > { %1951 = vmatpush3.msra.mxu1 %v439_v1  ;;  %1940 = vmatpush3.msra.mxu0 %v434_v4  ;;  %v432_v10 = vld [vmem:[%s2405_s2] sm:$0xff] }
  0x10   : > { %1952 = vmatprep.subr.mxu1 %v438_v5  ;;  %1941 = vmatprep.subr.mxu0 %v2098_v2  ;;  %v429_v11 = vld [vmem:[%s419_s28] sm:$0xff] }
  0x11   : > { %1953 = vmatpush3.msra.mxu1 %v438_v5  ;;  %1942 = vmatpush3.msra.mxu0 %v433_v6  ;;  %v1853_v12 = vld [vmem:[%s2408_s5] ss:$0 sm:$0xff] }
  0x12   : > { %1954 = vmatprep.subr.mxu1 %v437_v7  ;;  %1956 = vmatprep.mubr.msk.f32.mxu1 %vm453_vm0, %v430_v8  ;;  %v1851_v17 = vld [vmem:[%s2406_s3] ss:$0 sm:$0xff] }
  0x13   : > { %1955 = vmatpush3.msra.mxu1 %v437_v7  ;;  %1943 = vmatprep.subr.mxu0 %v2098_v2  ;;  %v442_v38 = vld [vmem:[%s2409_s6] sm:$0xff] }
  0x14   : > { %1957 = vmatmul.mubr.msk.f32.vlgmr.msra.gmra.mxu1 %vm453_vm0, %v431_v9  ;;  %1944 = vmatpush3.msra.mxu0 %v432_v10 }
  0x15   : > { %1945 = vmatprep.mubr.msk.f32.mxu0 %vm2099_vm1, %v2098_v2  ;;  %1959 = vmatprep.subr.mxu0 %v2098_v2 }
  0x16   : > { %1946 = vmatmul.mubr.msk.f32.vlgmr.msra.gmra.mxu0 %vm453_vm0, %v429_v11  ;;  %1966 = vmatprep.subr.mxu1 %v2098_v2 }
  0x17   : > { %1963 = vmatprep.mubr.msk.f32.mxu0 %vm2099_vm1, %v2098_v2  ;;  %1970 = vmatprep.mubr.msk.f32.mxu1 %vm2099_vm1, %v2098_v2 }
  0xd4   : > { %v1958_v13 = vpop.f32.mrf.mxu1 }
  0xd5   : > { %v2234_v14 = vadd.f32 %v1958_v13, %v1853_v12 }
  0xd6   : > { %v605_v15 = vpop.f32.mrf.mxu1  ;;  %v523_v16 = vpop.f32.mrf.mxu0 }
  0xd7   : > { %709 = vrot.lane.b32.xlu1 %v2234_v14, %s2100_s15  ;;  %1960 = vmatpush3.xpose.msk.msra.mxu0 %vm614_vm2, %v2234_v14  ;;  %v2243_v19 = vadd.f32 %v1853_v12, %v605_v15  ;;  %v2245_v20 = vadd.f32 %v1851_v17, %v523_v16 }
  0xd8   : > { %1961 = vmatprep.subr.mxu0 %v2098_v2  ;;  %v1947_v18 = vpop.f32.mrf.mxu0 }
  0xdb   : > { %707 = vrot.lane.b32.xlu1 %v2243_v19, %s2100_s15  ;;  %1962 = vmatpush3.xpose.msk.msra.mxu0 %vm614_vm2, %v2243_v19 }
  0xdc   : > { %1980 = vmatprep.subr.mxu0 %v2098_v2 }
  0xde   : > { %1964 = vmatmul.mubr.msk.f32.vlgmr.msra.gmra.mxu0 %vm614_vm2, %v2245_v20 }
  0xdf   : > { %788 = vrot.lane.b32.xlu1 %v2243_v19, %s2101_s18  ;;  %1984 = vmatprep.mubr.msk.f32.mxu0 %vm2099_vm1, %v2098_v2 }
  0xe3   : > { %786 = vrot.lane.b32.xlu1 %v2245_v20, %s2101_s18 }
 0x149   : > { %v710_v21 = vpop.permute.xlu1 %709 }
 0x14a   : > { %1967 = vmatpush3.msra.mxu1 %v710_v21 }
 0x14b   : > { %1968 = vmatprep.subr.mxu1 %v2098_v2 }
 0x14d   : > { %v708_v22 = vpop.permute.xlu1 %707 }
 0x14e   : > { %1969 = vmatpush3.msra.mxu1 %v708_v22 }
 0x14f   : > { %1973 = vmatprep.subr.mxu1 %v2098_v2 }
 0x151   : > { %v789_v36 = vpop.permute.xlu1 %788 }
 0x155   : > { %v787_v37 = vpop.permute.xlu1 %786 }
 0x19e   : > { %v690_v23 = vpop.f32.mrf.mxu0 }
 0x19f   : > { %v694_v24 = vmul.f32 0.35355338, %v690_v23 }
 0x1a0   : > { %v1965_v25 = vpop.f32.mrf.mxu0 }
 0x1a1   : > { %v696_v26 = vsel %vm695_vm3, %v694_v24, -inf }
 0x1a2   : > { %697 = vmax.xlane.f32.xlu0 %v696_v26 }
 0x22b   : > { %v698_v27 = vpop.xlane.xlu0 %697 }
 0x22c   : > { %v699_v28 = vsub.f32 %v694_v24, %v698_v27 }
 0x22e   : > { %v700_v29 = vmul.f32 1.442695, %v699_v28 }
 0x230   : > { %2074 = vpow2.f32 %v700_v29  ;;  %v444_v29 = vld [vmem:[%s2409_s6 + $0x10] sm:$0xff] }
 0x23d   : > { %v2075_v30 = vpop.eup %2074 }
 0x23e   : > { %v702_v31 = vsel %vm695_vm3, %v2075_v30, 0.0 }
 0x23f   : > { %703 = vadd.xlane.f32.xlu0 %v702_v31 }
 0x255   : > { %790 = vrot.lane.b32.xlu0 %v2234_v14, %s2101_s18 }
 0x2c8   : > { %v704_v32 = vpop.xlane.xlu0 %703 }
 0x2c9   : > { %2076 = vrcp.f32 %v704_v32 }
 0x2cc   : > { %v791_v35 = vpop.permute.xlu0 %790 }
 0x2d6   : > { %v2077_v33 = vpop.eup %2076 }
 0x2d7   : > { %v706_v34 = vmul.f32 %v2077_v33, %v2075_v30 }
 0x2d9   : > { %1971 = vmatmul.mubr.msk.f32.vlgmr.msra.gmra.mxu1 %vm695_vm3, %v706_v34 }
 0x2da   : > { %1974 = vmatpush3.xpose.msk.msra.mxu1 %vm614_vm2, %v791_v35  ;;  %1977 = vmatprep.mubr.msk.f32.mxu1 %vm2099_vm1, %v2098_v2 }
 0x2db   : > { %1975 = vmatprep.subr.mxu1 %v2098_v2 }
 0x2de   : > { %1976 = vmatpush3.xpose.msk.msra.mxu1 %vm614_vm2, %v789_v36  ;;  %v445_v36 = vld [vmem:[%s2409_s6 + $0x18] sm:$0xff] }
 0x2df   : > { %1992 = vmatprep.subr.mxu1 %v2098_v2 }
 0x2e1   : > { %1978 = vmatmul.mubr.msk.f32.vlgmr.msra.gmra.mxu1 %vm614_vm2, %v787_v37  ;;  %v1609_v37 = vld [vmem:[%s2411_s8 + $0x18] sm:$0xff] }
 0x2e2   : > { %1994 = vmatprep.mubr.msk.f32.mxu1 %vm2099_vm1, %v2098_v2  ;;  %1993 = vmatpush3.msra.mxu1 %v442_v38 }
 0x2e3   : > { %2004 = vmatprep.subr.mxu1 %v2098_v2 }
 0x399   : > { %v782_v39 = vpop.f32.mrf.mxu1 }
 0x39a   : > { %1995 = vmatmul.mubr.msk.f32.vlgmr.msra.gmra.mxu1 %vm614_vm2, %v782_v39 }
 0x39b   : > { %v1972_v40 = vpop.f32.mrf.mxu1  ;;  %2008 = vmatprep.mubr.msk.f32.mxu1 %vm2099_vm1, %v2098_v2 }
 0x3a1   : > { %v864_v41 = vpop.f32.mrf.mxu1 }
 0x3a2   : > { %v868_v42 = vmul.f32 0.35355338, %v864_v41 }
 0x3a3   : > { %v1979_v43 = vpop.f32.mrf.mxu1 }
 0x3a4   : > { %v869_v44 = vsel %vm695_vm3, %v868_v42, -inf }
 0x3a5   : > { %870 = vmax.xlane.f32.xlu1 %v869_v44  ;;  %v1608_v44 = vld [vmem:[%s2411_s8 + $0x10] sm:$0xff] }
 0x3b6   : > { %882 = vrot.lane.b32.xlu1 %v2234_v14, %s2102_s24 }
 0x3ba   : > { %1109 = vrot.lane.b32.xlu1 %v2234_v14, %s2103_s25 }
 0x3be   : > { %1107 = vrot.lane.b32.xlu1 %v2243_v19, %s2103_s25 }
 0x3c2   : > { %1105 = vrot.lane.b32.xlu1 %v2245_v20, %s2103_s25 }
 0x3c6   : > { %1356 = vrot.lane.b32.xlu1 %v2234_v14, %s2104_s26 }
 0x3ca   : > { %1352 = vrot.lane.b32.xlu1 %v2245_v20, %s2104_s26 }
 0x42e   : > { %v871_v45 = vpop.xlane.xlu1 %870 }
 0x42f   : > { %v872_v46 = vsub.f32 %v868_v42, %v871_v45  ;;  %v1607_v45 = vld [vmem:[%s2411_s8 + $0x8] sm:$0xff] }
 0x431   : > { %v873_v47 = vmul.f32 1.442695, %v872_v46  ;;  %v1606_v46 = vld [vmem:[%s2411_s8] sm:$0xff] }
 0x432   : > { %v883_v48 = vpop.permute.xlu1 %882 }
 0x433   : > { %2078 = vpow2.f32 %v873_v47  ;;  %1981 = vmatpush3.msra.mxu0 %v883_v48  ;;  %v1694_v47 = vld [vmem:[%s2413_s10 + $0x18] sm:$0xff]  ;;  %v1876_v48 = vld [vmem:[%s2410_s7] ss:$0 sm:$0xff] }
 0x434   : > { %1982 = vmatprep.subr.mxu0 %v2098_v2 }
 0x436   : > { %v1110_v58 = vpop.permute.xlu1 %1109 }
 0x43a   : > { %v1108_v59 = vpop.permute.xlu1 %1107 }
 0x43e   : > { %v1106_v62 = vpop.permute.xlu1 %1105 }
 0x440   : > { %v2079_v49 = vpop.eup %2078 }
 0x441   : > { %v875_v50 = vsel %vm695_vm3, %v2079_v49, 0.0 }
 0x442   : > { %876 = vadd.xlane.f32.xlu0 %v875_v50  ;;  %v1357_v63 = vpop.permute.xlu1 %1356 }
 0x446   : > { %v1353_v1 = vpop.permute.xlu1 %1352 }
 0x458   : > { %880 = vrot.lane.b32.xlu0 %v2243_v19, %s2102_s24 }
 0x45a   : > { %v2289_v51 = vpop.f32.mrf.mxu1 }
 0x45c   : > { %1354 = vrot.lane.b32.xlu0 %v2243_v19, %s2104_s26  ;;  %v1996_v52 = vpop.f32.mrf.mxu1 }
 0x4cb   : > { %v877_v53 = vpop.xlane.xlu0 %876 }
 0x4cc   : > { %2080 = vrcp.f32 %v877_v53  ;;  %v1693_v53 = vld [vmem:[%s2413_s10 + $0x10] sm:$0xff] }
 0x4cf   : > { %v881_v54 = vpop.permute.xlu0 %880 }
 0x4d0   : > { %1983 = vmatpush3.msra.mxu0 %v881_v54  ;;  %v1692_v54 = vld [vmem:[%s2413_s10 + $0x8] sm:$0xff] }
 0x4d1   : > { %1987 = vmatprep.subr.mxu0 %v2098_v2 }
 0x4d3   : > { %v1355_v0 = vpop.permute.xlu0 %1354 }
 0x4d9   : > { %v2081_v55 = vpop.eup %2080 }
 0x4da   : > { %v879_v56 = vmul.f32 %v2081_v55, %v2079_v49  ;;  %v1691_v55 = vld [vmem:[%s2413_s10] sm:$0xff] }
 0x4dc   : > { %1985 = vmatmul.mubr.msk.f32.vlgmr.msra.gmra.mxu0 %vm695_vm3, %v879_v56  ;;  %v1877_v56 = vld [vmem:[%s2412_s9] ss:$0 sm:$0xff] }
 0x4dd   : > { %1988 = vmatpush3.msra.mxu0 %v443_v57  ;;  %1989 = vmatprep.mubr.msk.f32.mxu0 %vm2099_vm1, %v2098_v2 }
 0x4de   : > { %1997 = vmatprep.subr.mxu0 %v2098_v2 }
 0x59c   : > { %v955_v60 = vpop.f32.mrf.mxu0 }
 0x59d   : > { %1990 = vmatmul.mubr.msk.f32.vlgmr.msra.gmra.mxu0 %vm614_vm2, %v955_v60 }
 0x59e   : > { %1998 = vmatpush3.xpose.msk.msra.mxu0 %vm614_vm2, %v1110_v58  ;;  %v1986_v61 = vpop.f32.mrf.mxu0  ;;  %2001 = vmatprep.mubr.msk.f32.mxu0 %vm2099_vm1, %v2098_v2 }
 0x59f   : > { %1999 = vmatprep.subr.mxu0 %v2098_v2  ;;  %v1879_v61 = vld [vmem:[%s2414_s11] ss:$0 sm:$0xff] }
 0x5a2   : > { %2000 = vmatpush3.xpose.msk.msra.mxu0 %vm614_vm2, %v1108_v59 }
 0x5a3   : > { %2016 = vmatprep.subr.mxu0 %v2098_v2 }
 0x5a5   : > { %2002 = vmatmul.mubr.msk.f32.vlgmr.msra.gmra.mxu0 %vm614_vm2, %v1106_v62 }
 0x5a6   : > { %2017 = vmatpush3.xpose.msk.msra.mxu0 %vm614_vm2, %v1357_v63  ;;  %2020 = vmatprep.mubr.msk.f32.mxu0 %vm2099_vm1, %v2098_v2 }
 0x5a7   : > { %2018 = vmatprep.subr.mxu0 %v2098_v2 }
 0x5aa   : > { %2019 = vmatpush3.xpose.msk.msra.mxu0 %vm614_vm2, %v1355_v0 }
 0x5ab   : > { %2035 = vmatprep.subr.mxu0 %v2098_v2 }
 0x5ad   : > { %2021 = vmatmul.mubr.msk.f32.vlgmr.msra.gmra.mxu0 %vm614_vm2, %v1353_v1 }
 0x5ae   : > { %2043 = vmatprep.mubr.msk.f32.mxu0 %vm2099_vm1, %v2098_v2  ;;  %2036 = vmatpush3.msra.mxu0 %v1609_v37 }
 0x5af   : > { %2037 = vmatprep.subr.mxu0 %v2098_v2 }
 0x5b0   : > { %2038 = vmatpush3.msra.mxu0 %v1608_v44 }
 0x5b1   : > { %2039 = vmatprep.subr.mxu0 %v2098_v2 }
 0x5b2   : > { %2040 = vmatpush3.msra.mxu0 %v1607_v45 }
 0x5b3   : > { %2041 = vmatprep.subr.mxu0 %v2098_v2 }
 0x5b4   : > { %2042 = vmatpush3.msra.mxu0 %v1606_v46 }
 0x65d   : > { %v2317_v3 = vpop.f32.mrf.mxu0 }
 0x65e   : > { %v1102_v38 = vadd.f32 %v2289_v51, %v2317_v3 }
 0x65f   : > { %v1991_v4 = vpop.f32.mrf.mxu0 }
 0x665   : > { %v1183_v5 = vpop.f32.mrf.mxu0 }
 0x666   : > { %v1187_v6 = vmul.f32 0.35355338, %v1183_v5 }
 0x667   : > { %v2003_v7 = vpop.f32.mrf.mxu0 }
 0x668   : > { %v1188_v8 = vsel %vm695_vm3, %v1187_v6, -inf }
 0x669   : > { %1189 = vmax.xlane.f32.xlu0 %v1188_v8 }
 0x66d   : > { %v1430_v9 = vpop.f32.mrf.mxu0 }
 0x66e   : > { %v1434_v11 = vmul.f32 0.35355338, %v1430_v9 }
 0x66f   : > { %v2022_v10 = vpop.f32.mrf.mxu0 }
 0x670   : > { %v1435_v12 = vsel %vm695_vm3, %v1434_v11, -inf }
 0x67f   : > { %1201 = vrot.lane.b32.xlu0 %v2234_v14, %s2105_s29 }
 0x69e   : > { %1436 = vmax.xlane.f32.xlu0 %v1435_v12 }
 0x6b4   : > { %1448 = vrot.lane.b32.xlu0 %v2234_v14, %s2106_s30 }
 0x6f2   : > { %v1190_v13 = vpop.xlane.xlu0 %1189 }
 0x6f3   : > { %v1191_v15 = vsub.f32 %v1187_v6, %v1190_v13 }
 0x6f5   : > { %v1192_v16 = vmul.f32 1.442695, %v1191_v15 }
 0x6f6   : > { %v1202_v17 = vpop.permute.xlu0 %1201 }
 0x6f7   : > { %2082 = vpow2.f32 %v1192_v16  ;;  %2005 = vmatpush3.msra.mxu1 %v1202_v17 }
 0x6f8   : > { %2006 = vmatprep.subr.mxu1 %v2098_v2 }
 0x704   : > { %v2083_v18 = vpop.eup %2082 }
 0x705   : > { %v1194_v20 = vsel %vm695_vm3, %v2083_v18, 0.0 }
 0x706   : > { %1195 = vadd.xlane.f32.xlu1 %v1194_v20 }
 0x717   : > { %1199 = vrot.lane.b32.xlu1 %v2243_v19, %s2105_s29  ;;  %s428_s29 = scalar_lea.vmem %s2415_s12, %s1847_s20 }
 0x727   : > { %v1437_v21 = vpop.xlane.xlu0 %1436 }
 0x728   : > { %v1438_v22 = vsub.f32 %v1434_v11, %v1437_v21 }
 0x72a   : > { %v1439_v23 = vmul.f32 1.442695, %v1438_v22 }
 0x72b   : > { %v1449_v32 = vpop.permute.xlu0 %1448 }
 0x72c   : > { %2084 = vpow2.f32 %v1439_v23 }
 0x739   : > { %v2085_v24 = vpop.eup %2084 }
 0x73a   : > { %v1441_v14 = vsel %vm695_vm3, %v2085_v24, 0.0 }
 0x73b   : > { %1442 = vadd.xlane.f32.xlu1 %v1441_v14 }
 0x74c   : > { %1446 = vrot.lane.b32.xlu1 %v2243_v19, %s2106_s30 }
 0x78f   : > { %v1196_v25 = vpop.xlane.xlu1 %1195 }
 0x790   : > { %2086 = vrcp.f32 %v1196_v25 }
 0x793   : > { %v1200_v26 = vpop.permute.xlu1 %1199 }
 0x794   : > { %2007 = vmatpush3.msra.mxu1 %v1200_v26 }
 0x795   : > { %2011 = vmatprep.subr.mxu1 %v2098_v2 }
 0x79d   : > { %v2087_v27 = vpop.eup %2086 }
 0x79e   : > { %v1198_v28 = vmul.f32 %v2087_v27, %v2083_v18 }
 0x7a0   : > { %2009 = vmatmul.mubr.msk.f32.vlgmr.msra.gmra.mxu1 %vm695_vm3, %v1198_v28 }
 0x7a1   : > { %2012 = vmatpush3.msra.mxu1 %v444_v29  ;;  %2013 = vmatprep.mubr.msk.f32.mxu1 %vm2099_vm1, %v2098_v2 }
 0x7a2   : > { %2023 = vmatprep.subr.mxu1 %v2098_v2 }
 0x7c4   : > { %v1443_v19 = vpop.xlane.xlu1 %1442 }
 0x7c5   : > { %2088 = vrcp.f32 %v1443_v19 }
 0x7c8   : > { %v1447_v34 = vpop.permute.xlu1 %1446 }
 0x7d2   : > { %v2089_v30 = vpop.eup %2088 }
 0x7d3   : > { %v1445_v35 = vmul.f32 %v2089_v30, %v2085_v24 }
 0x860   : > { %v1274_v31 = vpop.f32.mrf.mxu1 }
 0x861   : > { %2014 = vmatmul.mubr.msk.f32.vlgmr.msra.gmra.mxu1 %vm614_vm2, %v1274_v31 }
 0x862   : > { %2024 = vmatpush3.msra.mxu1 %v1449_v32  ;;  %v2010_v33 = vpop.f32.mrf.mxu1  ;;  %2027 = vmatprep.mubr.msk.f32.mxu1 %vm2099_vm1, %v2098_v2 }
 0x863   : > { %2025 = vmatprep.subr.mxu1 %v2098_v2 }
 0x864   : > { %2026 = vmatpush3.msra.mxu1 %v1447_v34 }
 0x865   : > { %2028 = vmatmul.mubr.msk.f32.vlgmr.msra.gmra.mxu1 %vm695_vm3, %v1445_v35  ;;  %2030 = vmatprep.subr.mxu1 %v2098_v2 }
 0x866   : > { %2032 = vmatprep.mubr.msk.f32.mxu1 %vm2099_vm1, %v2098_v2  ;;  %2031 = vmatpush3.msra.mxu1 %v445_v36 }
 0x867   : > { %2046 = vmatprep.subr.mxu1 %v2098_v2 }
 0x921   : > { %v1347_v39 = vpop.f32.mrf.mxu1 }
 0x922   : > { %v1351_v40 = vadd.f32 %v1347_v39, %v1102_v38 }
 0x923   : > { %v2015_v41 = vpop.f32.mrf.mxu1 }
 0x925   : > { %v1521_v42 = vpop.f32.mrf.mxu1 }
 0x926   : > { %2033 = vmatmul.mubr.msk.f32.vlgmr.msra.gmra.mxu1 %vm614_vm2, %v1521_v42 }
 0x927   : > { %v2029_v43 = vpop.f32.mrf.mxu1  ;;  %2054 = vmatprep.mubr.msk.f32.mxu1 %vm2099_vm1, %v2098_v2  ;;  %2047 = vmatpush3.msra.mxu1 %v1694_v47 }
 0x928   : > { %2048 = vmatprep.subr.mxu1 %v2098_v2 }
 0x929   : > { %2049 = vmatpush3.msra.mxu1 %v1693_v53 }
 0x92a   : > { %2050 = vmatprep.subr.mxu1 %v2098_v2 }
 0x92b   : > { %2051 = vmatpush3.msra.mxu1 %v1692_v54 }
 0x92c   : > { %2052 = vmatprep.subr.mxu1 %v2098_v2 }
 0x92d   : > { %2053 = vmatpush3.msra.mxu1 %v1691_v55 }
 0x9e6   : > { %v1594_v49 = vpop.f32.mrf.mxu1 }
 0x9e7   : > { %v1598_v50 = vadd.f32 %v1594_v49, %v1351_v40 }
 0x9e8   : > { %v2034_v51 = vpop.f32.mrf.mxu1 }
 0x9e9   : > { %v1605_v52 = vadd.f32 %v1876_v48, %v1598_v50 }
 0x9eb   : > { %2044 = vmatmul.mubr.msk.f32.vlgmr.msra.gmra.mxu0 %vm453_vm0, %v1605_v52 }
 0xaab   : > { %v1686_v57 = vpop.f32.mrf.mxu0 }
 0xaac   : > { %v1687_v58 = vadd.f32 %v1877_v56, %v1686_v57 }
 0xaad   : > { %v2045_v59 = vpop.f32.mrf.mxu0 }
 0xaae   : > { %v1690_v60 = vmax.f32 %v1687_v58, 0.0 }
 0xab0   : > { %2055 = vmatmul.mubr.msk.f32.vlgmr.msra.gmra.mxu1 %vm453_vm0, %v1690_v60 }
 0xb70   : > { %v1771_v62 = vpop.f32.mrf.mxu1 }
 0xb71   : > { %v1772_v63 = vadd.f32 %v1879_v61, %v1771_v62 }
 0xb72   : > { %v2056_v2 = vpop.f32.mrf.mxu1 }
 0xb73   : > { %v1775_v0 = vadd.f32 %v1772_v63, %v1605_v52 }
 0xb75   : > { %1776 = vst.msk [vmem:[%s428_s29] sm:$0xff] %vm453_vm0, %v1775_v0 }
 0xb76 PF: > { %s22_s21 = sadd.s32 1, %s2096_s21  }
 0xb77   : > { %p19_p4 = scmp.ge.s32.totalorder %s22_s21, 4  }
 0xb79   :  { %21 = sbr.rel (!%p19_p4) target bundleno = 1 (0x1), region = 101 }

// kernel: heat_predictor_forward.15
= control target key start
LH: loop header
LB: loop body
LE: loop exit
PB: predicated region body
PF: predicated region fallthrough
CT: control target
= control target key end

     0   :  { %s2254_s23 = smov 0   ;;  %s2430_s0 = inlined_call_operand.vmem [shape: f32[2,16,32], index: 0, kind: input, shape index: {}]   ;;  %s2431_s1 = inlined_call_operand.vmem [shape: f32[2,8,32], index: 1, kind: input, shape index: {}]   ;;  %s2432_s2 = inlined_call_operand.vmem [shape: f32[32,32], index: 2, kind: input, shape index: {}]   ;;  %s2433_s3 = inlined_call_operand.vmem [shape: f32[1,32], index: 3, kind: input, shape index: {}]   ;;  %s2434_s4 = inlined_call_operand.vmem [shape: f32[32,64], index: 4, kind: input, shape index: {}]   ;;  %s2435_s5 = inlined_call_operand.vmem [shape: f32[1,64], index: 5, kind: input, shape index: {}]   ;;  %s2436_s6 = inlined_call_operand.vmem [shape: f32[32,32], index: 6, kind: input, shape index: {}]   ;;  %s2437_s7 = inlined_call_operand.vmem [shape: f32[1,32], index: 7, kind: input, shape index: {}]   ;;  %s2438_s8 = inlined_call_operand.vmem [shape: f32[32,16], index: 8, kind: input, shape index: {}]   ;;  %s2439_s9 = inlined_call_operand.vmem [shape: f32[1,16], index: 9, kind: input, shape index: {}]   ;;  %s2440_s10 = inlined_call_operand.vmem [shape: f32[1,16], index: 10, kind: input, shape index: {}]   ;;  %s2441_s11 = inlined_call_operand.<no memory space> [shape: f32[1,1], index: 11, kind: input, shape index: {}]   ;;  %s2442_s12 = inlined_call_operand.vmem [shape: f32[2,16,1], index: 12, kind: output, shape index: {}]  }
   0x1   :  { %v17_v0 = vstv %s2441_s11 }
   0x2   :  { %18 = vst [vmem:[#allocation2] sm:$0x1] %v17_v0 }
   0x3 LB: > { %s1921_s24 = sadd.s32 4294967295, %s2175_s23   ;;  %p1925_p0 = scmp.ge.s32.totalorder %s2175_s23, 1  ;;  %s2175_s23 = sphi %s2254_s23, %s24_s23  }
   0x4   : > { %p373_p1 = scmp.lt.s32.totalorder %s2175_s23, 3 }
   0x6   : > { %p374_p2 = pnand %p1925_p0, %p373_p1 }
   0x7   : > { %p419_p3 = scmp.lt.s32.totalorder (!%p374_p2), %s1921_s24, 1  ;;  %s2179_s17 = smov (!%p374_p2), 120  }
   0x8   : > { %377 = sbr.rel (%p374_p2) target bundleno = 2820 (0xb04), region = 68  ;;  %s2181_s22 = smov (!%p374_p2), 112  }
   0x9   : > { %s2182_s25 = smov (!%p374_p2), 96   ;;  %s2183_s27 = smov (!%p374_p2), 80  }
   0xa   : > { %s2184_s28 = smov (!%p374_p2), 104   ;;  %s2185_s13 = smov (!%p374_p2), 72  }
   0xd   : > { %v439_v1 = vld [vmem:[%s2432_s2 + $0x18] sm:$0xff]  ;;  %v438_v3 = vld [vmem:[%s2432_s2 + $0x10] sm:$0xff]  ;;  %v2177_v4 = vmov 0.0   ;;  %v437_v6 = vld [vmem:[%s2432_s2 + $0x8] sm:$0xff]  ;;  %s2444_s24 = smov (!%p419_p3, %s1921_s24), 1  ;;  %vm457_vm0 = vcmask 261120  }
   0xe   : > { %v444_v2 = vld [vmem:[%s2434_s4 + $0x18] sm:$0xff]  ;;  %2027 = vmatprep.subr.mxu0 %v439_v1  ;;  %2038 = vmatprep.subr.mxu1 %v2177_v4  ;;  %v443_v5 = vld [vmem:[%s2434_s4 + $0x10] sm:$0xff]  ;;  %v442_v7 = vld [vmem:[%s2434_s4 + $0x8] sm:$0xff]  ;;  %s1972_s20 = sshll.u32 %s2444_s24, 4  ;;  %s1928_s21 = sshll.u32 %s2444_s24, 3  ;;  %vm2178_vm1 = vmmov 0  }
   0xf   : > { %2028 = vmatpush3.msra.mxu0 %v439_v1  ;;  %2039 = vmatpush3.msra.mxu1 %v444_v2  ;;  %v436_v8 = vld [vmem:[%s2432_s2] sm:$0xff]  ;;  %s423_s26 = scalar_lea.vmem %s2430_s0, %s1972_s20  ;;  %s427_s30 = scalar_lea.vmem %s2431_s1, %s1928_s21  ;;  %vm618_vm2 = vcmask 64512   ;;  %v447_v57 = vld [vmem:[%s2436_s6 + $0x8] sm:$0xff]  ;;  %vm1835_vm3 = vcmask 130048   ;;  %vm1851_vm4 = vcmask 7168  }
  0x10   : > { %2029 = vmatprep.subr.mxu0 %v438_v3  ;;  %2040 = vmatprep.subr.mxu1 %v2177_v4  ;;  %v433_v9 = vld [vmem:[%s423_s26] sm:$0xff]  ;;  %v434_v11 = vld [vmem:[%s423_s26 + $0x8] sm:$0xff]  ;;  %s2180_s21 = smov 88   ;;  %s432_s16 = scalar_lea.vmem %s2442_s12, %s1972_s20 }
  0x11   : > { %2030 = vmatpush3.msra.mxu0 %v438_v3  ;;  %2041 = vmatpush3.msra.mxu1 %v443_v5  ;;  %v441_v10 = vld [vmem:[%s2434_s4] sm:$0xff] }
  0x12   : > { %2031 = vmatprep.subr.mxu0 %v437_v6  ;;  %2042 = vmatprep.subr.mxu1 %v2177_v4  ;;  %v435_v12 = vld [vmem:[%s427_s30] sm:$0xff] }
  0x13   : > { %2032 = vmatpush3.msra.mxu0 %v437_v6  ;;  %2043 = vmatpush3.msra.mxu1 %v442_v7  ;;  %v1931_v13 = vld [vmem:[%s2433_s3] ss:$0 sm:$0xff] }
  0x14   : > { %2033 = vmatprep.subr.mxu0 %v436_v8  ;;  %2044 = vmatprep.subr.mxu1 %v2177_v4  ;;  %v1934_v14 = vld [vmem:[%s2435_s5] ss:$0 sm:$0xff] }
  0x15   : > { %2034 = vmatpush3.msra.mxu0 %v436_v8  ;;  %2035 = vmatprep.mubr.msk.f32.mxu0 %vm457_vm0, %v433_v9  ;;  %v446_v9 = vld [vmem:[%s2436_s6] sm:$0xff] }
  0x16   : > { %2045 = vmatpush3.msra.mxu1 %v441_v10  ;;  %2046 = vmatprep.mubr.msk.f32.mxu1 %vm2178_vm1, %v2177_v4 }
  0x17   : > { %2036 = vmatmul.mubr.msk.f32.vlgmr.msra.gmra.mxu0 %vm457_vm0, %v434_v11  ;;  %2047 = vmatmul.mubr.msk.f32.vlgmr.msra.gmra.mxu1 %vm457_vm0, %v435_v12 }
  0xd7   : > { %v2037_v15 = vpop.f32.mrf.mxu0  ;;  %v614_v16 = vpop.f32.mrf.mxu1 }
  0xd8   : > { %v2307_v17 = vadd.f32 %v2037_v15, %v1931_v13  ;;  %v2309_v18 = vadd.f32 %v1934_v14, %v614_v16 }
  0xd9   : > { %v530_v19 = vpop.f32.mrf.mxu0  ;;  %v2048_v20 = vpop.f32.mrf.mxu1 }
  0xda   : > { %v2311_v21 = vadd.f32 %v1931_v13, %v530_v19  ;;  %815 = vrot.lane.b32.xlu0 %v2309_v18, %s2179_s17  ;;  %2049 = vmatprep.subr.msk.mxu1 %vm618_vm2, %v2309_v18 }
  0xdb   : > { %2050 = vmatpush3.xpose.msk.msra.mxu1 %vm618_vm2, %v2309_v18  ;;  %813 = vrot.lane.b32.xlu1 %v2307_v17, %s2179_s17 }
  0xdc   : > { %2051 = vmatprep.mubr.msk.f32.mxu1 %vm618_vm2, %v2311_v21 }
  0xde   : > { %811 = vrot.lane.b32.xlu0 %v2311_v21, %s2179_s17  ;;  %2052 = vmatmul.mubr.msk.f32.vlgmr.msra.gmra.mxu1 %vm618_vm2, %v2307_v17 }
 0x14c   : > { %v816_v22 = vpop.permute.xlu0 %815 }
 0x14d   : > { %2059 = vmatprep.subr.msk.mxu0 %vm618_vm2, %v816_v22  ;;  %v814_v24 = vpop.permute.xlu1 %813 }
 0x14e   : > { %2060 = vmatpush3.xpose.msk.msra.mxu0 %vm618_vm2, %v816_v22 }
 0x14f   : > { %2069 = vmatprep.subr.mxu0 %v447_v57 }
 0x150   : > { %v812_v23 = vpop.permute.xlu0 %811 }
 0x151   : > { %2061 = vmatprep.mubr.msk.f32.mxu0 %vm618_vm2, %v812_v23 }
 0x152   : > { %2062 = vmatmul.mubr.msk.f32.vlgmr.msra.gmra.mxu0 %vm618_vm2, %v814_v24 }
 0x153   : > { %2070 = vmatpush3.msra.mxu0 %v447_v57 }
 0x19e   : > { %v2053_v25 = vpop.f32.mrf.mxu1 }
 0x19f   : > { %v704_v26 = vmul.f32 0.35355338, %v2053_v25 }
 0x1a0   : > { %v694_v27 = vpop.f32.mrf.mxu1 }
 0x1a1   : > { %v703_v28 = vmul.f32 0.35355338, %v694_v27  ;;  %v708_v29 = vsel %vm618_vm2, %v704_v26, -inf }
 0x1a2   : > { %709 = vmax.xlane.f32.xlu0 %v708_v29 }
 0x1a3   : > { %v705_v30 = vsel %vm618_vm2, %v703_v28, -inf }
 0x1a4   : > { %706 = vmax.xlane.f32.xlu1 %v705_v30 }
 0x212   : > { %v2063_v31 = vpop.f32.mrf.mxu0 }
 0x213   : > { %v899_v32 = vmul.f32 0.35355338, %v2063_v31 }
 0x214   : > { %v889_v33 = vpop.f32.mrf.mxu0 }
 0x215   : > { %v898_v34 = vmul.f32 0.35355338, %v889_v33  ;;  %v903_v35 = vsel %vm618_vm2, %v899_v32, -inf }
 0x216   : > { %904 = vmax.xlane.f32.xlu1 %v903_v35 }
 0x217   : > { %v900_v36 = vsel %vm618_vm2, %v898_v34, -inf }
 0x218   : > { %901 = vmax.xlane.f32.xlu0 %v900_v36 }
 0x22b   : > { %v710_v37 = vpop.xlane.xlu0 %709 }
 0x22c   : > { %v712_v38 = vsub.f32 %v704_v26, %v710_v37 }
 0x22d   : > { %v707_v39 = vpop.xlane.xlu1 %706 }
 0x22e   : > { %v715_v40 = vmul.f32 1.442695, %v712_v38  ;;  %v711_v41 = vsub.f32 %v703_v28, %v707_v39 }
 0x230   : > { %2137 = vpow2.f32 %v715_v40  ;;  %v713_v42 = vmul.f32 1.442695, %v711_v41 }
 0x232   : > { %2139 = vpow2.f32 %v713_v42 }
 0x23d   : > { %v2138_v43 = vpop.eup %2137 }
 0x23e   : > { %v720_v44 = vsel %vm618_vm2, %v2138_v43, 0.0 }
 0x23f   : > { %v2140_v45 = vpop.eup %2139  ;;  %721 = vadd.xlane.f32.xlu1 %v720_v44 }
 0x240   : > { %v717_v46 = vsel %vm618_vm2, %v2140_v45, 0.0 }
 0x241   : > { %718 = vadd.xlane.f32.xlu0 %v717_v46 }
 0x29f   : > { %v905_v47 = vpop.xlane.xlu1 %904 }
 0x2a0   : > { %v907_v48 = vsub.f32 %v899_v32, %v905_v47  ;;  %v448_v47 = vld [vmem:[%s2436_s6 + $0x10] sm:$0xff] }
 0x2a1   : > { %v902_v49 = vpop.xlane.xlu0 %901 }
 0x2a2   : > { %v910_v50 = vmul.f32 1.442695, %v907_v48  ;;  %v906_v51 = vsub.f32 %v898_v34, %v902_v49 }
 0x2a4   : > { %2141 = vpow2.f32 %v910_v50  ;;  %v908_v52 = vmul.f32 1.442695, %v906_v51 }
 0x2a6   : > { %2143 = vpow2.f32 %v908_v52 }
 0x2b1   : > { %v2142_v53 = vpop.eup %2141 }
 0x2b2   : > { %v915_v54 = vsel %vm618_vm2, %v2142_v53, 0.0 }
 0x2b3   : > { %v2144_v55 = vpop.eup %2143  ;;  %916 = vadd.xlane.f32.xlu1 %v915_v54 }
 0x2b4   : > { %v912_v56 = vsel %vm618_vm2, %v2144_v55, 0.0 }
 0x2b5   : > { %913 = vadd.xlane.f32.xlu0 %v912_v56 }
 0x2c4   : > { %922 = vrot.lane.b32.xlu1 %v2309_v18, %s2180_s21 }
 0x2c8   : > { %1172 = vrot.lane.b32.xlu1 %v2309_v18, %s2181_s22  ;;  %v722_v61 = vpop.xlane.xlu1 %721 }
 0x2ca   : > { %v719_v58 = vpop.xlane.xlu0 %718 }
 0x2cb   : > { %2145 = vrcp.f32 %v719_v58  ;;  %727 = vrot.lane.b32.xlu0 %v2309_v18, %s2182_s25 }
 0x2cc   : > { %1170 = vrot.lane.b32.xlu1 %v2307_v17, %s2181_s22  ;;  %2147 = vrcp.f32 %v722_v61 }
 0x2cf   : > { %1168 = vrot.lane.b32.xlu0 %v2311_v21, %s2181_s22 }
 0x2d8   : > { %v2146_v59 = vpop.eup %2145 }
 0x2d9   : > { %v725_v60 = vmul.f32 %v2146_v59, %v2140_v45  ;;  %v2148_v0 = vpop.eup %2147 }
 0x2da   : > { %v726_v3 = vmul.f32 %v2148_v0, %v2138_v43 }
 0x2db   : > { %2056 = vmatprep.mubr.msk.f32.mxu1 %vm618_vm2, %v725_v60 }
 0x33c   : > { %v917_v62 = vpop.xlane.xlu1 %916 }
 0x33d   : > { %2149 = vrcp.f32 %v917_v62 }
 0x33e   : > { %v914_v63 = vpop.xlane.xlu0 %913 }
 0x33f   : > { %2151 = vrcp.f32 %v914_v63 }
 0x340   : > { %v923_v1 = vpop.permute.xlu1 %922 }
 0x342   : > { %v728_v2 = vpop.permute.xlu0 %727 }
 0x343   : > { %2054 = vmatprep.subr.mxu1 %v728_v2 }
 0x344   : > { %2055 = vmatpush3.msra.mxu1 %v728_v2  ;;  %v1173_v4 = vpop.permute.xlu1 %1172 }
 0x345   : > { %2057 = vmatmul.mubr.msk.f32.vlgmr.msra.gmra.mxu1 %vm618_vm2, %v726_v3  ;;  %2064 = vmatprep.subr.mxu1 %v923_v1 }
 0x346   : > { %2079 = vmatprep.subr.msk.mxu0 %vm618_vm2, %v1173_v4  ;;  %2065 = vmatpush3.msra.mxu1 %v923_v1  ;;  %v1169_v14 = vpop.permute.xlu0 %1168 }
 0x347   : > { %2074 = vmatprep.subr.mxu1 %v446_v9 }
 0x348   : > { %v1171_v15 = vpop.permute.xlu1 %1170 }
 0x34a   : > { %v2150_v5 = vpop.eup %2149 }
 0x34b   : > { %v921_v8 = vmul.f32 %v2150_v5, %v2142_v53  ;;  %v449_v5 = vld [vmem:[%s2436_s6 + $0x18] sm:$0xff] }
 0x34c   : > { %v2152_v6 = vpop.eup %2151 }
 0x34d   : > { %v920_v7 = vmul.f32 %v2152_v6, %v2144_v55 }
 0x34f   : > { %2066 = vmatprep.mubr.msk.f32.mxu1 %vm618_vm2, %v920_v7 }
 0x350   : > { %2067 = vmatmul.mubr.msk.f32.vlgmr.msra.gmra.mxu1 %vm618_vm2, %v921_v8 }
 0x351   : > { %2075 = vmatpush3.msra.mxu1 %v446_v9 }
 0x405   : > { %v2058_v10 = vpop.f32.mrf.mxu1 }
 0x407   : > { %v802_v11 = vpop.f32.mrf.mxu1 }
 0x408   : > { %2076 = vmatprep.mubr.msk.f32.mxu1 %vm618_vm2, %v802_v11 }
 0x409   : > { %2077 = vmatmul.mubr.msk.f32.vlgmr.msra.gmra.mxu1 %vm618_vm2, %v2058_v10 }
 0x410   : > { %v2068_v12 = vpop.f32.mrf.mxu1 }
 0x412   : > { %v997_v13 = vpop.f32.mrf.mxu1 }
 0x413   : > { %2071 = vmatprep.mubr.msk.f32.mxu0 %vm618_vm2, %v997_v13 }
 0x414   : > { %2072 = vmatmul.mubr.msk.f32.vlgmr.msra.gmra.mxu0 %vm618_vm2, %v2068_v12 }
 0x415   : > { %2080 = vmatpush3.xpose.msk.msra.mxu0 %vm618_vm2, %v1173_v4  ;;  %2081 = vmatprep.mubr.msk.f32.mxu0 %vm618_vm2, %v1169_v14 }
 0x416   : > { %2089 = vmatprep.subr.mxu0 %v448_v47 }
 0x418   : > { %2082 = vmatmul.mubr.msk.f32.vlgmr.msra.gmra.mxu0 %vm618_vm2, %v1171_v15  ;;  %v1735_v15 = vld [vmem:[%s2438_s8 + $0x18] sm:$0xff] }
 0x419   : > { %2090 = vmatpush3.msra.mxu0 %v448_v47 }
 0x4c9   : > { %v2078_v16 = vpop.f32.mrf.mxu1 }
 0x4cb   : > { %v2380_v48 = vpop.f32.mrf.mxu1 }
 0x4d4   : > { %v2073_v19 = vpop.f32.mrf.mxu0 }
 0x4d5   : > { %v2359_v20 = vadd.f32 %v2078_v16, %v2073_v19  ;;  %v1734_v16 = vld [vmem:[%s2438_s8 + $0x10] sm:$0xff]  ;;  %v1733_v19 = vld [vmem:[%s2438_s8 + $0x8] sm:$0xff] }
 0x4d6   : > { %v2361_v22 = vpop.f32.mrf.mxu0 }
 0x4d8   : > { %v2083_v23 = vpop.f32.mrf.mxu0 }
 0x4d9   : > { %v1256_v24 = vmul.f32 0.35355338, %v2083_v23  ;;  %v1160_v23 = vadd.f32 %v2380_v48, %v2361_v22 }
 0x4da   : > { %v1246_v25 = vpop.f32.mrf.mxu0 }
 0x4db   : > { %v1255_v26 = vmul.f32 0.35355338, %v1246_v25  ;;  %v1260_v27 = vsel %vm618_vm2, %v1256_v24, -inf }
 0x4dc   : > { %1261 = vmax.xlane.f32.xlu1 %v1260_v27 }
 0x4dd   : > { %v1257_v28 = vsel %vm618_vm2, %v1255_v26, -inf }
 0x4de   : > { %1258 = vmax.xlane.f32.xlu0 %v1257_v28  ;;  %v1964_v28 = vld [vmem:[%s2437_s7] ss:$0 sm:$0xff] }
 0x4ed   : > { %1279 = vrot.lane.b32.xlu1 %v2309_v18, %s2183_s27 }
 0x4f1   : > { %1446 = vrot.lane.b32.xlu1 %v2311_v21, %s2184_s28 }
 0x4f5   : > { %1448 = vrot.lane.b32.xlu1 %v2307_v17, %s2184_s28 }
 0x565   : > { %v1262_v29 = vpop.xlane.xlu1 %1261 }
 0x566   : > { %v1264_v30 = vsub.f32 %v1256_v24, %v1262_v29 }
 0x567   : > { %v1259_v31 = vpop.xlane.xlu0 %1258 }
 0x568   : > { %v1267_v32 = vmul.f32 1.442695, %v1264_v30  ;;  %v1263_v33 = vsub.f32 %v1255_v26, %v1259_v31 }
 0x569   : > { %v1280_v34 = vpop.permute.xlu1 %1279 }
 0x56a   : > { %2153 = vpow2.f32 %v1267_v32  ;;  %v1265_v35 = vmul.f32 1.442695, %v1263_v33  ;;  %2084 = vmatprep.subr.mxu1 %v1280_v34  ;;  %v1965_v32 = vld [vmem:[%s2439_s9] ss:$0 sm:$0xff] }
 0x56b   : > { %2085 = vmatpush3.msra.mxu1 %v1280_v34 }
 0x56c   : > { %2155 = vpow2.f32 %v1265_v35 }
 0x56d   : > { %v1447_v43 = vpop.permute.xlu1 %1446 }
 0x571   : > { %v1449_v46 = vpop.permute.xlu1 %1448 }
 0x577   : > { %v2154_v36 = vpop.eup %2153 }
 0x578   : > { %v1272_v37 = vsel %vm618_vm2, %v2154_v36, 0.0 }
 0x579   : > { %v2156_v38 = vpop.eup %2155  ;;  %1273 = vadd.xlane.f32.xlu0 %v1272_v37 }
 0x57a   : > { %v1269_v21 = vsel %vm618_vm2, %v2156_v38, 0.0 }
 0x57d   : > { %1270 = vadd.xlane.f32.xlu0 %v1269_v21 }
 0x593   : > { %1450 = vrot.lane.b32.xlu0 %v2309_v18, %s2184_s28 }
 0x602   : > { %v1274_v17 = vpop.xlane.xlu0 %1273 }
 0x603   : > { %2157 = vrcp.f32 %v1274_v17 }
 0x606   : > { %v1271_v39 = vpop.xlane.xlu0 %1270 }
 0x607   : > { %2159 = vrcp.f32 %v1271_v39 }
 0x60a   : > { %v1451_v40 = vpop.permute.xlu0 %1450 }
 0x60b   : > { %2094 = vmatprep.subr.msk.mxu1 %vm618_vm2, %v1451_v40 }
 0x610   : > { %v2158_v41 = vpop.eup %2157 }
 0x611   : > { %v1278_v45 = vmul.f32 %v2158_v41, %v2154_v36  ;;  %v1969_v41 = vld [vmem:[#allocation2] ss:$0 sm:$0xff] }
 0x614   : > { %v2160_v42 = vpop.eup %2159 }
 0x615   : > { %v1277_v44 = vmul.f32 %v2160_v42, %v2156_v38  ;;  %v1968_v38 = vld [vmem:[%s2440_s10] ss:$0 sm:$0xff] }
 0x617   : > { %2086 = vmatprep.mubr.msk.f32.mxu1 %vm618_vm2, %v1277_v44 }
 0x618   : > { %2087 = vmatmul.mubr.msk.f32.vlgmr.msra.gmra.mxu1 %vm618_vm2, %v1278_v45 }
 0x619   : > { %2095 = vmatpush3.xpose.msk.msra.mxu1 %vm618_vm2, %v1451_v40  ;;  %2096 = vmatprep.mubr.msk.f32.mxu1 %vm618_vm2, %v1447_v43 }
 0x61a   : > { %2104 = vmatprep.subr.mxu1 %v449_v5 }
 0x61c   : > { %2097 = vmatmul.mubr.msk.f32.vlgmr.msra.gmra.mxu1 %vm618_vm2, %v1449_v46 }
 0x61d   : > { %2105 = vmatpush3.msra.mxu1 %v449_v5 }
 0x6d8   : > { %v2088_v49 = vpop.f32.mrf.mxu1 }
 0x6da   : > { %v1354_v50 = vpop.f32.mrf.mxu1 }
 0x6db   : > { %2091 = vmatprep.mubr.msk.f32.mxu0 %vm618_vm2, %v1354_v50 }
 0x6dc   : > { %2092 = vmatmul.mubr.msk.f32.vlgmr.msra.gmra.mxu0 %vm618_vm2, %v2088_v49  ;;  %v2098_v51 = vpop.f32.mrf.mxu1 }
 0x6dd   : > { %v1534_v52 = vmul.f32 0.35355338, %v2098_v51 }
 0x6de   : > { %v1524_v53 = vpop.f32.mrf.mxu1 }
 0x6df   : > { %v1533_v54 = vmul.f32 0.35355338, %v1524_v53  ;;  %v1538_v55 = vsel %vm618_vm2, %v1534_v52, -inf }
 0x6e0   : > { %1539 = vmax.xlane.f32.xlu1 %v1538_v55 }
 0x6e1   : > { %v1535_v56 = vsel %vm618_vm2, %v1533_v54, -inf }
 0x6e2   : > { %1536 = vmax.xlane.f32.xlu0 %v1535_v56 }
 0x6f1   : > { %1557 = vrot.lane.b32.xlu1 %v2309_v18, %s2185_s13 }
 0x769   : > { %v1540_v57 = vpop.xlane.xlu1 %1539 }
 0x76a   : > { %v1542_v58 = vsub.f32 %v1534_v52, %v1540_v57 }
 0x76b   : > { %v1537_v59 = vpop.xlane.xlu0 %1536 }
 0x76c   : > { %v1541_v60 = vsub.f32 %v1533_v54, %v1537_v59  ;;  %v1545_v62 = vmul.f32 1.442695, %v1542_v58 }
 0x76d   : > { %v1558_v61 = vpop.permute.xlu1 %1557 }
 0x76e   : > { %v1543_v63 = vmul.f32 1.442695, %v1541_v60  ;;  %2099 = vmatprep.subr.mxu0 %v1558_v61 }
 0x76f   : > { %2100 = vmatpush3.msra.mxu0 %v1558_v61 }
 0x770   : > { %2161 = vpow2.f32 %v1543_v63  ;;  %2109 = vmatprep.subr.mxu0 %v1735_v15 }
 0x771   : > { %2163 = vpow2.f32 %v1545_v62 }
 0x77d   : > { %v2162_v0 = vpop.eup %2161 }
 0x77e   : > { %v1547_v1 = vsel %vm618_vm2, %v2162_v0, 0.0  ;;  %v2164_v2 = vpop.eup %2163 }
 0x77f   : > { %1548 = vadd.xlane.f32.xlu0 %v1547_v1  ;;  %v1550_v3 = vsel %vm618_vm2, %v2164_v2, 0.0 }
 0x783   : > { %1551 = vadd.xlane.f32.xlu0 %v1550_v3 }
 0x79c   : > { %v2093_v18 = vpop.f32.mrf.mxu0 }
 0x79d   : > { %v1445_v4 = vadd.f32 %v2093_v18, %v2359_v20  ;;  %v1732_v20 = vld [vmem:[%s2438_s8] sm:$0xff] }
 0x79e   : > { %v1435_v12 = vpop.f32.mrf.mxu0 }
 0x79f   : > { %v1444_v25 = vadd.f32 %v1435_v12, %v1160_v23 }
 0x808   : > { %v1549_v6 = vpop.xlane.xlu0 %1548 }
 0x809   : > { %2165 = vrcp.f32 %v1549_v6 }
 0x80c   : > { %v1552_v7 = vpop.xlane.xlu0 %1551 }
 0x80d   : > { %2167 = vrcp.f32 %v1552_v7 }
 0x816   : > { %v2166_v8 = vpop.eup %2165 }
 0x817   : > { %v1555_v9 = vmul.f32 %v2166_v8, %v2162_v0 }
 0x819   : > { %2101 = vmatprep.mubr.msk.f32.mxu0 %vm618_vm2, %v1555_v9 }
 0x81a   : > { %v2168_v10 = vpop.eup %2167 }
 0x81b   : > { %v1556_v11 = vmul.f32 %v2168_v10, %v2164_v2 }
 0x81d   : > { %2102 = vmatmul.mubr.msk.f32.vlgmr.msra.gmra.mxu0 %vm618_vm2, %v1556_v11 }
 0x81e   : > { %2110 = vmatpush3.msra.mxu0 %v1735_v15 }
 0x81f   : > { %2111 = vmatprep.subr.mxu0 %v1734_v16 }
 0x820   : > { %2112 = vmatpush3.msra.mxu0 %v1734_v16 }
 0x821   : > { %2113 = vmatprep.subr.mxu0 %v1733_v19 }
 0x822   : > { %2114 = vmatpush3.msra.mxu0 %v1733_v19 }
 0x823   : > { %2115 = vmatprep.subr.mxu0 %v1732_v20 }
 0x824   : > { %2116 = vmatpush3.msra.mxu0 %v1732_v20 }
 0x8dd   : > { %v2103_v13 = vpop.f32.mrf.mxu0 }
 0x8df   : > { %v1632_v14 = vpop.f32.mrf.mxu0 }
 0x8e0   : > { %2106 = vmatprep.mubr.msk.f32.mxu1 %vm618_vm2, %v1632_v14 }
 0x8e1   : > { %2107 = vmatmul.mubr.msk.f32.vlgmr.msra.gmra.mxu1 %vm618_vm2, %v2103_v13 }
 0x9a1   : > { %v2108_v24 = vpop.f32.mrf.mxu1 }
 0x9a2   : > { %v1723_v26 = vadd.f32 %v2108_v24, %v1445_v4 }
 0x9a3   : > { %v1713_v27 = vpop.f32.mrf.mxu1 }
 0x9a4   : > { %v1722_v29 = vadd.f32 %v1713_v27, %v1444_v25  ;;  %v1731_v31 = vadd.f32 %v1964_v28, %v1723_v26 }
 0x9a6   : > { %v1730_v30 = vadd.f32 %v1964_v28, %v1722_v29 }
 0x9a8   : > { %2117 = vmatprep.mubr.msk.f32.mxu0 %vm457_vm0, %v1730_v30 }
 0x9a9   : > { %2118 = vmatmul.mubr.msk.f32.vlgmr.msra.gmra.mxu0 %vm457_vm0, %v1731_v31 }
 0xa69   : > { %v2119_v22 = vpop.f32.mrf.mxu0 }
 0xa6a   : > { %v1821_v33 = vadd.f32 %v2119_v22, %v1965_v32 }
 0xa6b   : > { %v1815_v34 = vpop.f32.mrf.mxu0 }
 0xa6c   : > { %v1816_v35 = vadd.f32 %v1965_v32, %v1815_v34  ;;  %v1825_v36 = vmax.f32 %v1821_v33, 0.0 }
 0xa6e   : > { %v1824_v37 = vmax.f32 %v1816_v35, 0.0  ;;  %v1834_v39 = vmul.f32 %v1968_v38, %v1825_v36 }
 0xa70   : > { %v1833_v21 = vmul.f32 %v1968_v38, %v1824_v37  ;;  %v1839_v40 = vsel %vm1835_vm3, %v1834_v39, 0.0 }
 0xa72   : > { %v1836_v17 = vsel %vm1835_vm3, %v1833_v21, 0.0 }
 0xa73   : > { %1837 = vadd.xlane.f32.xlu0 %v1836_v17 }
 0xa77   : > { %1840 = vadd.xlane.f32.xlu0 %v1839_v40 }
 0xafc   : > { %v1838_v42 = vpop.xlane.xlu0 %1837 }
 0xafd   : > { %v1849_v43 = vadd.f32 %v1969_v41, %v1838_v42 }
 0xaff   : > { %1852 = vst.msk [vmem:[%s432_s16] sm:$0xff] %vm1851_vm4, %v1849_v43 }
 0xb00   : > { %v1841_v44 = vpop.xlane.xlu0 %1840 }
 0xb01   : > { %v1850_v45 = vadd.f32 %v1969_v41, %v1841_v44 }
 0xb03   : > { %1853 = vst.msk [vmem:[%s432_s16 + $0x8] sm:$0xff] %vm1851_vm4, %v1850_v45 }
 0xb04 PF: > { %s24_s23 = sadd.s32 1, %s2175_s23  }
 0xb05   : > { %p21_p4 = scmp.ge.s32.totalorder %s24_s23, 4  }
 0xb07   :  { %23 = sbr.rel (!%p21_p4) target bundleno = 3 (0x3), region = 101 }

</bundles_post_ra>
